<compile_context>
chip_gen: v5e
topology: v5e:2x2
jax: 0.10.0
libtpu: 0.0.40
codegen_flags: <defaults>
</compile_context>

<pallas_src>
import functools

import jax
import jax.numpy as jnp
from jax.experimental import pallas as pl
from jax.experimental.pallas import tpu as pltpu


# Weight-slab slot index per (transposed / split / zero-padded) weight matrix.
_W_SLOT = {
    "xyz": 0, "shape1": 1, "cat_h": 2, "cat_x": 3, "shape2": 4, "enc": 5,
    "sigma": 6, "view_h": 7, "view_x": 8, "tex1": 9, "rgb1": 10, "rgb2": 11,
}
# Bias-slab lane (column) index per layer.
_B_COL = {
    "xyz": 0, "shape1": 1, "cat": 2, "shape2": 3, "enc": 4, "sigma": 5,
    "view": 6, "tex1": 7, "rgb1": 8, "rgb2": 9,
}
# Hoisted latent-projection column index in the z slab.
_Z_COL = {"shape_lat1": 0, "cat_lat": 1, "shape_lat2": 2, "tex_lat1": 3}


def codenerf_kernel(x_ref, z_ref, w_ref, b_ref, out_ref, *, emb1, emb2, W, slot_r):
    """One lane tile of the CodeNeRF forward in feature-major layout.

    x_ref:   (emb1+emb2, TILE) bf16  merged positional + view embeddings (transposed)
    z_ref:   (W, 4) f32              hoisted latent projections (columns, see _Z_COL)
    w_ref:   (12*slot_r, slot_c) bf16 packed transposed weights (one slot per layer)
    b_ref:   (slot_r, 16) f32        packed biases (out-features on sublanes)
    out_ref: (8, TILE) f32           row 0 = sigma, rows 1:4 = rgb, rows 4:8 = padding
    """
    D = emb1 + emb2
    half = W // 2
    relu = lambda t: jnp.maximum(t, 0.0)
    bf16 = lambda t: t.astype(jnp.bfloat16)

    def wmat(name, rows, cols):
        s = _W_SLOT[name] * slot_r
        return w_ref[s:s + rows, :cols]                       # (rows, cols) bf16

    def bias(name, rows):
        c = _B_COL[name]
        return b_ref[:rows, c:c + 1]                          # (rows, 1) f32

    def zcol(name):
        c = _Z_COL[name]
        return z_ref[:, c:c + 1]                              # (W, 1) f32

    def lin(act, w_name, b_name, rows, cols):
        return jnp.dot(wmat(w_name, rows, cols), act,
                       preferred_element_type=jnp.float32) + bias(b_name, rows)

    x = x_ref[...]                                            # (D, TILE) bf16

    # encoding_xyz: the xyz weight's view-embedding columns are zero-padded, so
    # the merged input slab can be used directly (no sublane slicing).
    y = relu(lin(x, "xyz", "xyz", W, D))                      # (W, TILE) f32

    # shape block 1
    y = relu(lin(bf16(y + zcol("shape_lat1")), "shape1", "shape1", W, W))

    # shape block 2 (do_cat=True): cat-latent add, then cat_layer as a
    # split-weight sum.  The x-contribution dot depends only on x, so it can
    # overlap with the y-chain (kept split instead of a stacked-K concat).
    y = y + zcol("cat_lat")
    y = relu(lin(bf16(y), "cat_h", "cat", W, W)
             + jnp.dot(wmat("cat_x", W, D), x, preferred_element_type=jnp.float32))
    y = relu(lin(bf16(y + zcol("shape_lat2")), "shape2", "shape2", W, W))

    # encoding_shape (no activation)
    y = lin(bf16(y), "enc", "enc", W, W)

    # sigma head (noise_std=None path)
    sigma = lin(bf16(y), "sigma", "sigma", 1, W) * 10.0       # (1, TILE)

    # encoding_viewdir over cat(y, x2), also as a split-weight sum (view_x is
    # zero-padded so the x1 rows of the merged slab contribute nothing).
    y = relu(lin(bf16(y), "view_h", "view", W, W)
             + jnp.dot(wmat("view_x", W, D), x, preferred_element_type=jnp.float32))

    # texture block 1
    y = relu(lin(bf16(y + zcol("tex_lat1")), "tex1", "tex1", W, W))

    # rgb head
    h = relu(lin(bf16(y), "rgb1", "rgb1", half, W))           # (half, TILE)
    rgb = jax.nn.sigmoid(lin(bf16(h), "rgb2", "rgb2", 3, half))  # (3, TILE)

    # Single lane-dense, full-sublane-group store (no masked partial stores).
    pad = jnp.zeros((4,) + sigma.shape[1:], jnp.float32)
    out_ref[...] = jnp.concatenate([sigma, rgb, pad], axis=0).astype(out_ref.dtype)


def pack_params(params, emb1, emb2, W):
    """Pack all (transposed, cat-split, zero-padded) weights into one bf16 slab
    and all biases into one small f32 slab (out-features on sublanes, layer on
    lanes).  The latent-projection layers are hoisted to the wrapper and are
    not part of the slabs."""
    half = W // 2
    D = emb1 + emb2
    slot_r = -(-W // 16) * 16                       # rows per weight slot (bf16 sublane pack)
    slot_c = max(D, W, half)                        # max fan-in (lane width)

    w_cat, w_view = params["w_cat"], params["w_view"]
    # name -> (matrix, starting column inside the slot)
    mats = {
        "xyz":    (params["w_xyz"].T, 0),           # (W, emb1); view columns stay zero
        "shape1": (params["w_shape1"].T, 0),
        # cat([y, x1]) @ w_cat == y @ w_cat[:W] + x1 @ w_cat[W:]
        "cat_h":  (w_cat[:W].T, 0),
        "cat_x":  (w_cat[W:].T, 0),                 # (W, emb1); view columns stay zero
        "shape2": (params["w_shape2"].T, 0),
        "enc":    (params["w_enc"].T, 0),
        "sigma":  (params["w_sigma"].T, 0),
        "view_h": (w_view[:W].T, 0),
        "view_x": (w_view[W:].T, emb1),             # (W, emb2) placed at the x2 rows
        "tex1":   (params["w_tex1"].T, 0),
        "rgb1":   (params["w_rgb1"].T, 0),
        "rgb2":   (params["w_rgb2"].T, 0),
    }
    w_slab = jnp.zeros((len(_W_SLOT) * slot_r, slot_c), jnp.bfloat16)
    for name, slot in _W_SLOT.items():
        m, c0 = mats[name]
        r, c = m.shape
        w_slab = w_slab.at[slot * slot_r: slot * slot_r + r,
                           c0:c0 + c].set(m.astype(jnp.bfloat16))

    n_cols = -(-len(_B_COL) // 8) * 8
    b_slab = jnp.zeros((slot_r, n_cols), jnp.float32)
    for name, col in _B_COL.items():
        bvec = params[f"b_{name}"]
        b_slab = b_slab.at[: bvec.shape[0], col].set(bvec)
    return w_slab, b_slab, slot_r


def _pick_tile(n, min_tile=512, max_tile=4096):
    """Largest multiple of min_tile (<= max_tile) that keeps a grid of >= 2
    "parallel" steps so v7x's two TensorCores both get work; tiny N falls back
    to a single min_tile step."""
    n_ceil = -(-n // min_tile) * min_tile
    if n_ceil <= min_tile:
        return min_tile
    tile = min(max_tile, (n_ceil // 2) // min_tile * min_tile)
    return max(tile, min_tile)


def codenerf_forward(x, shape_latent, texture_latent, params, *,
                     emb1, emb2, W=32, latent_dim=32, tile=None):
    """x: (..., emb1+emb2) f32; latents: (latent_dim,) f32.
    Returns (sigmas (..., 1), rgbs (..., 3)) in float32."""
    lead = x.shape[:-1]
    D = x.shape[-1]
    assert D == emb1 + emb2
    assert jnp.ravel(shape_latent).shape[0] == latent_dim
    assert jnp.ravel(texture_latent).shape[0] == latent_dim

    xf = x.reshape(-1, D)
    N = xf.shape[0]
    if tile is None:
        tile = _pick_tile(N)
    assert tile % 128 == 0, "lane tile must be a multiple of 128"
    n_pad = -(-N // tile) * tile
    if n_pad != N:
        xf = jnp.pad(xf, ((0, n_pad - N), (0, 0)))

    # Feature-major layout (points on the 128-lane axis).  Cast to bf16 BEFORE
    # transposing so the wrapper-side repack moves half the bytes.
    xt = xf.astype(jnp.bfloat16).T                  # (D, n_pad) bf16, merged x1|x2

    # Grid-invariant latent projections, hoisted out of the kernel (same
    # bf16-matmul / f32-accumulate policy as the in-kernel layers).
    def latent_proj(lat, name):
        z = jnp.dot(jnp.ravel(lat).astype(jnp.bfloat16),
                    params[f"w_{name}"].astype(jnp.bfloat16),
                    preferred_element_type=jnp.float32) + params[f"b_{name}"]
        return jnp.maximum(z, 0.0)                  # (W,) f32

    z_slab = jnp.stack(
        [latent_proj(shape_latent, "shape_lat1"),
         latent_proj(shape_latent, "cat_lat"),
         latent_proj(shape_latent, "shape_lat2"),
         latent_proj(texture_latent, "tex_lat1")], axis=1)    # (W, 4) f32

    w_slab, b_slab, slot_r = pack_params(params, emb1, emb2, W)

    half = W // 2
    macs_per_pt = (D * W + W * W                    # xyz, shape1
                   + W * W + D * W                  # cat_h, cat_x
                   + W * W + W * W + W              # shape2, enc, sigma
                   + W * W + D * W                  # view_h, view_x
                   + W * W + W * half + half * 3)   # tex1, rgb1, rgb2
    cost = pl.CostEstimate(
        flops=int(2 * macs_per_pt * n_pad),
        transcendentals=int(3 * n_pad),
        bytes_accessed=int(D * 2 * n_pad + 8 * 4 * n_pad
                           + w_slab.size * 2 + b_slab.size * 4 + z_slab.size * 4),
    )

    grid = (n_pad // tile,)
    kernel = functools.partial(codenerf_kernel, emb1=emb1, emb2=emb2, W=W,
                               slot_r=slot_r)

    packed = pl.pallas_call(
        kernel,
        out_shape=jax.ShapeDtypeStruct((8, n_pad), jnp.float32),
        grid_spec=pltpu.PrefetchScalarGridSpec(
            num_scalar_prefetch=0,
            grid=grid,
            in_specs=[
                pl.BlockSpec((D, tile), lambda i: (0, i)),
                pl.BlockSpec(z_slab.shape, lambda i: (0, 0)),
                pl.BlockSpec(w_slab.shape, lambda i: (0, 0)),
                pl.BlockSpec(b_slab.shape, lambda i: (0, 0)),
            ],
            out_specs=pl.BlockSpec((8, tile), lambda i: (0, i)),
        ),
        compiler_params=pltpu.CompilerParams(
            dimension_semantics=("parallel",),
        ),
        cost_estimate=cost,
    )(xt, z_slab, w_slab, b_slab)

    sigmas = packed[0, :N].reshape(*lead, 1)
    rgbs = packed[1:4, :N].T.reshape(*lead, 3)
    return sigmas, rgbs


def init_params(key, emb1, emb2, W=32, latent_dim=32):
    """PyTorch-default nn.Linear init (uniform +-1/sqrt(fan_in)) for the CodeNeRF
    layer set with shape_blocks=2, texture_blocks=1."""
    layers = [
        ("xyz", emb1, W), ("shape_lat1", latent_dim, W), ("shape1", W, W),
        ("cat_lat", latent_dim, W), ("cat", W + emb1, W),
        ("shape_lat2", latent_dim, W), ("shape2", W, W),
        ("enc", W, W), ("sigma", W, 1),
        ("view", W + emb2, W), ("tex_lat1", latent_dim, W), ("tex1", W, W),
        ("rgb1", W, W // 2), ("rgb2", W // 2, 3),
    ]
    params = {}
    keys = jax.random.split(key, len(layers))
    for k, (name, fan_in, fan_out) in zip(keys, layers):
        kw, kb = jax.random.split(k)
        bound = 1.0 / (fan_in ** 0.5)
        params[f"w_{name}"] = jax.random.uniform(kw, (fan_in, fan_out),
                                                 jnp.float32, -bound, bound)
        params[f"b_{name}"] = jax.random.uniform(kb, (fan_out,),
                                                 jnp.float32, -bound, bound)
    return params


def reference_forward(x, shape_latent, texture_latent, params, emb1):
    """Pure-JAX reference mirroring the PyTorch forward (do_cat=True,
    noise_std=None) with the same bf16-matmul / f32-accumulate policy."""
    bf = lambda t: t.astype(jnp.bfloat16)
    relu = lambda t: jnp.maximum(t, 0.0)

    def lin(h, name):
        return jnp.dot(bf(h), bf(params[f"w_{name}"]),
                       preferred_element_type=jnp.float32) + params[f"b_{name}"]

    x1 = x[..., :emb1]
    x2 = x[..., emb1:]
    sl = jnp.ravel(shape_latent)[None, :]
    tl = jnp.ravel(texture_latent)[None, :]

    y = relu(lin(x1, "xyz"))
    y = relu(lin(y + relu(lin(sl, "shape_lat1")), "shape1"))
    y = y + relu(lin(sl, "cat_lat"))
    y = relu(lin(jnp.concatenate([y, x1], axis=-1), "cat"))
    y = relu(lin(y + relu(lin(sl, "shape_lat2")), "shape2"))
    y = lin(y, "enc")
    sigmas = lin(y, "sigma") * 10.0
    y = relu(lin(jnp.concatenate([y, x2], axis=-1), "view"))
    y = relu(lin(y + relu(lin(tl, "tex_lat1")), "tex1"))
    rgbs = jax.nn.sigmoid(lin(relu(lin(y, "rgb1")), "rgb2"))
    return sigmas, rgbs


if __name__ == "__main__":
    emb1, emb2, W, latent_dim = 24, 12, 32, 32
    n_rays, n_samples = 25, 80            # 2000 points -> tile=1024, grid of 2 steps

    key = jax.random.PRNGKey(0)
    kx, ks, kt, kp = jax.random.split(key, 4)
    x = jax.random.normal(kx, (n_rays, n_samples, emb1 + emb2), jnp.float32)
    shape_latent = jax.random.normal(ks, (latent_dim,), jnp.float32)
    texture_latent = jax.random.normal(kt, (latent_dim,), jnp.float32)
    params = init_params(kp, emb1, emb2, W, latent_dim)

    sigmas, rgbs = codenerf_forward(x, shape_latent, texture_latent, params,
                                    emb1=emb1, emb2=emb2, W=W,
                                    latent_dim=latent_dim)
    sigmas = jax.block_until_ready(sigmas)
    rgbs = jax.block_until_ready(rgbs)

    ref_s, ref_c = reference_forward(x, shape_latent, texture_latent, params, emb1)
    assert sigmas.shape == (n_rays, n_samples, 1)
    assert rgbs.shape == (n_rays, n_samples, 3)
    # Kernel and reference share the bf16-matmul / f32-accumulate precision policy;
    # remaining differences are f32 accumulation-order only.
    assert jnp.allclose(sigmas, ref_s, atol=1e-2, rtol=1e-2), float(jnp.max(jnp.abs(sigmas - ref_s)))
    assert jnp.allclose(rgbs, ref_c, atol=1e-2, rtol=1e-2), float(jnp.max(jnp.abs(rgbs - ref_c)))

    print("KERNEL_OK")
</pallas_src>

<mosaic_0001>
module attributes {stable_mosaic.version = 11 : i64} {
  func.func @codenerf_kernel(%arg0: i32, %arg1: memref<36x1024xbf16, #tpu.memory_space<vmem>>, %arg2: memref<32x4xf32, #tpu.memory_space<vmem>>, %arg3: memref<384x36xbf16, #tpu.memory_space<vmem>>, %arg4: memref<32x16xf32, #tpu.memory_space<vmem>>, %arg5: memref<8x1024xf32, #tpu.memory_space<vmem>>) attributes {dimension_semantics = [#tpu.dimension_semantics<parallel>], iteration_bounds = array<i64: 2>, scalar_prefetch = 0 : i64, scratch_operands = 0 : i64, tpu.core_type = #tpu.core_type<tc>, window_params = [{transform_indices = @transform_0, window_bounds = array<i64: 36, 1024>}, {pipeline_mode = #tpu.pipeline_mode<synchronous>, transform_indices = @transform_1, window_bounds = array<i64: 32, 4>}, {pipeline_mode = #tpu.pipeline_mode<synchronous>, transform_indices = @transform_2, window_bounds = array<i64: 384, 36>}, {pipeline_mode = #tpu.pipeline_mode<synchronous>, transform_indices = @transform_3, window_bounds = array<i64: 32, 16>}, {transform_indices = @transform_4, window_bounds = array<i64: 8, 1024>}]} {
    %c0 = arith.constant 0 : index
    %c0_0 = arith.constant 0 : index
    %0 = vector.load %arg1[%c0, %c0_0] : memref<36x1024xbf16, #tpu.memory_space<vmem>>, vector<36x1024xbf16>
    %c0_1 = arith.constant 0 : index
    %c0_2 = arith.constant 0 : index
    %1 = vector.load %arg3[%c0_1, %c0_2] : memref<384x36xbf16, #tpu.memory_space<vmem>>, vector<32x36xbf16>
    %cst = arith.constant dense<0.000000e+00> : vector<32x1024xf32>
    %2 = tpu.matmul %1, %0, %cst {dimension_numbers = #tpu.dot_dimension_numbers<[1], [0], [0], [1], [0, 0, 1, 1], [], []>} : vector<32x36xbf16>, vector<36x1024xbf16>, vector<32x1024xf32> -> vector<32x1024xf32>
    %c0_3 = arith.constant 0 : index
    %c0_4 = arith.constant 0 : index
    %3 = vector.load %arg4[%c0_3, %c0_4] : memref<32x16xf32, #tpu.memory_space<vmem>>, vector<32x1xf32>
    %4 = vector.broadcast %3 : vector<32x1xf32> to vector<32x1024xf32>
    %5 = arith.addf %2, %4 : vector<32x1024xf32>
    %cst_5 = arith.constant 0.000000e+00 : f32
    %6 = vector.broadcast %cst_5 : f32 to vector<32x1024xf32>
    %7 = arith.maximumf %5, %6 : vector<32x1024xf32>
    %c0_6 = arith.constant 0 : index
    %c0_7 = arith.constant 0 : index
    %8 = vector.load %arg2[%c0_6, %c0_7] : memref<32x4xf32, #tpu.memory_space<vmem>>, vector<32x1xf32>
    %9 = vector.broadcast %8 : vector<32x1xf32> to vector<32x1024xf32>
    %10 = arith.addf %7, %9 : vector<32x1024xf32>
    %11 = arith.truncf %10 : vector<32x1024xf32> to vector<32x1024xbf16>
    %c32 = arith.constant 32 : index
    %c0_8 = arith.constant 0 : index
    %12 = vector.load %arg3[%c32, %c0_8] : memref<384x36xbf16, #tpu.memory_space<vmem>>, vector<32x32xbf16>
    %cst_9 = arith.constant dense<0.000000e+00> : vector<32x1024xf32>
    %13 = tpu.matmul %12, %11, %cst_9 {dimension_numbers = #tpu.dot_dimension_numbers<[1], [0], [0], [1], [0, 0, 1, 1], [], []>} : vector<32x32xbf16>, vector<32x1024xbf16>, vector<32x1024xf32> -> vector<32x1024xf32>
    %c0_10 = arith.constant 0 : index
    %c1 = arith.constant 1 : index
    %14 = vector.load %arg4[%c0_10, %c1] : memref<32x16xf32, #tpu.memory_space<vmem>>, vector<32x1xf32>
    %15 = vector.broadcast %14 : vector<32x1xf32> to vector<32x1024xf32>
    %16 = arith.addf %13, %15 : vector<32x1024xf32>
    %cst_11 = arith.constant 0.000000e+00 : f32
    %17 = vector.broadcast %cst_11 : f32 to vector<32x1024xf32>
    %18 = arith.maximumf %16, %17 : vector<32x1024xf32>
    %c0_12 = arith.constant 0 : index
    %c1_13 = arith.constant 1 : index
    %19 = vector.load %arg2[%c0_12, %c1_13] : memref<32x4xf32, #tpu.memory_space<vmem>>, vector<32x1xf32>
    %20 = vector.broadcast %19 : vector<32x1xf32> to vector<32x1024xf32>
    %21 = arith.addf %18, %20 : vector<32x1024xf32>
    %22 = arith.truncf %21 : vector<32x1024xf32> to vector<32x1024xbf16>
    %c64 = arith.constant 64 : index
    %c0_14 = arith.constant 0 : index
    %23 = vector.load %arg3[%c64, %c0_14] : memref<384x36xbf16, #tpu.memory_space<vmem>>, vector<32x32xbf16>
    %cst_15 = arith.constant dense<0.000000e+00> : vector<32x1024xf32>
    %24 = tpu.matmul %23, %22, %cst_15 {dimension_numbers = #tpu.dot_dimension_numbers<[1], [0], [0], [1], [0, 0, 1, 1], [], []>} : vector<32x32xbf16>, vector<32x1024xbf16>, vector<32x1024xf32> -> vector<32x1024xf32>
    %c0_16 = arith.constant 0 : index
    %c2 = arith.constant 2 : index
    %25 = vector.load %arg4[%c0_16, %c2] : memref<32x16xf32, #tpu.memory_space<vmem>>, vector<32x1xf32>
    %26 = vector.broadcast %25 : vector<32x1xf32> to vector<32x1024xf32>
    %27 = arith.addf %24, %26 : vector<32x1024xf32>
    %c96 = arith.constant 96 : index
    %c0_17 = arith.constant 0 : index
    %28 = vector.load %arg3[%c96, %c0_17] : memref<384x36xbf16, #tpu.memory_space<vmem>>, vector<32x36xbf16>
    %cst_18 = arith.constant dense<0.000000e+00> : vector<32x1024xf32>
    %29 = tpu.matmul %28, %0, %cst_18 {dimension_numbers = #tpu.dot_dimension_numbers<[1], [0], [0], [1], [0, 0, 1, 1], [], []>} : vector<32x36xbf16>, vector<36x1024xbf16>, vector<32x1024xf32> -> vector<32x1024xf32>
    %30 = arith.addf %27, %29 : vector<32x1024xf32>
    %cst_19 = arith.constant 0.000000e+00 : f32
    %31 = vector.broadcast %cst_19 : f32 to vector<32x1024xf32>
    %32 = arith.maximumf %30, %31 : vector<32x1024xf32>
    %c0_20 = arith.constant 0 : index
    %c2_21 = arith.constant 2 : index
    %33 = vector.load %arg2[%c0_20, %c2_21] : memref<32x4xf32, #tpu.memory_space<vmem>>, vector<32x1xf32>
    %34 = vector.broadcast %33 : vector<32x1xf32> to vector<32x1024xf32>
    %35 = arith.addf %32, %34 : vector<32x1024xf32>
    %36 = arith.truncf %35 : vector<32x1024xf32> to vector<32x1024xbf16>
    %c128 = arith.constant 128 : index
    %c0_22 = arith.constant 0 : index
    %37 = vector.load %arg3[%c128, %c0_22] : memref<384x36xbf16, #tpu.memory_space<vmem>>, vector<32x32xbf16>
    %cst_23 = arith.constant dense<0.000000e+00> : vector<32x1024xf32>
    %38 = tpu.matmul %37, %36, %cst_23 {dimension_numbers = #tpu.dot_dimension_numbers<[1], [0], [0], [1], [0, 0, 1, 1], [], []>} : vector<32x32xbf16>, vector<32x1024xbf16>, vector<32x1024xf32> -> vector<32x1024xf32>
    %c0_24 = arith.constant 0 : index
    %c3 = arith.constant 3 : index
    %39 = vector.load %arg4[%c0_24, %c3] : memref<32x16xf32, #tpu.memory_space<vmem>>, vector<32x1xf32>
    %40 = vector.broadcast %39 : vector<32x1xf32> to vector<32x1024xf32>
    %41 = arith.addf %38, %40 : vector<32x1024xf32>
    %cst_25 = arith.constant 0.000000e+00 : f32
    %42 = vector.broadcast %cst_25 : f32 to vector<32x1024xf32>
    %43 = arith.maximumf %41, %42 : vector<32x1024xf32>
    %44 = arith.truncf %43 : vector<32x1024xf32> to vector<32x1024xbf16>
    %c160 = arith.constant 160 : index
    %c0_26 = arith.constant 0 : index
    %45 = vector.load %arg3[%c160, %c0_26] : memref<384x36xbf16, #tpu.memory_space<vmem>>, vector<32x32xbf16>
    %cst_27 = arith.constant dense<0.000000e+00> : vector<32x1024xf32>
    %46 = tpu.matmul %45, %44, %cst_27 {dimension_numbers = #tpu.dot_dimension_numbers<[1], [0], [0], [1], [0, 0, 1, 1], [], []>} : vector<32x32xbf16>, vector<32x1024xbf16>, vector<32x1024xf32> -> vector<32x1024xf32>
    %c0_28 = arith.constant 0 : index
    %c4 = arith.constant 4 : index
    %47 = vector.load %arg4[%c0_28, %c4] : memref<32x16xf32, #tpu.memory_space<vmem>>, vector<32x1xf32>
    %48 = vector.broadcast %47 : vector<32x1xf32> to vector<32x1024xf32>
    %49 = arith.addf %46, %48 : vector<32x1024xf32>
    %50 = arith.truncf %49 : vector<32x1024xf32> to vector<32x1024xbf16>
    %c192 = arith.constant 192 : index
    %c0_29 = arith.constant 0 : index
    %51 = vector.load %arg3[%c192, %c0_29] : memref<384x36xbf16, #tpu.memory_space<vmem>>, vector<1x32xbf16>
    %cst_30 = arith.constant dense<0.000000e+00> : vector<1x1024xf32>
    %52 = tpu.matmul %51, %50, %cst_30 {dimension_numbers = #tpu.dot_dimension_numbers<[1], [0], [0], [1], [0, 0, 1, 1], [], []>} : vector<1x32xbf16>, vector<32x1024xbf16>, vector<1x1024xf32> -> vector<1x1024xf32>
    %c0_31 = arith.constant 0 : index
    %c5 = arith.constant 5 : index
    %53 = vector.load %arg4[%c0_31, %c5] : memref<32x16xf32, #tpu.memory_space<vmem>>, vector<1x1xf32>
    %54 = vector.broadcast %53 : vector<1x1xf32> to vector<1x1024xf32>
    %55 = arith.addf %52, %54 : vector<1x1024xf32>
    %cst_32 = arith.constant 1.000000e+01 : f32
    %56 = vector.broadcast %cst_32 : f32 to vector<1x1024xf32>
    %57 = arith.mulf %55, %56 : vector<1x1024xf32>
    %58 = arith.truncf %49 : vector<32x1024xf32> to vector<32x1024xbf16>
    %c224 = arith.constant 224 : index
    %c0_33 = arith.constant 0 : index
    %59 = vector.load %arg3[%c224, %c0_33] : memref<384x36xbf16, #tpu.memory_space<vmem>>, vector<32x32xbf16>
    %cst_34 = arith.constant dense<0.000000e+00> : vector<32x1024xf32>
    %60 = tpu.matmul %59, %58, %cst_34 {dimension_numbers = #tpu.dot_dimension_numbers<[1], [0], [0], [1], [0, 0, 1, 1], [], []>} : vector<32x32xbf16>, vector<32x1024xbf16>, vector<32x1024xf32> -> vector<32x1024xf32>
    %c0_35 = arith.constant 0 : index
    %c6 = arith.constant 6 : index
    %61 = vector.load %arg4[%c0_35, %c6] : memref<32x16xf32, #tpu.memory_space<vmem>>, vector<32x1xf32>
    %62 = vector.broadcast %61 : vector<32x1xf32> to vector<32x1024xf32>
    %63 = arith.addf %60, %62 : vector<32x1024xf32>
    %c256 = arith.constant 256 : index
    %c0_36 = arith.constant 0 : index
    %64 = vector.load %arg3[%c256, %c0_36] : memref<384x36xbf16, #tpu.memory_space<vmem>>, vector<32x36xbf16>
    %cst_37 = arith.constant dense<0.000000e+00> : vector<32x1024xf32>
    %65 = tpu.matmul %64, %0, %cst_37 {dimension_numbers = #tpu.dot_dimension_numbers<[1], [0], [0], [1], [0, 0, 1, 1], [], []>} : vector<32x36xbf16>, vector<36x1024xbf16>, vector<32x1024xf32> -> vector<32x1024xf32>
    %66 = arith.addf %63, %65 : vector<32x1024xf32>
    %cst_38 = arith.constant 0.000000e+00 : f32
    %67 = vector.broadcast %cst_38 : f32 to vector<32x1024xf32>
    %68 = arith.maximumf %66, %67 : vector<32x1024xf32>
    %c0_39 = arith.constant 0 : index
    %c3_40 = arith.constant 3 : index
    %69 = vector.load %arg2[%c0_39, %c3_40] : memref<32x4xf32, #tpu.memory_space<vmem>>, vector<32x1xf32>
    %70 = vector.broadcast %69 : vector<32x1xf32> to vector<32x1024xf32>
    %71 = arith.addf %68, %70 : vector<32x1024xf32>
    %72 = arith.truncf %71 : vector<32x1024xf32> to vector<32x1024xbf16>
    %c288 = arith.constant 288 : index
    %c0_41 = arith.constant 0 : index
    %73 = vector.load %arg3[%c288, %c0_41] : memref<384x36xbf16, #tpu.memory_space<vmem>>, vector<32x32xbf16>
    %cst_42 = arith.constant dense<0.000000e+00> : vector<32x1024xf32>
    %74 = tpu.matmul %73, %72, %cst_42 {dimension_numbers = #tpu.dot_dimension_numbers<[1], [0], [0], [1], [0, 0, 1, 1], [], []>} : vector<32x32xbf16>, vector<32x1024xbf16>, vector<32x1024xf32> -> vector<32x1024xf32>
    %c0_43 = arith.constant 0 : index
    %c7 = arith.constant 7 : index
    %75 = vector.load %arg4[%c0_43, %c7] : memref<32x16xf32, #tpu.memory_space<vmem>>, vector<32x1xf32>
    %76 = vector.broadcast %75 : vector<32x1xf32> to vector<32x1024xf32>
    %77 = arith.addf %74, %76 : vector<32x1024xf32>
    %cst_44 = arith.constant 0.000000e+00 : f32
    %78 = vector.broadcast %cst_44 : f32 to vector<32x1024xf32>
    %79 = arith.maximumf %77, %78 : vector<32x1024xf32>
    %80 = arith.truncf %79 : vector<32x1024xf32> to vector<32x1024xbf16>
    %c320 = arith.constant 320 : index
    %c0_45 = arith.constant 0 : index
    %81 = vector.load %arg3[%c320, %c0_45] : memref<384x36xbf16, #tpu.memory_space<vmem>>, vector<16x32xbf16>
    %cst_46 = arith.constant dense<0.000000e+00> : vector<16x1024xf32>
    %82 = tpu.matmul %81, %80, %cst_46 {dimension_numbers = #tpu.dot_dimension_numbers<[1], [0], [0], [1], [0, 0, 1, 1], [], []>} : vector<16x32xbf16>, vector<32x1024xbf16>, vector<16x1024xf32> -> vector<16x1024xf32>
    %c0_47 = arith.constant 0 : index
    %c8 = arith.constant 8 : index
    %83 = vector.load %arg4[%c0_47, %c8] : memref<32x16xf32, #tpu.memory_space<vmem>>, vector<16x1xf32>
    %84 = vector.broadcast %83 : vector<16x1xf32> to vector<16x1024xf32>
    %85 = arith.addf %82, %84 : vector<16x1024xf32>
    %cst_48 = arith.constant 0.000000e+00 : f32
    %86 = vector.broadcast %cst_48 : f32 to vector<16x1024xf32>
    %87 = arith.maximumf %85, %86 : vector<16x1024xf32>
    %88 = arith.truncf %87 : vector<16x1024xf32> to vector<16x1024xbf16>
    %c352 = arith.constant 352 : index
    %c0_49 = arith.constant 0 : index
    %89 = vector.load %arg3[%c352, %c0_49] : memref<384x36xbf16, #tpu.memory_space<vmem>>, vector<3x16xbf16>
    %cst_50 = arith.constant dense<0.000000e+00> : vector<3x1024xf32>
    %90 = tpu.matmul %89, %88, %cst_50 {dimension_numbers = #tpu.dot_dimension_numbers<[1], [0], [0], [1], [0, 0, 1, 1], [], []>} : vector<3x16xbf16>, vector<16x1024xbf16>, vector<3x1024xf32> -> vector<3x1024xf32>
    %c0_51 = arith.constant 0 : index
    %c9 = arith.constant 9 : index
    %91 = vector.load %arg4[%c0_51, %c9] : memref<32x16xf32, #tpu.memory_space<vmem>>, vector<3x1xf32>
    %92 = vector.broadcast %91 : vector<3x1xf32> to vector<3x1024xf32>
    %93 = arith.addf %90, %92 : vector<3x1024xf32>
    %94 = arith.negf %93 : vector<3x1024xf32>
    %95 = math.exp %94 : vector<3x1024xf32>
    %cst_52 = arith.constant 1.000000e+00 : f32
    %96 = vector.broadcast %cst_52 : f32 to vector<3x1024xf32>
    %97 = arith.addf %96, %95 : vector<3x1024xf32>
    %98 = arith.divf %96, %97 : vector<3x1024xf32>
    %cst_53 = arith.constant 0.000000e+00 : f32
    %99 = vector.broadcast %cst_53 : f32 to vector<4x1024xf32>
    %100 = tpu.concatenate %57, %98, %99 in 0 : vector<1x1024xf32>, vector<3x1024xf32>, vector<4x1024xf32> -> vector<8x1024xf32>
    %c0_54 = arith.constant 0 : index
    %c0_55 = arith.constant 0 : index
    %101 = vector.load %arg5[%c0_54, %c0_55] : memref<8x1024xf32, #tpu.memory_space<vmem>>, vector<8x1024xf32>
    tpu.vector_store %arg5[%c0_54, %c0_55], %100 {strides = array<i32>} : memref<8x1024xf32, #tpu.memory_space<vmem>>, vector<8x1024xf32>,
    return
  }
  func.func @transform_0(%arg0: i32) -> (i32, i32) {
    %c0_i32 = arith.constant 0 : i32
    %c0_i32_0 = arith.constant 0 : i32
    return %c0_i32, %arg0 : i32, i32
  }
  func.func @transform_1(%arg0: i32) -> (i32, i32) {
    %c0_i32 = arith.constant 0 : i32
    %c0_i32_0 = arith.constant 0 : i32
    %c0_i32_1 = arith.constant 0 : i32
    return %c0_i32, %c0_i32_0 : i32, i32
  }
  func.func @transform_2(%arg0: i32) -> (i32, i32) {
    %c0_i32 = arith.constant 0 : i32
    %c0_i32_0 = arith.constant 0 : i32
    %c0_i32_1 = arith.constant 0 : i32
    return %c0_i32, %c0_i32_0 : i32, i32
  }
  func.func @transform_3(%arg0: i32) -> (i32, i32) {
    %c0_i32 = arith.constant 0 : i32
    %c0_i32_0 = arith.constant 0 : i32
    %c0_i32_1 = arith.constant 0 : i32
    return %c0_i32, %c0_i32_0 : i32, i32
  }
  func.func @transform_4(%arg0: i32) -> (i32, i32) {
    %c0_i32 = arith.constant 0 : i32
    %c0_i32_0 = arith.constant 0 : i32
    return %c0_i32, %arg0 : i32, i32
  }
}

</mosaic_0001>

<bundles_post_ra>
// kernel: tpu_custom_call.1
= control target key start
LH: loop header
LB: loop body
LE: loop exit
PB: predicated region body
PF: predicated region fallthrough
CT: control target
= control target key end

     0   :  { %9 = vsyncpa [#allocation4], 0  ;;  %s5436_s0 = inlined_call_operand.vmem [shape: bf16[36,2048], index: 0, kind: input, shape index: {}]   ;;  %s5437_s1 = inlined_call_operand.vmem [shape: f32[32,4], index: 1, kind: input, shape index: {}]   ;;  %s5438_s2 = inlined_call_operand.vmem [shape: bf16[384,36], index: 2, kind: input, shape index: {}]   ;;  %s5439_s3 = inlined_call_operand.vmem [shape: f32[32,16], index: 3, kind: input, shape index: {}]   ;;  %s5440_s4 = inlined_call_operand.hbm [shape: f32[8,2048], index: 4, kind: output, shape index: {}]  }
   0x1   :  { %11 = vsyncpa [#allocation4 + $0x1], 0  ;;  %s3902_s15 = smov 0   ;;  %s3904_s16 = smov 0  }
   0x2   :  { %s3906_s17 = smov 0   ;;  %s3908_s18 = smov 0  }
   0x3 LB: > { %s3318_s19 = sadd.s32 4294967295, %s3865_s18   ;;  %s3319_s20 = sadd.s32 4294967294, %s3865_s18   ;;  %s3865_s18 = sphi %s3908_s18, %s5528_s18   ;;  %s3861_s17 = sphi %s3906_s17, %s5527_s17   ;;  %s3857_s16 = sphi %s3904_s16, %s5526_s16   ;;  %s3853_s15 = sphi %s3902_s15, %s5525_s15  }
   0x4   : > { %s3925_s21 = sadd.s32 1, %s3865_s18   ;;  %s24_s22 = sadd.s32 1, %s3861_s17 }
   0x5   : > { %s21_s23 = ssub.s32 %s3865_s18, %s3925_s21  ;;  %p31_p0 = scmp.ne.s32.totalorder %s3861_s17, %s3857_s16 }
   0x6   : > { %p22_p1 = scmp.eq.s32.totalorder %s21_s23, 0  ;;  %p32_p2 = scmp.eq.s32.totalorder %s3865_s18, 0 }
   0x7   : > { %p124_p3 = scmp.eq.s32.totalorder %s3318_s19, 1  ;;  %p129_p4 = scmp.ne.s32.totalorder %s3857_s16, %s3853_s15 }
   0x8   : > { %s3938_s24 = scalar_select %p22_p1, %s3861_s17, %s24_s22  }
   0x9   : > { %p33_p5 = por %p32_p2, %p31_p0  ;;  %p3940_p6 = por %p124_p3, %p31_p0 }
   0xa   : > { %p130_p7 = scmp.eq.s32.totalorder %s3319_s20, 1  ;;  %p3321_p9 = scmp.ge.s32.totalorder %s3865_s18, 2 }
   0xc   : > { %p3944_p8 = por %p130_p7, %p129_p4  ;;  %155 = sbr.rel (%p3321_p9) target bundleno = 41 (0x29), region = 28 }
  0x11   : > { %158 = sbr.rel (!%p33_p5) target bundleno = 41 (0x29), region = 32  ;;  %s160_s27 = sand.u32 (%p33_p5), 1, %s3861_s17  }
  0x12   : > { %s3647_s28 = sshll.u32 (%p33_p5), %s3865_s18, 5  ;;  %s3684_s29 = smul.u32 (%p33_p5), 160, %s160_s27 }
  0x13   : > { %s3956_s6 = scalar_lea.vmem (%p33_p5), %s5436_s0, %s3647_s28 }
  0x14   : > { %v178_v0 = vld [vmem:[%s3956_s6] sm:$0xff] (%p33_p5)  ;;  %v180_v1 = vld [vmem:[%s3956_s6 + $0x8] sm:$0xff] (%p33_p5)  ;;  %v182_v2 = vld [vmem:[%s3956_s6 + $0x10] sm:$0xff] (%p33_p5)  ;;  %s3961_s7 = scalar_lea.vmem (%p33_p5), [#allocation2], %s3684_s29 }
  0x15   : > { %179 = vst [vmem:[%s3961_s7] sm:$0xff] (%p33_p5), %v178_v0  ;;  %v184_v3 = vld [vmem:[%s3956_s6 + $0x18] sm:$0xff] (%p33_p5)  ;;  %v186_v4 = vld [vmem:[%s3956_s6 + $0x40] sm:$0xff] (%p33_p5)  ;;  %v188_v5 = vld [vmem:[%s3956_s6 + $0x48] sm:$0xff] (%p33_p5) }
  0x16   : > { %181 = vst [vmem:[%s3961_s7 + $0x8] sm:$0xff] %v180_v1  ;;  %v190_v6 = vld [vmem:[%s3956_s6 + $0x50] sm:$0xff]  ;;  %v192_v7 = vld [vmem:[%s3956_s6 + $0x58] sm:$0xff]  ;;  %v194_v8 = vld [vmem:[%s3956_s6 + $0x80] sm:$0xff] }
  0x17   : > { %183 = vst [vmem:[%s3961_s7 + $0x10] sm:$0xff] %v182_v2  ;;  %v196_v9 = vld [vmem:[%s3956_s6 + $0x88] sm:$0xff]  ;;  %v198_v10 = vld [vmem:[%s3956_s6 + $0x90] sm:$0xff]  ;;  %v200_v11 = vld [vmem:[%s3956_s6 + $0x98] sm:$0xff] }
  0x18   : > { %185 = vst [vmem:[%s3961_s7 + $0x18] sm:$0xff] %v184_v3  ;;  %v202_v12 = vld [vmem:[%s3956_s6 + $0xc0] sm:$0xff]  ;;  %v204_v13 = vld [vmem:[%s3956_s6 + $0xc8] sm:$0xff]  ;;  %v206_v14 = vld [vmem:[%s3956_s6 + $0xd0] sm:$0xff] }
  0x19   : > { %187 = vst [vmem:[%s3961_s7 + $0x20] sm:$0xff] %v186_v4  ;;  %v208_v15 = vld [vmem:[%s3956_s6 + $0xd8] sm:$0xff]  ;;  %v210_v16 = vld [vmem:[%s3956_s6 + $0x100] sm:$0xff]  ;;  %v212_v17 = vld [vmem:[%s3956_s6 + $0x108] sm:$0xff] }
  0x1a   : > { %189 = vst [vmem:[%s3961_s7 + $0x28] sm:$0xff] %v188_v5  ;;  %v214_v18 = vld [vmem:[%s3956_s6 + $0x110] sm:$0xff]  ;;  %v216_v19 = vld [vmem:[%s3956_s6 + $0x118] sm:$0xff] }
  0x1b   : > { %191 = vst [vmem:[%s3961_s7 + $0x30] sm:$0xff] %v190_v6 }
  0x1c   : > { %193 = vst [vmem:[%s3961_s7 + $0x38] sm:$0xff] %v192_v7 }
  0x1d   : > { %195 = vst [vmem:[%s3961_s7 + $0x40] sm:$0xff] %v194_v8 }
  0x1e   : > { %197 = vst [vmem:[%s3961_s7 + $0x48] sm:$0xff] %v196_v9 }
  0x1f   : > { %199 = vst [vmem:[%s3961_s7 + $0x50] sm:$0xff] %v198_v10 }
  0x20   : > { %201 = vst [vmem:[%s3961_s7 + $0x58] sm:$0xff] %v200_v11 }
  0x21   : > { %203 = vst [vmem:[%s3961_s7 + $0x60] sm:$0xff] %v202_v12 }
  0x22   : > { %205 = vst [vmem:[%s3961_s7 + $0x68] sm:$0xff] %v204_v13 }
  0x23   : > { %207 = vst [vmem:[%s3961_s7 + $0x70] sm:$0xff] %v206_v14 }
  0x24   : > { %209 = vst [vmem:[%s3961_s7 + $0x78] sm:$0xff] %v208_v15 }
  0x25   : > { %211 = vst [vmem:[%s3961_s7 + $0x80] sm:$0xff] %v210_v16 }
  0x26   : > { %213 = vst [vmem:[%s3961_s7 + $0x88] sm:$0xff] %v212_v17 }
  0x27   : > { %215 = vst [vmem:[%s3961_s7 + $0x90] sm:$0xff] %v214_v18 }
  0x28   : > { %217 = vst [vmem:[%s3961_s7 + $0x98] sm:$0xff] %v216_v19 }
  0x29 PF: > { %p3324_p10 = scmp.ge.s32.totalorder %s3865_s18, 1  ;;  %p222_p11 = scmp.lt.s32.totalorder %s3865_s18, 3 }
  0x2b   : > { %p223_p12 = pnand %p3324_p10, %p222_p11 }
  0x2d   : > { %226 = sbr.rel (%p223_p12) target bundleno = 1790 (0x6fe), region = 55 }
  0x32   : > { %s4003_s8 = sand.u32 1, %s3857_s16   ;;  %v4008_v20 = vld [vmem:[%s5439_s3 + $0x10] sm:$0xff]  ;;  %v3867_v21 = vmov 0   ;;  %v4014_v22 = vld [vmem:[%s5439_s3] sm:$0xff]  ;;  %vm422_vm0 = vcmask 1041408   ;;  %v4030_v38 = vld [vmem:[%s5439_s3 + $0x18] sm:$0xff] }
  0x33   : > { %s3685_s11 = smul.u32 160, %s4003_s8  ;;  %3735 = vset.pattern.permute.xlu0 %v3867_v21  ;;  %3736 = vset.pattern.permute.xlu1 %v3867_v21  ;;  %v4067_v55 = vld [vmem:[%s5439_s3 + $0x8] sm:$0xff]  ;;  %v4091_v6 = vld [vmem:[%s5438_s2] sm:$0xff]  ;;  %vm415_vm1 = vcmask 293888   ;;  %vm733_vm2 = vcmask 261120   ;;  %vm2927_vm3 = vcmask 130048  }
  0x34   : > { %297 = vperm.xlu0 %3735, %v4008_v20   ;;  %287 = vperm.xlu1 %3736, %v4014_v22   ;;  %v4096_v9 = vld [vmem:[%s5437_s1] sm:$0xff]  ;;  %s3325_s13 = sshll.u32 %s4003_s8, 6  ;;  %vm3211_vm12 = vcmask 1040384   ;;  %vm3220_vm13 = vcmask 1043456   ;;  %s3683_s20 = sshll.u32 %s3318_s19, 6 }
  0x35   : > { %3737 = vset.pattern.permute.xlu2 %v3867_v21  ;;  %s4018_s14 = scalar_lea.vmem [#allocation2], %s3685_s11  ;;  %s3249_s27 = scalar_lea.hbm %s5440_s4, %s3683_s20 }
  0x36   : > { %v273_v23 = vld [vmem:[%s4018_s14 + $0x80] sm:$0x33]  ;;  %v274_v24 = vld [vmem:[%s4018_s14 + $0x88] sm:$0x33]  ;;  %v275_v56 = vld [vmem:[%s4018_s14 + $0x90] sm:$0x33] }
  0x37   : > { %v367_v25 = vunpack.c.l.b16 %v273_v23  ;;  %v368_v26 = vunpack.c.h.b16 %v273_v23  ;;  %v369_v27 = vunpack.c.l.b16 %v274_v24  ;;  %v370_v28 = vunpack.c.h.b16 %v274_v24  ;;  %v3368_v29 = vld [vmem:[%s4018_s14 + $0x40] sm:$0xf]  ;;  %v3656_v35 = vld [vmem:[%s4018_s14 + $0x44] sm:$0xf]  ;;  %v3376_v37 = vld [vmem:[%s4018_s14 + $0x48] sm:$0xf] }
  0x38   : > { %v3660_v30 = vld [vmem:[%s4018_s14 + $0x5c] sm:$0xf0]  ;;  %v3370_v36 = vld [vmem:[%s4018_s14 + $0x60] sm:$0xf0]  ;;  %v3661_v39 = vld [vmem:[%s4018_s14 + $0x64] sm:$0xf0]  ;;  %v371_v61 = vunpack.c.l.b16 %v275_v56  ;;  %v372_v62 = vunpack.c.h.b16 %v275_v56 }
  0x39   : > { %v391_v31 = vpack.c.b16 %v367_v25, %v367_v25  ;;  %v392_v32 = vpack.c.b16 %v368_v26, %v368_v26  ;;  %v393_v33 = vpack.c.b16 %v369_v27, %v369_v27  ;;  %v394_v34 = vpack.c.b16 %v370_v28, %v370_v28  ;;  %v3657_v40 = vld [vmem:[%s4018_s14 + $0x4c] sm:$0xf]  ;;  %v3336_v46 = vld [vmem:[%s4018_s14] sm:$0xf]  ;;  %v3648_v50 = vld [vmem:[%s4018_s14 + $0x4] sm:$0xf] }
  0x3a   : > { %v3378_v41 = vld [vmem:[%s4018_s14 + $0x68] sm:$0xf0]  ;;  %v3652_v47 = vld [vmem:[%s4018_s14 + $0x1c] sm:$0xf0]  ;;  %v4051_v48 = vor.u32 %v3660_v30, %v3368_v29  ;;  %v4053_v49 = vor.u32 %v3656_v35, %v3370_v36  ;;  %v3338_v51 = vld [vmem:[%s4018_s14 + $0x20] sm:$0xf0]  ;;  %v4060_v53 = vor.u32 %v3661_v39, %v3376_v37  ;;  %v395_v3 = vpack.c.b16 %v371_v61, %v371_v61 }
  0x3b   : > { %v4036_v42 = vsel %vm422_vm0, %v391_v31, 0  ;;  %v4039_v43 = vsel %vm422_vm0, %v392_v32, 0  ;;  %v4042_v44 = vsel %vm422_vm0, %v393_v33, 0  ;;  %v4045_v45 = vsel %vm422_vm0, %v394_v34, 0  ;;  %v3344_v52 = vld [vmem:[%s4018_s14 + $0x8] sm:$0xf] }
  0x3c   : > { %5469 = vst [vmem:[#allocation6_spill] sm:$0xff] %v4042_v44  ;;  %452 = vmatpush.bf16.msra.mxu0 %v4036_v42  ;;  %471 = vmatpush.bf16.msra.mxu1 %v4039_v43  ;;  %v4062_v54 = vor.u32 %v3657_v40, %v3378_v41  ;;  %v276_v57 = vld [vmem:[%s4018_s14 + $0x98] sm:$0x33]  ;;  %v3653_v58 = vld [vmem:[%s4018_s14 + $0x24] sm:$0xf0]  ;;  %v4078_v1 = vor.u32 %v3652_v47, %v3336_v46  ;;  %v4099_v10 = vsel %vm422_vm0, %v395_v3, 0 }
  0x3d   : > { %5470 = vst [vmem:[#allocation7_spill] sm:$0xff] %v4045_v45  ;;  %490 = vmatpush.bf16.msra.mxu2 %v4042_v44  ;;  %509 = vmatpush.bf16.msra.mxu3 %v4045_v45  ;;  %v3649_v59 = vld [vmem:[%s4018_s14 + $0xc] sm:$0xf]  ;;  %v373_v63 = vunpack.c.l.b16 %v276_v57  ;;  %v374_v0 = vunpack.c.h.b16 %v276_v57  ;;  %v4080_v2 = vor.u32 %v3648_v50, %v3338_v51  ;;  %v4084_v4 = vor.u32 %v3653_v58, %v3344_v52  ;;  %v3384_v12 = vld [vmem:[%s4018_s14 + $0x50] sm:$0xf]  ;;  %v4189_v51 = vld [vmem:[%s5437_s1 + $0x18] sm:$0xff] }
  0x3e   : > { %5471 = vst [vmem:[#allocation8_spill] sm:$0xff] %v4060_v53  ;;  %v3346_v60 = vld [vmem:[%s4018_s14 + $0x28] sm:$0xf0]  ;;  %302 = vperm.xlu0 %3735, %v4030_v38   ;;  %292 = vperm.xlu1 %3736, %v4067_v55   ;;  %v396_v7 = vpack.c.b16 %v372_v62, %v372_v62  ;;  %v3662_v13 = vld [vmem:[%s4018_s14 + $0x6c] sm:$0xf0]  ;;  %s3253_s28 = sshll.u32 %s3249_s27, 4  ;;  %s3254_s28 = int_to_ptr.hbm [resolvable:$true] %s3253_s28 }
  0x3f   : > { %5472 = vst [vmem:[#allocation9_spill] sm:$0xff] %v4062_v54  ;;  %v4086_v5 = vor.u32 %v3649_v59, %v3346_v60  ;;  %v397_v8 = vpack.c.b16 %v373_v63, %v373_v63  ;;  %v398_v11 = vpack.c.b16 %v374_v0, %v374_v0  ;;  %v3658_v14 = vld [vmem:[%s4018_s14 + $0x54] sm:$0xf]  ;;  %v3392_v16 = vld [vmem:[%s4018_s14 + $0x58] sm:$0xf]  ;;  %v4119_v21 = vor.u32 %v3662_v13, %v3384_v12  ;;  %v4139_v28 = vld [vmem:[%s5437_s1 + $0x8] sm:$0xff] }
  0x40   : > { %453 = vmatpush.bf16.msra.mxu0 %v4051_v48  ;;  %472 = vmatpush.bf16.msra.mxu1 %v4053_v49  ;;  %5473 = vst [vmem:[#allocation10_spill] sm:$0xff] %v4078_v1  ;;  %v3386_v15 = vld [vmem:[%s4018_s14 + $0x70] sm:$0xf0]  ;;  %v3663_v17 = vld [vmem:[%s4018_s14 + $0x74] sm:$0xf0]  ;;  %v4114_v18 = vsel %vm422_vm0, %v396_v7, 0 }
  0x41   : > { %5474 = vst [vmem:[#allocation11_spill] sm:$0xff] %v4080_v2  ;;  %491 = vmatpush.bf16.msra.mxu2 %v4060_v53  ;;  %510 = vmatpush.bf16.msra.mxu3 %v4062_v54  ;;  %v4117_v19 = vsel %vm422_vm0, %v397_v8, 0  ;;  %v3659_v23 = vld [vmem:[%s4018_s14 + $0x5c] sm:$0xf]  ;;  %v4128_v25 = vsel %vm422_vm0, %v398_v11, 0  ;;  %v4143_v29 = vor.u32 %v3658_v14, %v3386_v15  ;;  %v4145_v30 = vor.u32 %v3663_v17, %v3392_v16  ;;  %v3665_v47 = vld [vmem:[%s5438_s2 + $0x8] sm:$0xff] }
  0x42   : > { %5475 = vst [vmem:[#allocation12_spill] sm:$0xff] %v4084_v4  ;;  %v3394_v24 = vld [vmem:[%s4018_s14 + $0x78] sm:$0xf0]  ;;  %v3352_v26 = vld [vmem:[%s4018_s14 + $0x10] sm:$0xf]  ;;  %s3238_s29 = scalar_lea.sflag [#allocation4], %s4003_s8 }
  0x43   : > { %5476 = vst [vmem:[#allocation13_spill] sm:$0xff] %v4086_v5  ;;  %v3654_v27 = vld [vmem:[%s4018_s14 + $0x2c] sm:$0xf0]  ;;  %v3650_v31 = vld [vmem:[%s4018_s14 + $0x14] sm:$0xf]  ;;  %v4150_v32 = vor.u32 %v3659_v23, %v3394_v24  ;;  %s3817_s30 = sshra.s32 %s3254_s28, 4  ;;  %s3818_s30 = int_to_ptr.hbm [resolvable:$true] %s3817_s30 }
  0x44   : > { %5477 = vst [vmem:[#allocation14_spill] sm:$0xff] %v4099_v10  ;;  %454 = vmatpush.bf16.msra.mxu0 %v4078_v1  ;;  %473 = vmatpush.bf16.msra.mxu1 %v4080_v2  ;;  %v4152_v33 = vor.u32 %v3654_v27, %v3352_v26  ;;  %v3354_v34 = vld [vmem:[%s4018_s14 + $0x30] sm:$0xf0]  ;;  %v3360_v35 = vld [vmem:[%s4018_s14 + $0x18] sm:$0xf]  ;;  %s3819_s5 = scalar_lea.hbm %s3818_s30, 64  ;;  %p3824_p2 = scmp.lt.s32.totalorder %s3818_s30, %s5440_s4 }
  0x45   : > { %492 = vmatpush.bf16.msra.mxu2 %v4084_v4  ;;  %511 = vmatpush.bf16.msra.mxu3 %v4086_v5  ;;  %5478 = vst [vmem:[#allocation15_spill] sm:$0xff] %v4114_v18  ;;  %v3655_v36 = vld [vmem:[%s4018_s14 + $0x34] sm:$0xf0]  ;;  %v3651_v37 = vld [vmem:[%s4018_s14 + $0x1c] sm:$0xf]  ;;  %v4162_v40 = vor.u32 %v3650_v31, %v3354_v34  ;;  %v4183_v50 = vld [vmem:[%s5437_s1 + $0x10] sm:$0xff]  ;;  %p3820_p13 = scmp.ne.s32.totalorder %s3818_s30, %s3819_s5 }
  0x46   : > { %637 = vperm.xlu0 %3735, %v4096_v9   ;;  %5479 = vst [vmem:[#allocation16_spill] sm:$0xff] %v4117_v19  ;;  %642 = vperm.xlu1 %3736, %v4139_v28   ;;  %v3362_v39 = vld [vmem:[%s4018_s14 + $0x38] sm:$0xf0]  ;;  %v4164_v41 = vor.u32 %v3655_v36, %v3360_v35  ;;  %s5362_s14 = scalar_lea.vmem [#allocation3], %s3325_s13  ;;  %s3823_s9 = scalar_lea.hbm %s5440_s4, 128 }
  0x47   : > { %5480 = vst [vmem:[#allocation17_spill] sm:$0xff] %v4119_v21  ;;  %3398 = vmatmul.msk.bf16.vlgmr.msra.gmra.mxu0 %vm415_vm1, %v4091_v6  ;;  %3400 = vmatmul.msk.bf16.vlgmr.msra.gmra.mxu1 %vm415_vm1, %v4091_v6  ;;  %v4168_v46 = vor.u32 %v3651_v37, %v3362_v39  ;;  %s3251_s19 = sshll.u32 %s5362_s14, 4  ;;  %p3821_p0 = pnand %p3820_p13, %p3940_p6  ;;  %s3252_s19 = int_to_ptr.vmem [resolvable:$true] %s3251_s19 }
  0x48   : > { %528 = vmatpush.bf16.msrb.mxu0 %v4099_v10  ;;  %5481 = vst [vmem:[#allocation18_spill] sm:$0xff] %v4128_v25  ;;  %3402 = vmatmul.msk.bf16.vlgmr.msra.gmra.mxu2 %vm415_vm1, %v4091_v6  ;;  %p3825_p3 = scmp.lt.s32.totalorder %s3823_s9, %s3819_s5 }
  0x49   : > { %3404 = vmatmul.msk.bf16.vlgmr.msra.gmra.mxu3 %vm415_vm1, %v4091_v6  ;;  %547 = vmatpush.bf16.msrb.mxu1 %v4114_v18  ;;  %5482 = vst [vmem:[#allocation19_spill] sm:$0xff] %v4143_v29  ;;  %p3822_p1 = pneg %p3821_p0 }
  0x4a   : > { %566 = vmatpush.bf16.msrb.mxu2 %v4117_v19  ;;  %5483 = vst [vmem:[#allocation20_spill] sm:$0xff] %v4145_v30  ;;  %585 = vmatpush.bf16.msrb.mxu3 %v4128_v25  ;;  %p3826_p4 = por %p3825_p3, %p3824_p2 }
  0x4b   : > { %5484 = vst [vmem:[#allocation21_spill] sm:$0xff] %v4150_v32  ;;  %647 = vperm.xlu2 %3737, %v4183_v50  }
  0x4c   : > { %529 = vmatpush.bf16.msrb.mxu0 %v4119_v21  ;;  %5485 = vst [vmem:[#allocation22_spill] sm:$0xff] %v4152_v33  ;;  %p3827_p5 = pnand %p3826_p4, %p3822_p1 }
  0x4d   : > { %548 = vmatpush.bf16.msrb.mxu1 %v4143_v29  ;;  %5486 = vst [vmem:[#allocation23_spill] sm:$0xff] %v4162_v40 }
  0x4e   : > { %567 = vmatpush.bf16.msrb.mxu2 %v4145_v30  ;;  %5487 = vst [vmem:[#allocation24_spill] sm:$0xff] %v4164_v41  ;;  %586 = vmatpush.bf16.msrb.mxu3 %v4150_v32 }
  0x4f   : > { %5488 = vst [vmem:[#allocation25_spill] sm:$0xff] %v4168_v46 }
  0x50   : > { %530 = vmatpush.bf16.msrb.mxu0 %v4152_v33 }
  0x51   : > { %549 = vmatpush.bf16.msrb.mxu1 %v4162_v40 }
  0x52   : > { %568 = vmatpush.bf16.msrb.mxu2 %v4164_v41  ;;  %587 = vmatpush.bf16.msrb.mxu3 %v4168_v46  ;;  %v3868_v46 = vmov 1  }
  0x53   : > { %652 = vperm.xlu2 %3737, %v4189_v51   ;;  %3739 = vset.pattern.permute.xlu0 %v3868_v46 }
  0x54   : > { %3740 = vset.pattern.permute.xlu1 %v3868_v46  ;;  %720 = vperm.xlu0 %3739, %v4030_v38  }
  0x55   : > { %708 = vperm.xlu1 %3740, %v4014_v22  }
  0x57   : > { %3399 = vmatmul.msk.bf16.gmra.mxu0 %vm415_vm1, %v3665_v47  ;;  %3401 = vmatmul.msk.bf16.gmra.mxu1 %vm415_vm1, %v3665_v47 }
  0x58   : > { %3403 = vmatmul.msk.bf16.gmra.mxu2 %vm415_vm1, %v3665_v47 }
  0x59   : > { %3405 = vmatmul.msk.bf16.gmra.mxu3 %vm415_vm1, %v3665_v47 }
  0x5b   : > { %3738 = vset.pattern.permute.xlu2 %v3868_v46 }
  0x5c   : > { %716 = vperm.xlu2 %3738, %v4008_v20   ;;  %925 = vperm.xlu0 %3739, %v4096_v9  }
  0x5d   : > { %933 = vperm.xlu1 %3740, %v4183_v50  }
  0x64   : > { %712 = vperm.xlu2 %3738, %v4067_v55  }
  0x65   : > { %929 = vperm.xlu1 %3740, %v4139_v28  }
  0x67   : > { %3406 = vmatmul.msk.bf16.vlgmr.msrb.gmra.mxu0 %vm415_vm1, %v4091_v6  ;;  %3408 = vmatmul.msk.bf16.vlgmr.msrb.gmra.mxu1 %vm415_vm1, %v4091_v6 }
  0x68   : > { %3410 = vmatmul.msk.bf16.vlgmr.msrb.gmra.mxu2 %vm415_vm1, %v4091_v6 }
  0x69   : > { %3412 = vmatmul.msk.bf16.vlgmr.msrb.gmra.mxu3 %vm415_vm1, %v4091_v6 }
  0x6c   : > { %937 = vperm.xlu2 %3738, %v4189_v51  }
  0x77   : > { %3407 = vmatmul.msk.bf16.gmra.mxu0 %vm415_vm1, %v3665_v47  ;;  %3409 = vmatmul.msk.bf16.gmra.mxu1 %vm415_vm1, %v3665_v47 }
  0x78   : > { %3411 = vmatmul.msk.bf16.gmra.mxu2 %vm415_vm1, %v3665_v47 }
  0x79   : > { %3413 = vmatmul.msk.bf16.gmra.mxu3 %vm415_vm1, %v3665_v47 }
  0xa5   : > { %v4210_v8 = vpop.permute.xlu2 %647 }
  0xa6   : > { %v4204_v57 = vpop.permute.xlu0 %297  ;;  %v4206_v62 = vpop.permute.xlu1 %287 }
  0xb0   : > { %v4208_v7 = vpop.permute.xlu0 %302  ;;  %v4212_v11 = vpop.permute.xlu1 %292 }
  0xc4   : > { %v456_v52 = vpop.f32.mrf.mxu0  ;;  %v475_v56 = vpop.f32.mrf.mxu1 }
  0xc5   : > { %v457_v12 = vadd.f32 %v456_v52, %v4206_v62  ;;  %v476_v13 = vadd.f32 %v475_v56, %v4206_v62  ;;  %v4222_v52 = vpop.permute.xlu0 %637 }
  0xc7   : > { %v599_v31 = vmax.f32 %v457_v12, 0.0  ;;  %v600_v34 = vmax.f32 %v476_v13, 0.0  ;;  %v4226_v12 = vpop.permute.xlu2 %652 }
  0xc9   : > { %v655_v13 = vadd.f32 %v4222_v52, %v599_v31 }
  0xcb   : > { %v494_v58 = vpop.f32.mrf.mxu2 }
  0xcc   : > { %v513_v59 = vpop.f32.mrf.mxu3  ;;  %v458_v60 = vpop.f32.mrf.mxu0 }
  0xcd   : > { %v477_v61 = vpop.f32.mrf.mxu1  ;;  %v459_v16 = vadd.f32 %v458_v60, %v4212_v11 }
  0xce   : > { %v478_v24 = vadd.f32 %v477_v61, %v4212_v11 }
  0xcf   : > { %v607_v47 = vmax.f32 %v459_v16, 0.0 }
  0xd3   : > { %v496_v63 = vpop.f32.mrf.mxu2 }
  0xd4   : > { %v515_v0 = vpop.f32.mrf.mxu3  ;;  %v461_v3 = vpop.f32.mrf.mxu0 }
  0xd5   : > { %v480_v6 = vpop.f32.mrf.mxu1  ;;  %v462_v14 = vadd.f32 %v461_v3, %v4204_v57  ;;  %v516_v31 = vadd.f32 %v515_v0, %v4212_v11 }
  0xd6   : > { %v481_v15 = vadd.f32 %v480_v6, %v4204_v57  ;;  %v608_v6 = vmax.f32 %v478_v24, 0.0 }
  0xd7   : > { %v615_v35 = vmax.f32 %v462_v14, 0.0  ;;  %v656_v14 = vadd.f32 %v4222_v52, %v600_v34  ;;  %v610_v30 = vmax.f32 %v516_v31, 0.0 }
  0xd8   : > { %v616_v36 = vmax.f32 %v481_v15, 0.0  ;;  %v4232_v15 = vpop.permute.xlu1 %642 }
  0xd9   : > { %v671_v16 = vadd.f32 %v4210_v8, %v615_v35  ;;  %v663_v34 = vadd.f32 %v4232_v15, %v607_v47 }
  0xda   : > { %v672_v24 = vadd.f32 %v4210_v8, %v616_v36  ;;  %v664_v36 = vadd.f32 %v4232_v15, %v608_v6 }
  0xdb   : > { %v499_v17 = vpop.f32.mrf.mxu2 }
  0xdc   : > { %v518_v23 = vpop.f32.mrf.mxu3  ;;  %v463_v26 = vpop.f32.mrf.mxu0  ;;  %v500_v56 = vadd.f32 %v499_v17, %v4204_v57  ;;  %v688_v6 = vpack.c.bf16 %v664_v36, %v656_v14 }
  0xdd   : > { %v482_v27 = vpop.f32.mrf.mxu1  ;;  %v464_v37 = vadd.f32 %v463_v26, %v4208_v7  ;;  %v519_v61 = vadd.f32 %v518_v23, %v4204_v57  ;;  %v495_v26 = vadd.f32 %v494_v58, %v4206_v62 }
  0xde   : > { %v483_v39 = vadd.f32 %v482_v27, %v4208_v7  ;;  %v497_v27 = vadd.f32 %v496_v63, %v4212_v11 }
  0xdf   : > { %v623_v60 = vmax.f32 %v464_v37, 0.0  ;;  %v617_v37 = vmax.f32 %v500_v56, 0.0  ;;  %v618_v46 = vmax.f32 %v519_v61, 0.0  ;;  %v601_v19 = vmax.f32 %v495_v26, 0.0 }
  0xe0   : > { %v624_v3 = vmax.f32 %v483_v39, 0.0  ;;  %v609_v47 = vmax.f32 %v497_v27, 0.0  ;;  %v666_v27 = vadd.f32 %v4232_v15, %v610_v30 }
  0xe1   : > { %v679_v17 = vadd.f32 %v4226_v12, %v623_v60 }
  0xe2   : > { %v680_v23 = vadd.f32 %v4226_v12, %v624_v3  ;;  %v514_v3 = vadd.f32 %v513_v59, %v4206_v62  ;;  %v674_v59 = vadd.f32 %v4210_v8, %v618_v46  ;;  %v665_v26 = vadd.f32 %v4232_v15, %v609_v47  ;;  %v4278_v47 = vld [vmem:[%s5438_s2 + $0x18] sm:$0xff] }
  0xe3   : > { %v501_v39 = vpop.f32.mrf.mxu2  ;;  %v695_v41 = vpack.c.bf16 %v679_v17, %v671_v16  ;;  %v673_v16 = vadd.f32 %v4210_v8, %v617_v37  ;;  %v687_v17 = vpack.c.bf16 %v663_v34, %v655_v13 }
  0xe4   : > { %v520_v35 = vpop.f32.mrf.mxu3  ;;  %v696_v60 = vpack.c.bf16 %v680_v23, %v672_v24  ;;  %v502_v58 = vadd.f32 %v501_v39, %v4208_v7  ;;  %v532_v32 = vpop.f32.mrf.mxu0  ;;  %v602_v24 = vmax.f32 %v514_v3, 0.0  ;;  %v657_v39 = vadd.f32 %v4222_v52, %v601_v19 }
  0xe5   : > { %v521_v63 = vadd.f32 %v520_v35, %v4208_v7  ;;  %v551_v0 = vpop.f32.mrf.mxu1  ;;  %746 = vmatpush.bf16.msra.mxu0 %v695_v41  ;;  %v4256_v41 = vld [vmem:[%s5438_s2 + $0x10] sm:$0xff] }
  0xe6   : > { %765 = vmatpush.bf16.msra.mxu1 %v696_v60  ;;  %v625_v56 = vmax.f32 %v502_v58, 0.0  ;;  %v658_v35 = vadd.f32 %v4222_v52, %v602_v24  ;;  %v689_v60 = vpack.c.bf16 %v665_v26, %v657_v39 }
  0xe7   : > { %v626_v25 = vmax.f32 %v521_v63, 0.0 }
  0xe8   : > { %v681_v61 = vadd.f32 %v4226_v12, %v625_v56  ;;  %v690_v30 = vpack.c.bf16 %v666_v27, %v658_v35 }
  0xe9   : > { %v682_v23 = vadd.f32 %v4226_v12, %v626_v25  ;;  %747 = vmatpush.bf16.msra.mxu0 %v687_v17 }
  0xea   : > { %766 = vmatpush.bf16.msra.mxu1 %v688_v6  ;;  %v697_v13 = vpack.c.bf16 %v681_v61, %v673_v16  ;;  %v533_v16 = vadd.f32 %v532_v32, %v4206_v62 }
  0xeb   : > { %v698_v14 = vpack.c.bf16 %v682_v23, %v674_v59  ;;  %v570_v25 = vpop.f32.mrf.mxu2  ;;  %v552_v59 = vadd.f32 %v551_v0, %v4206_v62 }
  0xec   : > { %v589_v31 = vpop.f32.mrf.mxu3  ;;  %784 = vmatpush.bf16.msra.mxu2 %v697_v13  ;;  %v534_v34 = vpop.f32.mrf.mxu0  ;;  %3422 = vmatmul.msk.bf16.vlgmr.msra.gmra.mxu0 %vm733_vm2, %v4256_v41 }
  0xed   : > { %803 = vmatpush.bf16.msra.mxu3 %v698_v14  ;;  %v553_v37 = vpop.f32.mrf.mxu1  ;;  %3424 = vmatmul.msk.bf16.vlgmr.msra.gmra.mxu1 %vm733_vm2, %v4256_v41  ;;  %v535_v56 = vadd.f32 %v534_v34, %v4212_v11  ;;  %v603_v34 = vmax.f32 %v533_v16, 0.0  ;;  %v604_v0 = vmax.f32 %v552_v59, 0.0 }
  0xee   : > { %v554_v17 = vadd.f32 %v553_v37, %v4212_v11 }
  0xef   : > { %v611_v32 = vmax.f32 %v535_v56, 0.0  ;;  %v590_v56 = vadd.f32 %v589_v31, %v4206_v62 }
  0xf0   : > { %785 = vmatpush.bf16.msra.mxu2 %v689_v60  ;;  %v612_v37 = vmax.f32 %v554_v17, 0.0  ;;  %v571_v60 = vadd.f32 %v570_v25, %v4206_v62 }
  0xf1   : > { %804 = vmatpush.bf16.msra.mxu3 %v690_v30  ;;  %v667_v16 = vadd.f32 %v4232_v15, %v611_v32 }
  0xf3   : > { %v572_v36 = vpop.f32.mrf.mxu2  ;;  %3426 = vmatmul.msk.bf16.vlgmr.msra.gmra.mxu2 %vm733_vm2, %v4256_v41 }
  0xf4   : > { %v591_v3 = vpop.f32.mrf.mxu3  ;;  %3428 = vmatmul.msk.bf16.vlgmr.msra.gmra.mxu3 %vm733_vm2, %v4256_v41  ;;  %v537_v19 = vpop.f32.mrf.mxu0  ;;  %v573_v17 = vadd.f32 %v572_v36, %v4212_v11 }
  0xf5   : > { %v556_v46 = vpop.f32.mrf.mxu1  ;;  %v538_v58 = vadd.f32 %v537_v19, %v4204_v57  ;;  %v592_v25 = vadd.f32 %v591_v3, %v4212_v11  ;;  %v659_v11 = vadd.f32 %v4222_v52, %v603_v34  ;;  %v660_v3 = vadd.f32 %v4222_v52, %v604_v0 }
  0xf6   : > { %v557_v63 = vadd.f32 %v556_v46, %v4204_v57 }
  0xf7   : > { %v619_v13 = vmax.f32 %v538_v58, 0.0 }
  0xf8   : > { %v620_v14 = vmax.f32 %v557_v63, 0.0 }
  0xf9   : > { %v675_v46 = vadd.f32 %v4210_v8, %v619_v13 }
  0xfa   : > { %v676_v58 = vadd.f32 %v4210_v8, %v620_v14  ;;  %v613_v14 = vmax.f32 %v573_v17, 0.0 }
  0xfb   : > { %v575_v6 = vpop.f32.mrf.mxu2 }
  0xfc   : > { %v594_v24 = vpop.f32.mrf.mxu3  ;;  %v539_v61 = vpop.f32.mrf.mxu0  ;;  %3423 = vmatmul.msk.bf16.gmra.mxu0 %vm733_vm2, %v4278_v47  ;;  %v576_v30 = vadd.f32 %v575_v6, %v4204_v57  ;;  %v668_v6 = vadd.f32 %v4232_v15, %v612_v37  ;;  %v605_v37 = vmax.f32 %v571_v60, 0.0  ;;  %v669_v0 = vadd.f32 %v4232_v15, %v613_v14 }
  0xfd   : > { %v558_v23 = vpop.f32.mrf.mxu1  ;;  %v540_v26 = vadd.f32 %v539_v61, %v4208_v7  ;;  %3425 = vmatmul.msk.bf16.gmra.mxu1 %vm733_vm2, %v4278_v47  ;;  %v595_v19 = vadd.f32 %v594_v24, %v4204_v57 }
  0xfe   : > { %v559_v27 = vadd.f32 %v558_v23, %v4208_v7  ;;  %v621_v13 = vmax.f32 %v576_v30, 0.0  ;;  %v661_v60 = vadd.f32 %v4222_v52, %v605_v37 }
  0xff   : > { %v627_v39 = vmax.f32 %v540_v26, 0.0  ;;  %v622_v62 = vmax.f32 %v595_v19, 0.0  ;;  %v614_v26 = vmax.f32 %v592_v25, 0.0 }
 0x100   : > { %v628_v35 = vmax.f32 %v559_v27, 0.0  ;;  %v677_v30 = vadd.f32 %v4210_v8, %v621_v13  ;;  %v4342_v13 = vpop.permute.xlu0 %720 }
 0x101   : > { %v683_v63 = vadd.f32 %v4226_v12, %v627_v39  ;;  %v606_v39 = vmax.f32 %v590_v56, 0.0  ;;  %v678_v19 = vadd.f32 %v4210_v8, %v622_v62  ;;  %v693_v8 = vpack.c.bf16 %v669_v0, %v661_v60 }
 0x102   : > { %v684_v61 = vadd.f32 %v4226_v12, %v628_v35  ;;  %v691_v35 = vpack.c.bf16 %v667_v16, %v659_v11  ;;  %v4334_v16 = vpop.permute.xlu2 %716 }
 0x103   : > { %v699_v59 = vpack.c.bf16 %v683_v63, %v675_v46  ;;  %v577_v24 = vpop.f32.mrf.mxu2  ;;  %3427 = vmatmul.msk.bf16.gmra.mxu2 %vm733_vm2, %v4278_v47  ;;  %v692_v46 = vpack.c.bf16 %v668_v6, %v660_v3  ;;  %v662_v56 = vadd.f32 %v4222_v52, %v606_v39  ;;  %v4336_v6 = vpop.permute.xlu1 %708 }
 0x104   : > { %v700_v57 = vpack.c.bf16 %v684_v61, %v676_v58  ;;  %v596_v23 = vpop.f32.mrf.mxu3  ;;  %3429 = vmatmul.msk.bf16.gmra.mxu3 %vm733_vm2, %v4278_v47  ;;  %v578_v31 = vadd.f32 %v577_v24, %v4208_v7  ;;  %v670_v58 = vadd.f32 %v4232_v15, %v614_v26 }
 0x105   : > { %v597_v36 = vadd.f32 %v596_v23, %v4208_v7  ;;  %822 = vmatpush.bf16.msrb.mxu0 %v699_v59 }
 0x106   : > { %841 = vmatpush.bf16.msrb.mxu1 %v700_v57  ;;  %v629_v27 = vmax.f32 %v578_v31, 0.0 }
 0x107   : > { %v630_v32 = vmax.f32 %v597_v36, 0.0 }
 0x108   : > { %v685_v7 = vadd.f32 %v4226_v12, %v629_v27 }
 0x109   : > { %v686_v34 = vadd.f32 %v4226_v12, %v630_v32  ;;  %823 = vmatpush.bf16.msrb.mxu0 %v691_v35  ;;  %v694_v12 = vpack.c.bf16 %v670_v58, %v662_v56 }
 0x10a   : > { %842 = vmatpush.bf16.msrb.mxu1 %v692_v46  ;;  %v701_v63 = vpack.c.bf16 %v685_v7, %v677_v30  ;;  %v4340_v23 = vpop.permute.xlu2 %712 }
 0x10b   : > { %v702_v61 = vpack.c.bf16 %v686_v34, %v678_v19  ;;  %v4344_v62 = vpop.permute.xlu1 %933 }
 0x10c   : > { %860 = vmatpush.bf16.msrb.mxu2 %v701_v63  ;;  %3430 = vmatmul.msk.bf16.vlgmr.msrb.gmra.mxu0 %vm733_vm2, %v4256_v41 }
 0x10d   : > { %879 = vmatpush.bf16.msrb.mxu3 %v702_v61  ;;  %3432 = vmatmul.msk.bf16.vlgmr.msrb.gmra.mxu1 %vm733_vm2, %v4256_v41 }
 0x110   : > { %861 = vmatpush.bf16.msrb.mxu2 %v693_v8 }
 0x111   : > { %880 = vmatpush.bf16.msrb.mxu3 %v694_v12 }
 0x112   : > { %v4356_v58 = vpop.permute.xlu2 %937 }
 0x113   : > { %3434 = vmatmul.msk.bf16.vlgmr.msrb.gmra.mxu2 %vm733_vm2, %v4256_v41 }
 0x114   : > { %3436 = vmatmul.msk.bf16.vlgmr.msrb.gmra.mxu3 %vm733_vm2, %v4256_v41 }
 0x11c   : > { %3431 = vmatmul.msk.bf16.gmra.mxu0 %vm733_vm2, %v4278_v47 }
 0x11d   : > { %3433 = vmatmul.msk.bf16.gmra.mxu1 %vm733_vm2, %v4278_v47 }
 0x123   : > { %3435 = vmatmul.msk.bf16.gmra.mxu2 %vm733_vm2, %v4278_v47 }
 0x124   : > { %3437 = vmatmul.msk.bf16.gmra.mxu3 %vm733_vm2, %v4278_v47 }
 0x169   : > { %v749_v52 = vpop.f32.mrf.mxu0 }
 0x16a   : > { %v768_v15 = vpop.f32.mrf.mxu1  ;;  %v750_v3 = vadd.f32 %v749_v52, %v4336_v6 }
 0x16b   : > { %v769_v39 = vadd.f32 %v768_v15, %v4336_v6 }
 0x16c   : > { %v892_v19 = vmax.f32 %v750_v3, 0.0 }
 0x16d   : > { %v893_v8 = vmax.f32 %v769_v39, 0.0 }
 0x171   : > { %v751_v17 = vpop.f32.mrf.mxu0 }
 0x172   : > { %v770_v25 = vpop.f32.mrf.mxu1  ;;  %v752_v14 = vadd.f32 %v751_v17, %v4340_v23  ;;  %v4360_v17 = vpop.permute.xlu0 %925 }
 0x173   : > { %v771_v35 = vadd.f32 %v770_v25, %v4340_v23  ;;  %v4362_v25 = vpop.permute.xlu1 %929 }
 0x174   : > { %v900_v7 = vmax.f32 %v752_v14, 0.0 }
 0x175   : > { %v901_v12 = vmax.f32 %v771_v35, 0.0 }
 0x176   : > { %v787_v41 = vpop.f32.mrf.mxu2 }
 0x177   : > { %v4338_v59 = vpop.f32.mrf.mxu3 }
 0x179   : > { %v754_v57 = vpop.f32.mrf.mxu0 }
 0x17a   : > { %v773_v24 = vpop.f32.mrf.mxu1  ;;  %v755_v47 = vadd.f32 %v754_v57, %v4334_v16 }
 0x17b   : > { %v774_v31 = vadd.f32 %v773_v24, %v4334_v16 }
 0x17c   : > { %v908_v26 = vmax.f32 %v755_v47, 0.0  ;;  %v940_v47 = vadd.f32 %v4360_v17, %v892_v19 }
 0x17d   : > { %v909_v27 = vmax.f32 %v774_v31, 0.0  ;;  %v948_v31 = vadd.f32 %v4362_v25, %v900_v7 }
 0x17e   : > { %v789_v36 = vpop.f32.mrf.mxu2  ;;  %v956_v34 = vadd.f32 %v4344_v62, %v908_v26  ;;  %v941_v26 = vadd.f32 %v4360_v17, %v893_v8 }
 0x17f   : > { %v808_v11 = vpop.f32.mrf.mxu3  ;;  %v957_v0 = vadd.f32 %v4344_v62, %v909_v27  ;;  %v949_v27 = vadd.f32 %v4362_v25, %v901_v12  ;;  %v790_v39 = vadd.f32 %v789_v36, %v4340_v23  ;;  %v972_v35 = vpack.c.bf16 %v948_v31, %v940_v47 }
 0x180   : > { %v809_v19 = vadd.f32 %v808_v11, %v4340_v23 }
 0x181   : > { %v756_v32 = vpop.f32.mrf.mxu0  ;;  %v902_v11 = vmax.f32 %v790_v39, 0.0 }
 0x182   : > { %v775_v37 = vpop.f32.mrf.mxu1  ;;  %v757_v46 = vadd.f32 %v756_v32, %v4342_v13 }
 0x183   : > { %v776_v30 = vadd.f32 %v775_v37, %v4342_v13 }
 0x184   : > { %v916_v63 = vmax.f32 %v757_v46, 0.0  ;;  %v3869_v46 = vmov 2  }
 0x185   : > { %v917_v61 = vmax.f32 %v776_v30, 0.0  ;;  %3743 = vset.pattern.permute.xlu1 %v3869_v46  ;;  %3742 = vset.pattern.permute.xlu0 %v3869_v46  ;;  %v788_v30 = vadd.f32 %v787_v41, %v4336_v6  ;;  %v807_v41 = vadd.f32 %v4338_v59, %v4336_v6 }
 0x186   : > { %v792_v60 = vpop.f32.mrf.mxu2  ;;  %v964_v52 = vadd.f32 %v4356_v58, %v916_v63  ;;  %v4380_v63 = vld [vmem:[%s5438_s2 + $0x20] sm:$0xff]  ;;  %993 = vperm.xlu1 %3743, %v4014_v22   ;;  %3741 = vset.pattern.permute.xlu2 %v3869_v46 }
 0x187   : > { %v811_v56 = vpop.f32.mrf.mxu3  ;;  %v965_v15 = vadd.f32 %v4356_v58, %v917_v61  ;;  %v793_v32 = vadd.f32 %v792_v60, %v4334_v16  ;;  %1005 = vperm.xlu0 %3742, %v4030_v38   ;;  %1001 = vperm.xlu2 %3741, %v4008_v20   ;;  %v894_v22 = vmax.f32 %v788_v30, 0.0  ;;  %v895_v31 = vmax.f32 %v807_v41, 0.0 }
 0x188   : > { %v980_v57 = vpack.c.bf16 %v964_v52, %v956_v34  ;;  %v812_v37 = vadd.f32 %v811_v56, %v4334_v16  ;;  %v903_v52 = vmax.f32 %v809_v19, 0.0 }
 0x189   : > { %v981_v24 = vpack.c.bf16 %v965_v15, %v957_v0  ;;  %v4366_v3 = vpop.f32.mrf.mxu0  ;;  %v973_v0 = vpack.c.bf16 %v949_v27, %v941_v26  ;;  %v910_v36 = vmax.f32 %v793_v32, 0.0  ;;  %v950_v27 = vadd.f32 %v4362_v25, %v902_v11 }
 0x18a   : > { %v4368_v14 = vpop.f32.mrf.mxu1  ;;  %1030 = vmatpush.bf16.msra.mxu0 %v980_v57  ;;  %v911_v61 = vmax.f32 %v812_v37, 0.0  ;;  %v951_v39 = vadd.f32 %v4362_v25, %v903_v52  ;;  %v943_v46 = vadd.f32 %v4360_v17, %v895_v31 }
 0x18b   : > { %1049 = vmatpush.bf16.msra.mxu1 %v981_v24  ;;  %v958_v24 = vadd.f32 %v4344_v62, %v910_v36 }
 0x18c   : > { %v959_v47 = vadd.f32 %v4344_v62, %v911_v61 }
 0x18e   : > { %v794_v7 = vpop.f32.mrf.mxu2  ;;  %1031 = vmatpush.bf16.msra.mxu0 %v972_v35  ;;  %1421 = vperm.xlu1 %3743, %v4183_v50   ;;  %v942_v35 = vadd.f32 %v4360_v17, %v894_v22  ;;  %v4409_v50 = vld [vmem:[%s5438_s2 + $0x28] sm:$0xff] }
 0x18f   : > { %v813_v34 = vpop.f32.mrf.mxu3  ;;  %v795_v60 = vadd.f32 %v794_v7, %v4342_v13  ;;  %1050 = vmatpush.bf16.msra.mxu1 %v973_v0  ;;  %1413 = vperm.xlu0 %3742, %v4096_v9  }
 0x190   : > { %v814_v56 = vadd.f32 %v813_v34, %v4342_v13  ;;  %v974_v30 = vpack.c.bf16 %v950_v27, %v942_v35  ;;  %997 = vperm.xlu2 %3741, %v4067_v55   ;;  %v975_v34 = vpack.c.bf16 %v951_v39, %v943_v46 }
 0x191   : > { %v918_v8 = vmax.f32 %v795_v60, 0.0  ;;  %v827_v15 = vpop.f32.mrf.mxu0  ;;  %3446 = vmatmul.msk.bf16.vlgmr.msra.gmra.mxu0 %vm733_vm2, %v4380_v63  ;;  %v826_v60 = vadd.f32 %v4366_v3, %v4336_v6 }
 0x192   : > { %v919_v12 = vmax.f32 %v814_v56, 0.0  ;;  %v846_v57 = vpop.f32.mrf.mxu1  ;;  %3448 = vmatmul.msk.bf16.vlgmr.msra.gmra.mxu1 %vm733_vm2, %v4380_v63  ;;  %v828_v61 = vadd.f32 %v827_v15, %v4340_v23 }
 0x193   : > { %v966_v59 = vadd.f32 %v4356_v58, %v918_v8  ;;  %v847_v56 = vadd.f32 %v846_v57, %v4340_v23  ;;  %v896_v57 = vmax.f32 %v826_v60, 0.0 }
 0x194   : > { %v967_v38 = vadd.f32 %v4356_v58, %v919_v12  ;;  %v904_v3 = vmax.f32 %v828_v61, 0.0 }
 0x195   : > { %v982_v20 = vpack.c.bf16 %v966_v59, %v958_v24  ;;  %v905_v24 = vmax.f32 %v847_v56, 0.0 }
 0x196   : > { %v983_v26 = vpack.c.bf16 %v967_v38, %v959_v47  ;;  %v863_v32 = vpop.f32.mrf.mxu2  ;;  %1417 = vperm.xlu1 %3743, %v4139_v28   ;;  %v952_v39 = vadd.f32 %v4362_v25, %v904_v3 }
 0x197   : > { %v882_v37 = vpop.f32.mrf.mxu3  ;;  %1068 = vmatpush.bf16.msra.mxu2 %v982_v20  ;;  %v953_v46 = vadd.f32 %v4362_v25, %v905_v24  ;;  %v864_v60 = vadd.f32 %v863_v32, %v4336_v6 }
 0x198   : > { %1087 = vmatpush.bf16.msra.mxu3 %v983_v26  ;;  %1425 = vperm.xlu2 %3741, %v4189_v51   ;;  %v845_v51 = vadd.f32 %v4368_v14, %v4336_v6  ;;  %v883_v56 = vadd.f32 %v882_v37, %v4336_v6 }
 0x199   : > { %v830_v19 = vpop.f32.mrf.mxu0 }
 0x19a   : > { %v849_v7 = vpop.f32.mrf.mxu1  ;;  %v831_v9 = vadd.f32 %v830_v19, %v4334_v16  ;;  %v897_v27 = vmax.f32 %v845_v51, 0.0 }
 0x19b   : > { %1069 = vmatpush.bf16.msra.mxu2 %v974_v30  ;;  %v850_v55 = vadd.f32 %v849_v7, %v4334_v16  ;;  %v944_v30 = vadd.f32 %v4360_v17, %v896_v57 }
 0x19c   : > { %1088 = vmatpush.bf16.msra.mxu3 %v975_v34  ;;  %v912_v28 = vmax.f32 %v831_v9, 0.0  ;;  %v945_v34 = vadd.f32 %v4360_v17, %v897_v27  ;;  %v3670_v27 = vld [vmem:[%s5438_s2 + $0x30] sm:$0xff] }
 0x19d   : > { %v913_v8 = vmax.f32 %v850_v55, 0.0  ;;  %v976_v61 = vpack.c.bf16 %v952_v39, %v944_v30  ;;  %v3671_v39 = vld [vmem:[%s5438_s2 + $0x38] sm:$0xff] }
 0x19e   : > { %v865_v0 = vpop.f32.mrf.mxu2  ;;  %3450 = vmatmul.msk.bf16.vlgmr.msra.gmra.mxu2 %vm733_vm2, %v4380_v63  ;;  %v960_v38 = vadd.f32 %v4344_v62, %v912_v28  ;;  %v977_v28 = vpack.c.bf16 %v953_v46, %v945_v34 }
 0x19f   : > { %v884_v36 = vpop.f32.mrf.mxu3  ;;  %3452 = vmatmul.msk.bf16.vlgmr.msra.gmra.mxu3 %vm733_vm2, %v4380_v63  ;;  %v961_v31 = vadd.f32 %v4344_v62, %v913_v8  ;;  %v866_v9 = vadd.f32 %v865_v0, %v4340_v23  ;;  %v898_v0 = vmax.f32 %v864_v60, 0.0 }
 0x1a0   : > { %v885_v55 = vadd.f32 %v884_v36, %v4340_v23  ;;  %v899_v36 = vmax.f32 %v883_v56, 0.0 }
 0x1a1   : > { %v832_v41 = vpop.f32.mrf.mxu0  ;;  %3447 = vmatmul.msk.bf16.gmra.mxu0 %vm733_vm2, %v4409_v50  ;;  %v906_v6 = vmax.f32 %v866_v9, 0.0 }
 0x1a2   : > { %v851_v11 = vpop.f32.mrf.mxu1  ;;  %v833_v12 = vadd.f32 %v832_v41, %v4342_v13  ;;  %3449 = vmatmul.msk.bf16.gmra.mxu1 %vm733_vm2, %v4409_v50  ;;  %v907_v23 = vmax.f32 %v885_v55, 0.0 }
 0x1a3   : > { %v852_v22 = vadd.f32 %v851_v11, %v4342_v13 }
 0x1a4   : > { %v920_v52 = vmax.f32 %v833_v12, 0.0  ;;  %v955_v57 = vadd.f32 %v4362_v25, %v907_v23 }
 0x1a5   : > { %v921_v15 = vmax.f32 %v852_v22, 0.0 }
 0x1a6   : > { %v868_v47 = vpop.f32.mrf.mxu2  ;;  %v968_v20 = vadd.f32 %v4356_v58, %v920_v52 }
 0x1a7   : > { %v887_v59 = vpop.f32.mrf.mxu3  ;;  %v969_v26 = vadd.f32 %v4356_v58, %v921_v15  ;;  %v869_v19 = vadd.f32 %v868_v47, %v4334_v16  ;;  %v954_v15 = vadd.f32 %v4362_v25, %v906_v6  ;;  %v5490_v25 = vld [vmem:[#allocation18_spill] sm:$0xff] }
 0x1a8   : > { %v984_v35 = vpack.c.bf16 %v968_v20, %v960_v38  ;;  %v888_v7 = vadd.f32 %v887_v59, %v4334_v16  ;;  %v946_v59 = vadd.f32 %v4360_v17, %v898_v0  ;;  %v5493_v20 = vld [vmem:[#allocation24_spill] sm:$0xff] }
 0x1a9   : > { %v985_v14 = vpack.c.bf16 %v969_v26, %v961_v31  ;;  %v914_v16 = vmax.f32 %v869_v19, 0.0  ;;  %v5492_v31 = vld [vmem:[#allocation21_spill] sm:$0xff] }
 0x1aa   : > { %1106 = vmatpush.bf16.msrb.mxu0 %v984_v35  ;;  %v915_v8 = vmax.f32 %v888_v7, 0.0  ;;  %v5494_v26 = vld [vmem:[#allocation25_spill] sm:$0xff] }
 0x1ab   : > { %1125 = vmatpush.bf16.msrb.mxu1 %v985_v14 }
 0x1ac   : > { %v963_v51 = vadd.f32 %v4344_v62, %v915_v8 }
 0x1ae   : > { %v870_v41 = vpop.f32.mrf.mxu2  ;;  %3451 = vmatmul.msk.bf16.gmra.mxu2 %vm733_vm2, %v4409_v50  ;;  %1107 = vmatpush.bf16.msrb.mxu0 %v976_v61 }
 0x1af   : > { %v889_v11 = vpop.f32.mrf.mxu3  ;;  %v871_v12 = vadd.f32 %v870_v41, %v4342_v13  ;;  %3453 = vmatmul.msk.bf16.gmra.mxu3 %vm733_vm2, %v4409_v50  ;;  %1126 = vmatpush.bf16.msrb.mxu1 %v977_v28 }
 0x1b0   : > { %v890_v22 = vadd.f32 %v889_v11, %v4342_v13  ;;  %v962_v13 = vadd.f32 %v4344_v62, %v914_v16  ;;  %v947_v62 = vadd.f32 %v4360_v17, %v899_v36  ;;  %v5489_v17 = vld [vmem:[#allocation16_spill] sm:$0xff] }
 0x1b1   : > { %v922_v32 = vmax.f32 %v871_v12, 0.0  ;;  %3454 = vmatmul.msk.bf16.vlgmr.msrb.gmra.mxu0 %vm733_vm2, %v4380_v63 }
 0x1b2   : > { %1201 = vmatpush.bf16.msra.mxu0 %v4036_v42  ;;  %v923_v37 = vmax.f32 %v890_v22, 0.0  ;;  %3456 = vmatmul.msk.bf16.vlgmr.msrb.gmra.mxu1 %vm733_vm2, %v4380_v63  ;;  %v979_v38 = vpack.c.bf16 %v955_v57, %v947_v62 }
 0x1b3   : > { %1220 = vmatpush.bf16.msra.mxu1 %v4039_v43  ;;  %v970_v3 = vadd.f32 %v4356_v58, %v922_v32 }
 0x1b4   : > { %v971_v52 = vadd.f32 %v4356_v58, %v923_v37  ;;  %v978_v58 = vpack.c.bf16 %v954_v15, %v946_v59 }
 0x1b5   : > { %v986_v24 = vpack.c.bf16 %v970_v3, %v962_v13 }
 0x1b6   : > { %1202 = vmatpush.bf16.msra.mxu0 %v4051_v48  ;;  %v987_v47 = vpack.c.bf16 %v971_v52, %v963_v51 }
 0x1b7   : > { %1221 = vmatpush.bf16.msra.mxu1 %v4053_v49  ;;  %1144 = vmatpush.bf16.msrb.mxu2 %v986_v24 }
 0x1b8   : > { %1163 = vmatpush.bf16.msrb.mxu3 %v987_v47 }
 0x1ba   : > { %1203 = vmatpush.bf16.msra.mxu0 %v4078_v1 }
 0x1bb   : > { %1222 = vmatpush.bf16.msra.mxu1 %v4080_v2  ;;  %1145 = vmatpush.bf16.msrb.mxu2 %v978_v58 }
 0x1bc   : > { %1164 = vmatpush.bf16.msrb.mxu3 %v979_v38 }
 0x1be   : > { %1277 = vmatpush.bf16.msrb.mxu0 %v4099_v10  ;;  %3458 = vmatmul.msk.bf16.vlgmr.msrb.gmra.mxu2 %vm733_vm2, %v4380_v63 }
 0x1bf   : > { %1296 = vmatpush.bf16.msrb.mxu1 %v4114_v18  ;;  %1239 = vmatpush.bf16.msra.mxu2 %v4042_v44 }
 0x1c0   : > { %1258 = vmatpush.bf16.msra.mxu3 %v4045_v45 }
 0x1c1   : > { %3460 = vmatmul.msk.bf16.vlgmr.msrb.gmra.mxu3 %vm733_vm2, %v4380_v63  ;;  %3455 = vmatmul.msk.bf16.gmra.mxu0 %vm733_vm2, %v4409_v50  ;;  %v5491_v63 = vld [vmem:[#allocation20_spill] sm:$0xff] }
 0x1c2   : > { %1278 = vmatpush.bf16.msrb.mxu0 %v4119_v21  ;;  %3457 = vmatmul.msk.bf16.gmra.mxu1 %vm733_vm2, %v4409_v50 }
 0x1c3   : > { %1297 = vmatpush.bf16.msrb.mxu1 %v4143_v29  ;;  %1240 = vmatpush.bf16.msra.mxu2 %v4060_v53 }
 0x1c4   : > { %1259 = vmatpush.bf16.msra.mxu3 %v4062_v54 }
 0x1c6   : > { %1279 = vmatpush.bf16.msrb.mxu0 %v4152_v33 }
 0x1c7   : > { %1298 = vmatpush.bf16.msrb.mxu1 %v4162_v40  ;;  %1241 = vmatpush.bf16.msra.mxu2 %v4084_v4 }
 0x1c8   : > { %1260 = vmatpush.bf16.msra.mxu3 %v4086_v5 }
 0x1cb   : > { %1315 = vmatpush.bf16.msrb.mxu2 %v5489_v17 }
 0x1cc   : > { %1334 = vmatpush.bf16.msrb.mxu3 %v5490_v25 }
 0x1ce   : > { %3459 = vmatmul.msk.bf16.gmra.mxu2 %vm733_vm2, %v4409_v50 }
 0x1cf   : > { %1316 = vmatpush.bf16.msrb.mxu2 %v5491_v63 }
 0x1d0   : > { %1335 = vmatpush.bf16.msrb.mxu3 %v5492_v31 }
 0x1d1   : > { %3461 = vmatmul.msk.bf16.gmra.mxu3 %vm733_vm2, %v4409_v50  ;;  %3470 = vmatmul.msk.bf16.vlgmr.msra.gmra.mxu0 %vm415_vm1, %v3670_v27 }
 0x1d2   : > { %3472 = vmatmul.msk.bf16.vlgmr.msra.gmra.mxu1 %vm415_vm1, %v3670_v27 }
 0x1d3   : > { %1317 = vmatpush.bf16.msrb.mxu2 %v5493_v20 }
 0x1d4   : > { %1336 = vmatpush.bf16.msrb.mxu3 %v5494_v26 }
 0x1de   : > { %3474 = vmatmul.msk.bf16.vlgmr.msra.gmra.mxu2 %vm415_vm1, %v3670_v27 }
 0x1e1   : > { %3476 = vmatmul.msk.bf16.vlgmr.msra.gmra.mxu3 %vm415_vm1, %v3670_v27  ;;  %3471 = vmatmul.msk.bf16.gmra.mxu0 %vm415_vm1, %v3671_v39  ;;  %v4563_v24 = vpop.permute.xlu2 %1001 }
 0x1e2   : > { %3473 = vmatmul.msk.bf16.gmra.mxu1 %vm415_vm1, %v3671_v39 }
 0x1ee   : > { %3475 = vmatmul.msk.bf16.gmra.mxu2 %vm415_vm1, %v3671_v39 }
 0x1f1   : > { %3477 = vmatmul.msk.bf16.gmra.mxu3 %vm415_vm1, %v3671_v39  ;;  %3478 = vmatmul.msk.bf16.vlgmr.msrb.gmra.mxu0 %vm415_vm1, %v3670_v27 }
 0x1f2   : > { %3480 = vmatmul.msk.bf16.vlgmr.msrb.gmra.mxu1 %vm415_vm1, %v3670_v27 }
 0x1f8   : > { %v4565_v62 = vpop.permute.xlu1 %993 }
 0x1f9   : > { %v4582_v5 = vpop.permute.xlu0 %1005 }
 0x1fe   : > { %3482 = vmatmul.msk.bf16.vlgmr.msrb.gmra.mxu2 %vm415_vm1, %v3670_v27 }
 0x200   : > { %v4573_v20 = vpop.permute.xlu1 %1421 }
 0x201   : > { %3484 = vmatmul.msk.bf16.vlgmr.msrb.gmra.mxu3 %vm415_vm1, %v3670_v27  ;;  %3479 = vmatmul.msk.bf16.gmra.mxu0 %vm415_vm1, %v3671_v39 }
 0x202   : > { %3481 = vmatmul.msk.bf16.gmra.mxu1 %vm415_vm1, %v3671_v39 }
 0x20e   : > { %3483 = vmatmul.msk.bf16.gmra.mxu2 %vm415_vm1, %v3671_v39  ;;  %v1033_v50 = vpop.f32.mrf.mxu0 }
 0x20f   : > { %v1052_v35 = vpop.f32.mrf.mxu1  ;;  %v1034_v21 = vadd.f32 %v1033_v50, %v4565_v62 }
 0x210   : > { %v1053_v18 = vadd.f32 %v1052_v35, %v4565_v62 }
 0x211   : > { %3485 = vmatmul.msk.bf16.gmra.mxu3 %vm415_vm1, %v3671_v39  ;;  %v4571_v39 = vpop.permute.xlu2 %997 }
 0x216   : > { %v1035_v14 = vpop.f32.mrf.mxu0 }
 0x217   : > { %v1054_v46 = vpop.f32.mrf.mxu1  ;;  %v1036_v40 = vadd.f32 %v1035_v14, %v4571_v39 }
 0x218   : > { %v1055_v4 = vadd.f32 %v1054_v46, %v4571_v39 }
 0x21e   : > { %v1038_v30 = vpop.f32.mrf.mxu0 }
 0x21f   : > { %v1057_v19 = vpop.f32.mrf.mxu1  ;;  %v1039_v63 = vadd.f32 %v1038_v30, %v4563_v24 }
 0x220   : > { %v1058_v17 = vadd.f32 %v1057_v19, %v4563_v24 }
 0x221   : > { %v4519_v7 = vpop.f32.mrf.mxu2 }
 0x222   : > { %v4521_v34 = vpop.f32.mrf.mxu3 }
 0x226   : > { %v1040_v9 = vpop.f32.mrf.mxu0 }
 0x227   : > { %v1059_v55 = vpop.f32.mrf.mxu1  ;;  %v1041_v53 = vadd.f32 %v1040_v9, %v4582_v5 }
 0x228   : > { %v1060_v45 = vadd.f32 %v1059_v55, %v4582_v5 }
 0x229   : > { %v4523_v61 = vpop.f32.mrf.mxu2 }
 0x22a   : > { %v4525_v60 = vpop.f32.mrf.mxu3 }
 0x22e   : > { %v4527_v56 = vpop.f32.mrf.mxu0 }
 0x22f   : > { %v4529_v41 = vpop.f32.mrf.mxu1 }
 0x231   : > { %v4531_v11 = vpop.f32.mrf.mxu2 }
 0x232   : > { %v4533_v28 = vpop.f32.mrf.mxu3 }
 0x236   : > { %v4535_v16 = vpop.f32.mrf.mxu0 }
 0x237   : > { %v4537_v8 = vpop.f32.mrf.mxu1 }
 0x239   : > { %v4539_v12 = vpop.f32.mrf.mxu2 }
 0x23a   : > { %v4541_v22 = vpop.f32.mrf.mxu3 }
 0x23e   : > { %v4543_v6 = vpop.f32.mrf.mxu0 }
 0x23f   : > { %v4545_v23 = vpop.f32.mrf.mxu1 }
 0x241   : > { %v4547_v32 = vpop.f32.mrf.mxu2 }
 0x244   : > { %v4549_v37 = vpop.f32.mrf.mxu3 }
 0x246   : > { %v4551_v0 = vpop.f32.mrf.mxu0 }
 0x247   : > { %v4553_v36 = vpop.f32.mrf.mxu1 }
 0x249   : > { %v4555_v13 = vpop.f32.mrf.mxu2 }
 0x24c   : > { %v4557_v51 = vpop.f32.mrf.mxu3 }
 0x24e   : > { %v1205_v3 = vpop.f32.mrf.mxu0 }
 0x24f   : > { %v1224_v52 = vpop.f32.mrf.mxu1  ;;  %v1348_v19 = vadd.f32 %v1205_v3, %v1034_v21 }
 0x251   : > { %v4559_v15 = vpop.f32.mrf.mxu2  ;;  %v1380_v35 = vmax.f32 %v1348_v19, 0.0 }
 0x254   : > { %v4561_v57 = vpop.f32.mrf.mxu3 }
 0x256   : > { %v1207_v47 = vpop.f32.mrf.mxu0 }
 0x257   : > { %v1226_v59 = vpop.f32.mrf.mxu1  ;;  %v1356_v54 = vadd.f32 %v1207_v47, %v1036_v40  ;;  %v4591_v47 = vpop.permute.xlu1 %1417 }
 0x258   : > { %v1357_v30 = vadd.f32 %v1226_v59, %v1055_v4 }
 0x259   : > { %v4567_v58 = vpop.f32.mrf.mxu2 }
 0x25a   : > { %v1389_v9 = vmax.f32 %v1357_v30, 0.0 }
 0x25c   : > { %v4569_v38 = vpop.f32.mrf.mxu3 }
 0x25e   : > { %v1210_v27 = vpop.f32.mrf.mxu0 }
 0x25f   : > { %v1229_v26 = vpop.f32.mrf.mxu1  ;;  %v1364_v33 = vadd.f32 %v1210_v27, %v1039_v63  ;;  %v1349_v27 = vadd.f32 %v1224_v52, %v1053_v18 }
 0x260   : > { %v1365_v29 = vadd.f32 %v1229_v26, %v1058_v17  ;;  %v4589_v17 = vpop.permute.xlu2 %1425  ;;  %v1388_v26 = vmax.f32 %v1356_v54, 0.0 }
 0x261   : > { %v4575_v31 = vpop.f32.mrf.mxu2  ;;  %v1396_v44 = vmax.f32 %v1364_v33, 0.0 }
 0x262   : > { %v1397_v2 = vmax.f32 %v1365_v29, 0.0  ;;  %v1436_v54 = vadd.f32 %v4591_v47, %v1388_v26  ;;  %v1096_v26 = vadd.f32 %v4533_v28, %v4563_v24  ;;  %v1079_v28 = vadd.f32 %v4539_v12, %v4582_v5 }
 0x263   : > { %v1444_v55 = vadd.f32 %v4573_v20, %v1396_v44 }
 0x264   : > { %v4578_v25 = vpop.f32.mrf.mxu3 }
 0x266   : > { %v1212_v10 = vpop.f32.mrf.mxu0 }
 0x267   : > { %v1372_v14 = vadd.f32 %v1212_v10, %v1041_v53  ;;  %v1231_v63 = vpop.f32.mrf.mxu1  ;;  %v1381_v53 = vmax.f32 %v1349_v27, 0.0  ;;  %v4595_v10 = vpop.permute.xlu0 %1413  ;;  %v1077_v27 = vadd.f32 %v4531_v11, %v4563_v24  ;;  %v1072_v11 = vadd.f32 %v4519_v7, %v4565_v62 }
 0x268   : > { %v1373_v1 = vadd.f32 %v1231_v63, %v1060_v45  ;;  %v1445_v45 = vadd.f32 %v4573_v20, %v1397_v2  ;;  %v1428_v44 = vadd.f32 %v4595_v10, %v1380_v35  ;;  %v4610_v63 = vld [vmem:[%s5438_s2 + $0x40] sm:$0xff] }
 0x269   : > { %v1245_v46 = vpop.f32.mrf.mxu2  ;;  %v1404_v40 = vmax.f32 %v1372_v14, 0.0  ;;  %v1429_v30 = vadd.f32 %v4595_v10, %v1381_v53  ;;  %v1350_v7 = vadd.f32 %v4575_v31, %v1072_v11 }
 0x26a   : > { %v1405_v4 = vmax.f32 %v1373_v1, 0.0  ;;  %v1437_v1 = vadd.f32 %v4591_v47, %v1389_v9  ;;  %v1460_v19 = vpack.c.bf16 %v1436_v54, %v1428_v44 }
 0x26b   : > { %v1452_v21 = vadd.f32 %v4589_v17, %v1404_v40  ;;  %v1074_v40 = vadd.f32 %v4523_v61, %v4571_v39  ;;  %v1091_v61 = vadd.f32 %v4521_v34, %v4565_v62  ;;  %v4646_v34 = vld [vmem:[%s5439_s3] sm:$0xff] }
 0x26c   : > { %v1264_v50 = vpop.f32.mrf.mxu3  ;;  %v1453_v18 = vadd.f32 %v4589_v17, %v1405_v4  ;;  %v1461_v14 = vpack.c.bf16 %v1437_v1, %v1429_v30  ;;  %v1093_v4 = vadd.f32 %v4525_v60, %v4571_v39  ;;  %v1098_v60 = vadd.f32 %v4541_v22, %v4582_v5 }
 0x26d   : > { %v1468_v29 = vpack.c.bf16 %v1452_v21, %v1444_v55  ;;  %v1358_v21 = vadd.f32 %v1245_v46, %v1074_v40  ;;  %v1351_v22 = vadd.f32 %v4578_v25, %v1091_v61 }
 0x26e   : > { %v4600_v33 = vpop.f32.mrf.mxu0  ;;  %v1469_v3 = vpack.c.bf16 %v1453_v18, %v1445_v45  ;;  %v1359_v45 = vadd.f32 %v1264_v50, %v1093_v4 }
 0x26f   : > { %v4603_v52 = vpop.f32.mrf.mxu1  ;;  %1518 = vmatpush.bf16.msra.mxu0 %v1468_v29  ;;  %v3870_v29 = vmov 3   ;;  %v1390_v1 = vmax.f32 %v1358_v21, 0.0 }
 0x270   : > { %1537 = vmatpush.bf16.msra.mxu1 %v1469_v3  ;;  %3745 = vset.pattern.permute.xlu0 %v3870_v29  ;;  %v4640_v3 = vld [vmem:[%s5439_s3 + $0x18] sm:$0xff]  ;;  %v1391_v30 = vmax.f32 %v1359_v45, 0.0 }
 0x271   : > { %v1248_v59 = vpop.f32.mrf.mxu2  ;;  %3746 = vset.pattern.permute.xlu1 %v3870_v29  ;;  %1493 = vperm.xlu0 %3745, %v4640_v3   ;;  %v1438_v4 = vadd.f32 %v4591_v47, %v1390_v1 }
 0x272   : > { %v1366_v9 = vadd.f32 %v1248_v59, %v1077_v27  ;;  %1481 = vperm.xlu1 %3746, %v4646_v34   ;;  %3744 = vset.pattern.permute.xlu2 %v3870_v29  ;;  %v4654_v59 = vld [vmem:[%s5439_s3 + $0x10] sm:$0xff]  ;;  %v1383_v27 = vmax.f32 %v1351_v22, 0.0 }
 0x273   : > { %1519 = vmatpush.bf16.msra.mxu0 %v1460_v19  ;;  %1489 = vperm.xlu2 %3744, %v4654_v59   ;;  %v1382_v19 = vmax.f32 %v1350_v7, 0.0  ;;  %v1134_v7 = vadd.f32 %v4545_v23, %v4563_v24  ;;  %v1131_v23 = vadd.f32 %v4537_v8, %v4571_v39 }
 0x274   : > { %v1267_v2 = vpop.f32.mrf.mxu3  ;;  %1538 = vmatpush.bf16.msra.mxu1 %v1461_v14  ;;  %v1398_v12 = vmax.f32 %v1366_v9, 0.0 }
 0x275   : > { %v1367_v35 = vadd.f32 %v1267_v2, %v1096_v26  ;;  %v1430_v45 = vadd.f32 %v4595_v10, %v1382_v19  ;;  %v1136_v19 = vadd.f32 %v4553_v36, %v4582_v5 }
 0x276   : > { %v4620_v55 = vpop.f32.mrf.mxu0  ;;  %3494 = vmatmul.msk.bf16.vlgmr.msra.gmra.mxu0 %vm733_vm2, %v4610_v63  ;;  %v1446_v14 = vadd.f32 %v4573_v20, %v1398_v12  ;;  %v1431_v12 = vadd.f32 %v4595_v10, %v1383_v27 }
 0x277   : > { %v1302_v53 = vpop.f32.mrf.mxu1  ;;  %3496 = vmatmul.msk.bf16.vlgmr.msra.gmra.mxu1 %vm733_vm2, %v4610_v63  ;;  %v1399_v31 = vmax.f32 %v1367_v35, 0.0  ;;  %v1462_v22 = vpack.c.bf16 %v1438_v4, %v1430_v45 }
 0x279   : > { %v1250_v18 = vpop.f32.mrf.mxu2  ;;  %v1447_v26 = vadd.f32 %v4573_v20, %v1399_v31  ;;  %v4683_v31 = vld [vmem:[%s5439_s3 + $0x8] sm:$0xff] }
 0x27a   : > { %v1374_v46 = vadd.f32 %v1250_v18, %v1079_v28  ;;  %v1439_v28 = vadd.f32 %v4591_v47, %v1391_v30 }
 0x27b   : > { %1485 = vperm.xlu2 %3744, %v4683_v31  }
 0x27c   : > { %v1269_v54 = vpop.f32.mrf.mxu3  ;;  %v1406_v44 = vmax.f32 %v1374_v46, 0.0  ;;  %v4676_v46 = vld [vmem:[%s5438_s2 + $0x48] sm:$0xff]  ;;  %v1463_v1 = vpack.c.bf16 %v1439_v28, %v1431_v12 }
 0x27d   : > { %v1375_v50 = vadd.f32 %v1269_v54, %v1098_v60  ;;  %v1115_v60 = vadd.f32 %v4543_v6, %v4563_v24  ;;  %v1112_v54 = vadd.f32 %v4535_v16, %v4571_v39  ;;  %v1117_v16 = vadd.f32 %v4551_v0, %v4582_v5 }
 0x27e   : > { %v1454_v25 = vadd.f32 %v4589_v17, %v1406_v44  ;;  %v1286_v9 = vpop.f32.mrf.mxu0  ;;  %v1110_v44 = vadd.f32 %v4527_v56, %v4565_v62 }
 0x27f   : > { %v1407_v2 = vmax.f32 %v1375_v50, 0.0  ;;  %v1305_v11 = vpop.f32.mrf.mxu1  ;;  %v1368_v6 = vadd.f32 %v1286_v9, %v1115_v60  ;;  %v1360_v30 = vadd.f32 %v4620_v55, %v1112_v54 }
 0x280   : > { %v1470_v35 = vpack.c.bf16 %v1454_v25, %v1446_v14  ;;  %v1369_v50 = vadd.f32 %v1305_v11, %v1134_v7  ;;  %v1361_v14 = vadd.f32 %v1302_v53, %v1131_v23  ;;  %v1352_v56 = vadd.f32 %v4600_v33, %v1110_v44 }
 0x281   : > { %v1455_v40 = vadd.f32 %v4589_v17, %v1407_v2  ;;  %v4663_v61 = vpop.f32.mrf.mxu2  ;;  %v1129_v2 = vadd.f32 %v4529_v41, %v4565_v62  ;;  %v1400_v25 = vmax.f32 %v1368_v6, 0.0  ;;  %v1392_v36 = vmax.f32 %v1360_v30, 0.0 }
 0x282   : > { %1556 = vmatpush.bf16.msra.mxu2 %v1470_v35  ;;  %v1401_v41 = vmax.f32 %v1369_v50, 0.0  ;;  %v1393_v33 = vmax.f32 %v1361_v14, 0.0  ;;  %v1384_v35 = vmax.f32 %v1352_v56, 0.0  ;;  %v1172_v30 = vadd.f32 %v4561_v57, %v4563_v24 }
 0x283   : > { %v1471_v21 = vpack.c.bf16 %v1455_v40, %v1447_v26  ;;  %v1353_v55 = vadd.f32 %v4603_v52, %v1129_v2  ;;  %v1448_v11 = vadd.f32 %v4573_v20, %v1400_v25  ;;  %v1440_v45 = vadd.f32 %v4591_v47, %v1392_v36 }
 0x284   : > { %v4668_v18 = vpop.f32.mrf.mxu3  ;;  %v1441_v12 = vadd.f32 %v4591_v47, %v1393_v33  ;;  %v1432_v6 = vadd.f32 %v4595_v10, %v1384_v35  ;;  %v1150_v2 = vadd.f32 %v4555_v13, %v4571_v39  ;;  %v1169_v14 = vadd.f32 %v4557_v51, %v4571_v39 }
 0x285   : > { %1575 = vmatpush.bf16.msra.mxu3 %v1471_v21  ;;  %v1385_v52 = vmax.f32 %v1353_v55, 0.0  ;;  %v1449_v21 = vadd.f32 %v4573_v20, %v1401_v41  ;;  %v1148_v56 = vadd.f32 %v4547_v32, %v4565_v62  ;;  %v1167_v13 = vadd.f32 %v4549_v37, %v4565_v62 }
 0x286   : > { %1557 = vmatpush.bf16.msra.mxu2 %v1462_v22  ;;  %v1288_v8 = vpop.f32.mrf.mxu0  ;;  %3495 = vmatmul.msk.bf16.gmra.mxu0 %vm733_vm2, %v4676_v46  ;;  %v1174_v51 = vadd.f32 %v4569_v38, %v4582_v5 }
 0x287   : > { %v1376_v27 = vadd.f32 %v1288_v8, %v1117_v16  ;;  %v1307_v0 = vpop.f32.mrf.mxu1  ;;  %3497 = vmatmul.msk.bf16.gmra.mxu1 %vm733_vm2, %v4676_v46  ;;  %v1433_v22 = vadd.f32 %v4595_v10, %v1385_v52  ;;  %v1153_v16 = vadd.f32 %v4559_v15, %v4563_v24  ;;  %v1155_v15 = vadd.f32 %v4567_v58, %v4582_v5 }
 0x288   : > { %v1377_v26 = vadd.f32 %v1307_v0, %v1136_v19  ;;  %v1354_v32 = vadd.f32 %v4663_v61, %v1148_v56  ;;  %v1355_v0 = vadd.f32 %v4668_v18, %v1167_v13 }
 0x289   : > { %1576 = vmatpush.bf16.msra.mxu3 %v1463_v1  ;;  %v1321_v40 = vpop.f32.mrf.mxu2  ;;  %3498 = vmatmul.msk.bf16.vlgmr.msra.gmra.mxu2 %vm733_vm2, %v4610_v63  ;;  %v1408_v53 = vmax.f32 %v1376_v27, 0.0  ;;  %v1464_v1 = vpack.c.bf16 %v1440_v45, %v1432_v6  ;;  %v1465_v44 = vpack.c.bf16 %v1441_v12, %v1433_v22 }
 0x28a   : > { %v1409_v4 = vmax.f32 %v1377_v26, 0.0  ;;  %v1362_v25 = vadd.f32 %v1321_v40, %v1150_v2  ;;  %v1386_v26 = vmax.f32 %v1354_v32, 0.0  ;;  %v1387_v61 = vmax.f32 %v1355_v0, 0.0 }
 0x28b   : > { %v1456_v28 = vadd.f32 %v4589_v17, %v1408_v53 }
 0x28c   : > { %v1340_v9 = vpop.f32.mrf.mxu3  ;;  %3500 = vmatmul.msk.bf16.vlgmr.msra.gmra.mxu3 %vm733_vm2, %v4610_v63  ;;  %v1457_v60 = vadd.f32 %v4589_v17, %v1409_v4  ;;  %v1394_v62 = vmax.f32 %v1362_v25, 0.0 }
 0x28d   : > { %v1472_v7 = vpack.c.bf16 %v1456_v28, %v1448_v11  ;;  %v1363_v57 = vadd.f32 %v1340_v9, %v1169_v14  ;;  %v1434_v11 = vadd.f32 %v4595_v10, %v1386_v26  ;;  %v1435_v28 = vadd.f32 %v4595_v10, %v1387_v61 }
 0x28e   : > { %v1473_v54 = vpack.c.bf16 %v1457_v60, %v1449_v21  ;;  %v1442_v33 = vadd.f32 %v4591_v47, %v1394_v62 }
 0x28f   : > { %1594 = vmatpush.bf16.msrb.mxu0 %v1472_v7  ;;  %v1395_v5 = vmax.f32 %v1363_v57, 0.0 }
 0x290   : > { %1613 = vmatpush.bf16.msrb.mxu1 %v1473_v54  ;;  %v1466_v52 = vpack.c.bf16 %v1442_v33, %v1434_v11 }
 0x291   : > { %v1324_v23 = vpop.f32.mrf.mxu2  ;;  %v1443_v18 = vadd.f32 %v4591_v47, %v1395_v5 }
 0x292   : > { %v1370_v19 = vadd.f32 %v1324_v23, %v1153_v16 }
 0x293   : > { %1595 = vmatpush.bf16.msrb.mxu0 %v1464_v1  ;;  %v1467_v21 = vpack.c.bf16 %v1443_v18, %v1435_v28 }
 0x294   : > { %v1343_v50 = vpop.f32.mrf.mxu3  ;;  %1614 = vmatpush.bf16.msrb.mxu1 %v1465_v44  ;;  %v1402_v39 = vmax.f32 %v1370_v19, 0.0 }
 0x295   : > { %v1371_v8 = vadd.f32 %v1343_v50, %v1172_v30 }
 0x296   : > { %3502 = vmatmul.msk.bf16.vlgmr.msrb.gmra.mxu0 %vm733_vm2, %v4610_v63  ;;  %v1450_v40 = vadd.f32 %v4573_v20, %v1402_v39 }
 0x297   : > { %3504 = vmatmul.msk.bf16.vlgmr.msrb.gmra.mxu1 %vm733_vm2, %v4610_v63  ;;  %v1403_v55 = vmax.f32 %v1371_v8, 0.0 }
 0x299   : > { %v1326_v24 = vpop.f32.mrf.mxu2  ;;  %3499 = vmatmul.msk.bf16.gmra.mxu2 %vm733_vm2, %v4676_v46  ;;  %v1451_v53 = vadd.f32 %v4573_v20, %v1403_v55 }
 0x29a   : > { %v1378_v27 = vadd.f32 %v1326_v24, %v1155_v15 }
 0x29c   : > { %v1345_v58 = vpop.f32.mrf.mxu3  ;;  %3501 = vmatmul.msk.bf16.gmra.mxu3 %vm733_vm2, %v4676_v46  ;;  %v1410_v41 = vmax.f32 %v1378_v27, 0.0 }
 0x29d   : > { %v1379_v37 = vadd.f32 %v1345_v58, %v1174_v51 }
 0x29e   : > { %v1458_v36 = vadd.f32 %v4589_v17, %v1410_v41  ;;  %v4780_v41 = vld [vmem:[%s5438_s2 + $0x50] sm:$0xff] }
 0x29f   : > { %v1411_v38 = vmax.f32 %v1379_v37, 0.0 }
 0x2a0   : > { %v1474_v4 = vpack.c.bf16 %v1458_v36, %v1450_v40  ;;  %v3871_v36 = vmov 4  }
 0x2a1   : > { %v1459_v9 = vadd.f32 %v4589_v17, %v1411_v38  ;;  %3749 = vset.pattern.permute.xlu0 %v3871_v36  ;;  %3747 = vset.pattern.permute.xlu1 %v3871_v36 }
 0x2a2   : > { %1632 = vmatpush.bf16.msrb.mxu2 %v1474_v4  ;;  %1717 = vperm.xlu0 %3749, %v4646_v34  }
 0x2a3   : > { %v1475_v35 = vpack.c.bf16 %v1459_v9, %v1451_v53  ;;  %1725 = vperm.xlu1 %3747, %v4654_v59   ;;  %3748 = vset.pattern.permute.xlu2 %v3871_v36 }
 0x2a4   : > { %1729 = vperm.xlu2 %3748, %v4640_v3  }
 0x2a5   : > { %1651 = vmatpush.bf16.msrb.mxu3 %v1475_v35 }
 0x2a6   : > { %1633 = vmatpush.bf16.msrb.mxu2 %v1466_v52  ;;  %3503 = vmatmul.msk.bf16.gmra.mxu0 %vm733_vm2, %v4676_v46 }
 0x2a7   : > { %3505 = vmatmul.msk.bf16.gmra.mxu1 %vm733_vm2, %v4676_v46 }
 0x2a9   : > { %1652 = vmatpush.bf16.msrb.mxu3 %v1467_v21  ;;  %3506 = vmatmul.msk.bf16.vlgmr.msrb.gmra.mxu2 %vm733_vm2, %v4610_v63  ;;  %v4798_v21 = vld [vmem:[%s5438_s2 + $0x58] sm:$0xff] }
 0x2ab   : > { %1721 = vperm.xlu1 %3747, %v4683_v31  }
 0x2ac   : > { %3508 = vmatmul.msk.bf16.vlgmr.msrb.gmra.mxu3 %vm733_vm2, %v4610_v63 }
 0x2b9   : > { %3507 = vmatmul.msk.bf16.gmra.mxu2 %vm733_vm2, %v4676_v46 }
 0x2bc   : > { %3509 = vmatmul.msk.bf16.gmra.mxu3 %vm733_vm2, %v4676_v46 }
 0x2cd   : > { %v4761_v60 = vpop.permute.xlu2 %1489 }
 0x2d5   : > { %v4763_v12 = vpop.permute.xlu2 %1485 }
 0x2e3   : > { %v4766_v6 = vpop.permute.xlu0 %1493 }
 0x2e4   : > { %v4768_v63 = vpop.permute.xlu1 %1481 }
 0x2f3   : > { %v1521_v20 = vpop.f32.mrf.mxu0 }
 0x2f4   : > { %v1540_v17 = vpop.f32.mrf.mxu1  ;;  %v1522_v46 = vadd.f32 %v1521_v20, %v4768_v63 }
 0x2f5   : > { %v1541_v44 = vadd.f32 %v1540_v17, %v4768_v63 }
 0x2f6   : > { %v1664_v25 = vmax.f32 %v1522_v46, 0.0 }
 0x2f7   : > { %v1665_v57 = vmax.f32 %v1541_v44, 0.0 }
 0x2fb   : > { %v1523_v47 = vpop.f32.mrf.mxu0 }
 0x2fc   : > { %v1542_v10 = vpop.f32.mrf.mxu1  ;;  %v1524_v23 = vadd.f32 %v1523_v47, %v4763_v12 }
 0x2fd   : > { %v1543_v16 = vadd.f32 %v1542_v10, %v4763_v12 }
 0x2fe   : > { %v1672_v13 = vmax.f32 %v1524_v23, 0.0 }
 0x2ff   : > { %v1673_v24 = vmax.f32 %v1543_v16, 0.0 }
 0x300   : > { %v1696_v27 = vpack.c.bf16 %v1672_v13, %v1664_v25 }
 0x301   : > { %v1697_v55 = vpack.c.bf16 %v1673_v24, %v1665_v57 }
 0x303   : > { %v1526_v45 = vpop.f32.mrf.mxu0 }
 0x304   : > { %v1545_v7 = vpop.f32.mrf.mxu1  ;;  %v1527_v54 = vadd.f32 %v1526_v45, %v4761_v60 }
 0x305   : > { %v1546_v22 = vadd.f32 %v1545_v7, %v4761_v60 }
 0x306   : > { %v1680_v2 = vmax.f32 %v1527_v54, 0.0 }
 0x307   : > { %v1681_v56 = vmax.f32 %v1546_v22, 0.0 }
 0x30b   : > { %v1528_v50 = vpop.f32.mrf.mxu0 }
 0x30c   : > { %v1559_v1 = vpop.f32.mrf.mxu2  ;;  %v1529_v30 = vadd.f32 %v1528_v50, %v4766_v6  ;;  %v1547_v19 = vpop.f32.mrf.mxu1 }
 0x30d   : > { %v1548_v8 = vadd.f32 %v1547_v19, %v4766_v6  ;;  %v1560_v20 = vadd.f32 %v1559_v1, %v4768_v63 }
 0x30e   : > { %v1688_v15 = vmax.f32 %v1529_v30, 0.0 }
 0x30f   : > { %v1578_v14 = vpop.f32.mrf.mxu3  ;;  %v1689_v51 = vmax.f32 %v1548_v8, 0.0  ;;  %v1666_v50 = vmax.f32 %v1560_v20, 0.0 }
 0x310   : > { %v1704_v32 = vpack.c.bf16 %v1688_v15, %v1680_v2  ;;  %v1579_v10 = vadd.f32 %v1578_v14, %v4768_v63 }
 0x311   : > { %v1705_v39 = vpack.c.bf16 %v1689_v51, %v1681_v56 }
 0x312   : > { %1754 = vmatpush.bf16.msra.mxu0 %v1704_v32  ;;  %v1667_v1 = vmax.f32 %v1579_v10, 0.0 }
 0x313   : > { %1773 = vmatpush.bf16.msra.mxu1 %v1705_v39  ;;  %v1597_v0 = vpop.f32.mrf.mxu0 }
 0x314   : > { %v1561_v58 = vpop.f32.mrf.mxu2  ;;  %v1616_v62 = vpop.f32.mrf.mxu1  ;;  %v1598_v19 = vadd.f32 %v1597_v0, %v4768_v63 }
 0x315   : > { %v1562_v4 = vadd.f32 %v1561_v58, %v4763_v12  ;;  %v1617_v13 = vadd.f32 %v1616_v62, %v4768_v63 }
 0x316   : > { %1755 = vmatpush.bf16.msra.mxu0 %v1696_v27  ;;  %v1668_v0 = vmax.f32 %v1598_v19, 0.0 }
 0x317   : > { %v1580_v37 = vpop.f32.mrf.mxu3  ;;  %1774 = vmatpush.bf16.msra.mxu1 %v1697_v55  ;;  %v1674_v54 = vmax.f32 %v1562_v4, 0.0 }
 0x318   : > { %v1581_v28 = vadd.f32 %v1580_v37, %v4763_v12 }
 0x319   : > { %3518 = vmatmul.msk.bf16.vlgmr.msra.gmra.mxu0 %vm733_vm2, %v4780_v41  ;;  %v1698_v25 = vpack.c.bf16 %v1674_v54, %v1666_v50 }
 0x31a   : > { %3520 = vmatmul.msk.bf16.vlgmr.msra.gmra.mxu1 %vm733_vm2, %v4780_v41  ;;  %v1675_v46 = vmax.f32 %v1581_v28, 0.0 }
 0x31b   : > { %v1599_v38 = vpop.f32.mrf.mxu0 }
 0x31c   : > { %v1564_v5 = vpop.f32.mrf.mxu2  ;;  %v1618_v40 = vpop.f32.mrf.mxu1  ;;  %v1600_v14 = vadd.f32 %v1599_v38, %v4763_v12  ;;  %v1699_v24 = vpack.c.bf16 %v1675_v46, %v1667_v1 }
 0x31d   : > { %v1565_v61 = vadd.f32 %v1564_v5, %v4761_v60  ;;  %v1619_v51 = vadd.f32 %v1618_v40, %v4763_v12  ;;  %v1669_v5 = vmax.f32 %v1617_v13, 0.0 }
 0x31e   : > { %v1676_v55 = vmax.f32 %v1600_v14, 0.0 }
 0x31f   : > { %v1583_v26 = vpop.f32.mrf.mxu3  ;;  %v1682_v17 = vmax.f32 %v1565_v61, 0.0  ;;  %v1677_v38 = vmax.f32 %v1619_v51, 0.0 }
 0x320   : > { %v1584_v53 = vadd.f32 %v1583_v26, %v4761_v60  ;;  %v1700_v36 = vpack.c.bf16 %v1676_v55, %v1668_v0 }
 0x321   : > { %v1701_v61 = vpack.c.bf16 %v1677_v38, %v1669_v5 }
 0x322   : > { %v1683_v45 = vmax.f32 %v1584_v53, 0.0 }
 0x323   : > { %v1602_v33 = vpop.f32.mrf.mxu0 }
 0x324   : > { %v1566_v9 = vpop.f32.mrf.mxu2  ;;  %v1621_v11 = vpop.f32.mrf.mxu1  ;;  %v1603_v44 = vadd.f32 %v1602_v33, %v4761_v60 }
 0x325   : > { %v1567_v18 = vadd.f32 %v1566_v9, %v4766_v6  ;;  %v1622_v16 = vadd.f32 %v1621_v11, %v4761_v60 }
 0x326   : > { %v1684_v32 = vmax.f32 %v1603_v44, 0.0 }
 0x327   : > { %v1585_v35 = vpop.f32.mrf.mxu3  ;;  %v1690_v47 = vmax.f32 %v1567_v18, 0.0  ;;  %v1685_v27 = vmax.f32 %v1622_v16, 0.0 }
 0x328   : > { %v1586_v52 = vadd.f32 %v1585_v35, %v4766_v6 }
 0x329   : > { %v1706_v22 = vpack.c.bf16 %v1690_v47, %v1682_v17  ;;  %3519 = vmatmul.msk.bf16.gmra.mxu0 %vm733_vm2, %v4798_v21 }
 0x32a   : > { %v1691_v7 = vmax.f32 %v1586_v52, 0.0  ;;  %3521 = vmatmul.msk.bf16.gmra.mxu1 %vm733_vm2, %v4798_v21 }
 0x32b   : > { %1792 = vmatpush.bf16.msra.mxu2 %v1706_v22  ;;  %v1604_v30 = vpop.f32.mrf.mxu0 }
 0x32c   : > { %v1707_v23 = vpack.c.bf16 %v1691_v7, %v1683_v45  ;;  %v1635_v2 = vpop.f32.mrf.mxu2  ;;  %v1605_v8 = vadd.f32 %v1604_v30, %v4766_v6  ;;  %v1623_v56 = vpop.f32.mrf.mxu1 }
 0x32d   : > { %v1624_v57 = vadd.f32 %v1623_v56, %v4766_v6  ;;  %v1636_v17 = vadd.f32 %v1635_v2, %v4768_v63  ;;  %v4847_v2 = vpop.permute.xlu1 %1725  ;;  %v4851_v56 = vpop.permute.xlu0 %1717 }
 0x32e   : > { %1811 = vmatpush.bf16.msra.mxu3 %v1707_v23  ;;  %v1692_v39 = vmax.f32 %v1605_v8, 0.0  ;;  %v4849_v8 = vpop.permute.xlu2 %1729 }
 0x32f   : > { %v1654_v15 = vpop.f32.mrf.mxu3  ;;  %1793 = vmatpush.bf16.msra.mxu2 %v1698_v25  ;;  %v1693_v58 = vmax.f32 %v1624_v57, 0.0  ;;  %v1670_v50 = vmax.f32 %v1636_v17, 0.0 }
 0x330   : > { %v1708_v37 = vpack.c.bf16 %v1692_v39, %v1684_v32  ;;  %v1655_v45 = vadd.f32 %v1654_v15, %v4768_v63 }
 0x331   : > { %v1709_v26 = vpack.c.bf16 %v1693_v58, %v1685_v27 }
 0x332   : > { %1812 = vmatpush.bf16.msra.mxu3 %v1699_v24  ;;  %3522 = vmatmul.msk.bf16.vlgmr.msra.gmra.mxu2 %vm733_vm2, %v4780_v41 }
 0x333   : > { %1830 = vmatpush.bf16.msrb.mxu0 %v1708_v37  ;;  %1849 = vmatpush.bf16.msrb.mxu1 %v1709_v26 }
 0x334   : > { %v1637_v62 = vpop.f32.mrf.mxu2 }
 0x335   : > { %3524 = vmatmul.msk.bf16.vlgmr.msra.gmra.mxu3 %vm733_vm2, %v4780_v41  ;;  %v1638_v35 = vadd.f32 %v1637_v62, %v4763_v12  ;;  %v4854_v25 = vpop.permute.xlu1 %1721 }
 0x337   : > { %v1656_v40 = vpop.f32.mrf.mxu3  ;;  %1831 = vmatpush.bf16.msrb.mxu0 %v1700_v36  ;;  %1850 = vmatpush.bf16.msrb.mxu1 %v1701_v61  ;;  %v1678_v22 = vmax.f32 %v1638_v35, 0.0  ;;  %v3872_v61 = vmov 6  }
 0x338   : > { %v1657_v52 = vadd.f32 %v1656_v40, %v4763_v12  ;;  %v1671_v12 = vmax.f32 %v1655_v45, 0.0  ;;  %v4877_v40 = vld [vmem:[%s5438_s2 + $0x60] sm:$0x1]  ;;  %3750 = vset.pattern.permute.xlu2 %v3872_v61  ;;  %3752 = vset.pattern.permute.xlu0 %v3872_v61 }
 0x339   : > { %2051 = vperm.xlu2 %3750, %v4654_v59   ;;  %2047 = vperm.xlu0 %3752, %v4683_v31  }
 0x33a   : > { %3526 = vmatmul.msk.bf16.vlgmr.msrb.gmra.mxu0 %vm733_vm2, %v4780_v41  ;;  %3528 = vmatmul.msk.bf16.vlgmr.msrb.gmra.mxu1 %vm733_vm2, %v4780_v41  ;;  %v1679_v46 = vmax.f32 %v1657_v52, 0.0 }
 0x33b   : > { %3751 = vset.pattern.permute.xlu1 %v3872_v61 }
 0x33c   : > { %v1640_v53 = vpop.f32.mrf.mxu2  ;;  %v1703_v44 = vpack.c.bf16 %v1679_v46, %v1671_v12  ;;  %2055 = vperm.xlu1 %3751, %v4640_v3  }
 0x33d   : > { %v1641_v33 = vadd.f32 %v1640_v53, %v4761_v60 }
 0x33f   : > { %v1659_v9 = vpop.f32.mrf.mxu3  ;;  %v1686_v47 = vmax.f32 %v1641_v33, 0.0 }
 0x340   : > { %v1660_v4 = vadd.f32 %v1659_v9, %v4761_v60 }
 0x341   : > { %2043 = vperm.xlu2 %3750, %v4646_v34  }
 0x342   : > { %3523 = vmatmul.msk.bf16.gmra.mxu2 %vm733_vm2, %v4798_v21  ;;  %v1687_v7 = vmax.f32 %v1660_v4, 0.0 }
 0x344   : > { %v1642_v18 = vpop.f32.mrf.mxu2  ;;  %3753 = vset.pattern.permute.xlu1 %v3870_v29 }
 0x345   : > { %3525 = vmatmul.msk.bf16.gmra.mxu3 %vm733_vm2, %v4798_v21  ;;  %v1643_v11 = vadd.f32 %v1642_v18, %v4766_v6 }
 0x347   : > { %v1661_v28 = vpop.f32.mrf.mxu3  ;;  %v1694_v10 = vmax.f32 %v1643_v11, 0.0 }
 0x348   : > { %v1662_v20 = vadd.f32 %v1661_v28, %v4766_v6  ;;  %v1702_v6 = vpack.c.bf16 %v1678_v22, %v1670_v50  ;;  %v3799_v28 = vld [vmem:[%s5437_s1 + $0x10] sm:$0xff] }
 0x349   : > { %v1710_v60 = vpack.c.bf16 %v1694_v10, %v1686_v47  ;;  %2471 = vperm.xlu1 %3753, %v3799_v28   ;;  %3754 = vset.pattern.permute.xlu2 %v3870_v29  ;;  %v5496_v28 = vld [vmem:[#allocation11_spill] sm:$0xff] }
 0x34a   : > { %v1695_v54 = vmax.f32 %v1662_v20, 0.0  ;;  %3527 = vmatmul.msk.bf16.gmra.mxu0 %vm733_vm2, %v4798_v21  ;;  %3529 = vmatmul.msk.bf16.gmra.mxu1 %vm733_vm2, %v4798_v21 }
 0x34b   : > { %1868 = vmatpush.bf16.msrb.mxu2 %v1710_v60 }
 0x34c   : > { %v1711_v23 = vpack.c.bf16 %v1695_v54, %v1687_v7 }
 0x34e   : > { %1887 = vmatpush.bf16.msrb.mxu3 %v1711_v23  ;;  %v3800_v23 = vld [vmem:[%s5437_s1 + $0x18] sm:$0xff] }
 0x34f   : > { %1869 = vmatpush.bf16.msrb.mxu2 %v1702_v6  ;;  %2475 = vperm.xlu2 %3754, %v3800_v23   ;;  %v5511_v23 = vld [vmem:[#allocation20_spill] sm:$0xff] }
 0x352   : > { %1888 = vmatpush.bf16.msrb.mxu3 %v1703_v44  ;;  %3530 = vmatmul.msk.bf16.vlgmr.msrb.gmra.mxu2 %vm733_vm2, %v4780_v41 }
 0x355   : > { %3532 = vmatmul.msk.bf16.vlgmr.msrb.gmra.mxu3 %vm733_vm2, %v4780_v41 }
 0x362   : > { %3531 = vmatmul.msk.bf16.gmra.mxu2 %vm733_vm2, %v4798_v21 }
 0x365   : > { %3533 = vmatmul.msk.bf16.gmra.mxu3 %vm733_vm2, %v4798_v21 }
 0x396   : > { %v1757_v63 = vpop.f32.mrf.mxu0 }
 0x397   : > { %v1776_v1 = vpop.f32.mrf.mxu1  ;;  %v1758_v57 = vadd.f32 %v1757_v63, %v4851_v56 }
 0x398   : > { %v1777_v39 = vadd.f32 %v1776_v1, %v4851_v56 }
 0x39e   : > { %v1759_v16 = vpop.f32.mrf.mxu0 }
 0x39f   : > { %v1778_v30 = vpop.f32.mrf.mxu1  ;;  %v1760_v24 = vadd.f32 %v1759_v16, %v4854_v25 }
 0x3a0   : > { %v1779_v27 = vadd.f32 %v1778_v30, %v4854_v25 }
 0x3a1   : > { %v4868_v55 = vpack.c.bf16 %v1760_v24, %v1758_v57 }
 0x3a2   : > { %v4871_v5 = vpack.c.bf16 %v1779_v27, %v1777_v39  ;;  %v3802_v27 = vld [vmem:[%s5437_s1 + $0x8] sm:$0xff] }
 0x3a3   : > { %2467 = vperm.xlu2 %3754, %v3802_v27  }
 0x3a6   : > { %v1762_v19 = vpop.f32.mrf.mxu0 }
 0x3a7   : > { %v1781_v14 = vpop.f32.mrf.mxu1  ;;  %v1763_v41 = vadd.f32 %v1762_v19, %v4847_v2  ;;  %v3801_v19 = vld [vmem:[%s5437_s1] sm:$0xff] }
 0x3a8   : > { %v1782_v13 = vadd.f32 %v1781_v14, %v4847_v2  ;;  %2463 = vperm.xlu1 %3753, %v3801_v19  }
 0x3ae   : > { %v1764_v15 = vpop.f32.mrf.mxu0 }
 0x3af   : > { %v1783_v21 = vpop.f32.mrf.mxu1  ;;  %v1765_v51 = vadd.f32 %v1764_v15, %v4849_v8 }
 0x3b0   : > { %v1784_v32 = vadd.f32 %v1783_v21, %v4849_v8 }
 0x3b1   : > { %v4863_v58 = vpack.c.bf16 %v1765_v51, %v1763_v41 }
 0x3b2   : > { %v4865_v0 = vpack.c.bf16 %v1784_v32, %v1782_v13 }
 0x3b3   : > { %1932 = vmatpush.bf16.msra.mxu0 %v4863_v58 }
 0x3b4   : > { %1945 = vmatpush.bf16.msra.mxu1 %v4865_v0 }
 0x3b5   : > { %v1795_v37 = vpop.f32.mrf.mxu2 }
 0x3b6   : > { %v1796_v14 = vadd.f32 %v1795_v37, %v4851_v56 }
 0x3b7   : > { %v1833_v26 = vpop.f32.mrf.mxu0  ;;  %v1852_v62 = vpop.f32.mrf.mxu1  ;;  %1933 = vmatpush.bf16.msra.mxu0 %v4868_v55 }
 0x3b8   : > { %v1814_v38 = vpop.f32.mrf.mxu3  ;;  %1946 = vmatpush.bf16.msra.mxu1 %v4871_v5  ;;  %v1834_v20 = vadd.f32 %v1833_v26, %v4851_v56  ;;  %v1853_v7 = vadd.f32 %v1852_v62, %v4851_v56 }
 0x3b9   : > { %v1815_v15 = vadd.f32 %v1814_v38, %v4851_v56 }
 0x3ba   : > { %3534 = vmatmul.msk.bf16.vlgmr.msra.gmra.mxu0 %vm733_vm2, %v4877_v40 }
 0x3bb   : > { %3535 = vmatmul.msk.bf16.vlgmr.msra.gmra.mxu1 %vm733_vm2, %v4877_v40 }
 0x3bd   : > { %v1797_v36 = vpop.f32.mrf.mxu2 }
 0x3be   : > { %v1798_v50 = vadd.f32 %v1797_v36, %v4854_v25 }
 0x3bf   : > { %v1835_v9 = vpop.f32.mrf.mxu0  ;;  %v1854_v33 = vpop.f32.mrf.mxu1 }
 0x3c0   : > { %v1816_v53 = vpop.f32.mrf.mxu3  ;;  %v1836_v12 = vadd.f32 %v1835_v9, %v4854_v25  ;;  %v1855_v1 = vadd.f32 %v1854_v33, %v4854_v25  ;;  %v4921_v21 = vpack.c.bf16 %v1798_v50, %v1796_v14  ;;  %v5512_v50 = vld [vmem:[#allocation21_spill] sm:$0xff] }
 0x3c1   : > { %v1817_v63 = vadd.f32 %v1816_v53, %v4854_v25  ;;  %v1917_v53 = vld [vmem:[%s5439_s3] sm:$0x1] }
 0x3c2   : > { %v1904_v51 = vpack.c.bf16 %v1836_v12, %v1834_v20  ;;  %v1905_v24 = vpack.c.bf16 %v1855_v1, %v1853_v7  ;;  %v5502_v20 = vld [vmem:[#allocation9_spill] sm:$0xff]  ;;  %v5507_v7 = vld [vmem:[#allocation22_spill] sm:$0xff]  ;;  %v5513_v12 = vld [vmem:[#allocation24_spill] sm:$0xff]  ;;  %v5038_v1 = vpop.permute.xlu2 %2051 }
 0x3c3   : > { %v4923_v57 = vpack.c.bf16 %v1817_v63, %v1815_v15 }
 0x3c5   : > { %v1800_v4 = vpop.f32.mrf.mxu2 }
 0x3c6   : > { %v1801_v17 = vadd.f32 %v1800_v4, %v4847_v2  ;;  %v3875_v4 = vmov 5  }
 0x3c7   : > { %v1838_v35 = vpop.f32.mrf.mxu0  ;;  %v1857_v11 = vpop.f32.mrf.mxu1 }
 0x3c8   : > { %v1819_v18 = vpop.f32.mrf.mxu3  ;;  %v1839_v47 = vadd.f32 %v1838_v35, %v4847_v2  ;;  %v1858_v22 = vadd.f32 %v1857_v11, %v4847_v2  ;;  %v5495_v35 = vld [vmem:[#allocation10_spill] sm:$0xff] }
 0x3c9   : > { %v1820_v54 = vadd.f32 %v1819_v18, %v4847_v2 }
 0x3ca   : > { %v5041_v19 = vpop.permute.xlu2 %2043 }
 0x3cd   : > { %v1802_v52 = vpop.f32.mrf.mxu2 }
 0x3ce   : > { %v1803_v10 = vadd.f32 %v1802_v52, %v4849_v8  ;;  %v5501_v52 = vld [vmem:[#allocation8_spill] sm:$0xff] }
 0x3cf   : > { %v1840_v46 = vpop.f32.mrf.mxu0  ;;  %v1859_v44 = vpop.f32.mrf.mxu1 }
 0x3d0   : > { %v1821_v45 = vpop.f32.mrf.mxu3  ;;  %v4906_v6 = vpack.c.bf16 %v1803_v10, %v1801_v17  ;;  %v1841_v29 = vadd.f32 %v1840_v46, %v4849_v8  ;;  %v1860_v30 = vadd.f32 %v1859_v44, %v4849_v8  ;;  %v5503_v17 = vld [vmem:[#allocation17_spill] sm:$0xff]  ;;  %v5505_v10 = vld [vmem:[#allocation12_spill] sm:$0xff]  ;;  %v5510_v46 = vld [vmem:[#allocation18_spill] sm:$0xff] }
 0x3d1   : > { %v1822_v60 = vadd.f32 %v1821_v45, %v4849_v8  ;;  %v5506_v45 = vld [vmem:[#allocation13_spill] sm:$0xff] }
 0x3d2   : > { %v1912_v41 = vpack.c.bf16 %v1841_v29, %v1839_v47  ;;  %1958 = vmatpush.bf16.msra.mxu2 %v4906_v6  ;;  %v1913_v13 = vpack.c.bf16 %v1860_v30, %v1858_v22  ;;  %v5504_v47 = vld [vmem:[#allocation19_spill] sm:$0xff]  ;;  %v3678_v22 = vld [vmem:[%s5438_s2 + $0x80] sm:$0xff]  ;;  %v5046_v14 = vpop.permute.xlu2 %2475 }
 0x3d3   : > { %v4911_v16 = vpack.c.bf16 %v1822_v60, %v1820_v54  ;;  %v5508_v54 = vld [vmem:[#allocation23_spill] sm:$0xff]  ;;  %v5509_v60 = vld [vmem:[#allocation16_spill] sm:$0xff] }
 0x3d4   : > { %1984 = vmatpush.bf16.msrb.mxu0 %v1912_v41  ;;  %1997 = vmatpush.bf16.msrb.mxu1 %v1913_v13  ;;  %v3679_v29 = vld [vmem:[%s5438_s2 + $0x88] sm:$0xff] }
 0x3d5   : > { %1971 = vmatpush.bf16.msra.mxu3 %v4911_v16  ;;  %v1871_v32 = vpop.f32.mrf.mxu2 }
 0x3d6   : > { %1959 = vmatpush.bf16.msra.mxu2 %v4921_v21 }
 0x3d8   : > { %v1890_v39 = vpop.f32.mrf.mxu3  ;;  %1985 = vmatpush.bf16.msrb.mxu0 %v1904_v51  ;;  %1998 = vmatpush.bf16.msrb.mxu1 %v1905_v24 }
 0x3d9   : > { %1972 = vmatpush.bf16.msra.mxu3 %v4923_v57  ;;  %3536 = vmatmul.msk.bf16.vlgmr.msra.gmra.mxu2 %vm733_vm2, %v4877_v40 }
 0x3db   : > { %3538 = vmatmul.msk.bf16.vlgmr.msrb.gmra.mxu0 %vm733_vm2, %v4877_v40  ;;  %3539 = vmatmul.msk.bf16.vlgmr.msrb.gmra.mxu1 %vm733_vm2, %v4877_v40 }
 0x3dc   : > { %2080 = vmatpush.bf16.msra.mxu0 %v4863_v58  ;;  %2099 = vmatpush.bf16.msra.mxu1 %v4865_v0  ;;  %v3873_v58 = vmov 7  }
 0x3dd   : > { %3537 = vmatmul.msk.bf16.vlgmr.msra.gmra.mxu3 %vm733_vm2, %v4877_v40  ;;  %v1873_v37 = vpop.f32.mrf.mxu2  ;;  %3757 = vset.pattern.permute.xlu2 %v3873_v58 }
 0x3de   : > { %2531 = vperm.xlu2 %3757, %v4646_v34   ;;  %3756 = vset.pattern.permute.xlu1 %v3873_v58  ;;  %v3874_v34 = vmov 8   ;;  %v1874_v9 = vadd.f32 %v1873_v37, %v4854_v25 }
 0x3df   : > { %2543 = vperm.xlu1 %3756, %v4640_v3   ;;  %3755 = vset.pattern.permute.xlu0 %v3873_v58 }
 0x3e0   : > { %2081 = vmatpush.bf16.msra.mxu0 %v4868_v55  ;;  %v1892_v38 = vpop.f32.mrf.mxu3  ;;  %2100 = vmatpush.bf16.msra.mxu1 %v4871_v5  ;;  %v2764_v55 = vld [vmem:[%s5439_s3] sm:$0xff]  ;;  %v4951_v5 = vld [vmem:[%s5438_s2 + $0x70] sm:$0xff] }
 0x3e1   : > { %2539 = vperm.xlu0 %3755, %v4654_v59  }
 0x3e4   : > { %2156 = vmatpush.bf16.msrb.mxu0 %v1912_v41  ;;  %2175 = vmatpush.bf16.msrb.mxu1 %v1913_v13 }
 0x3e5   : > { %v1876_v0 = vpop.f32.mrf.mxu2 }
 0x3e6   : > { %3758 = vset.pattern.permute.xlu2 %v3874_v34  ;;  %v1877_v59 = vadd.f32 %v1876_v0, %v4847_v2 }
 0x3e7   : > { %2768 = vperm.xlu2 %3758, %v2764_v55   ;;  %2535 = vperm.xlu1 %3756, %v4683_v31  }
 0x3e8   : > { %2157 = vmatpush.bf16.msrb.mxu0 %v1904_v51  ;;  %2176 = vmatpush.bf16.msrb.mxu1 %v1905_v24  ;;  %v1895_v26 = vpop.f32.mrf.mxu3 }
 0x3e9   : > { %3759 = vset.pattern.permute.xlu0 %v3874_v34  ;;  %v1896_v61 = vadd.f32 %v1895_v26, %v4847_v2  ;;  %v1872_v2 = vadd.f32 %v1871_v32, %v4851_v56 }
 0x3eb   : > { %3550 = vmatmul.msk.bf16.vlgmr.msra.gmra.mxu0 %vm733_vm2, %v4951_v5  ;;  %3552 = vmatmul.msk.bf16.vlgmr.msra.gmra.mxu1 %vm733_vm2, %v4951_v5  ;;  %v1906_v18 = vpack.c.bf16 %v1874_v9, %v1872_v2 }
 0x3ec   : > { %2251 = vmatpush.bf16.msra.mxu0 %v4036_v42  ;;  %2270 = vmatpush.bf16.msra.mxu1 %v4039_v43  ;;  %v1893_v42 = vadd.f32 %v1892_v38, %v4854_v25  ;;  %v5499_v25 = vld [vmem:[#allocation14_spill] sm:$0xff] }
 0x3ed   : > { %v1878_v3 = vpop.f32.mrf.mxu2 }
 0x3ee   : > { %v1879_v62 = vadd.f32 %v1878_v3, %v4849_v8 }
 0x3ef   : > { %3761 = vset.pattern.permute.xlu2 %v3875_v4 }
 0x3f0   : > { %v1897_v36 = vpop.f32.mrf.mxu3  ;;  %v1914_v33 = vpack.c.bf16 %v1879_v62, %v1877_v59  ;;  %2252 = vmatpush.bf16.msra.mxu0 %v4051_v48  ;;  %2271 = vmatpush.bf16.msra.mxu1 %v4053_v49  ;;  %v3677_v48 = vld [vmem:[%s5438_s2 + $0x78] sm:$0xff]  ;;  %v5497_v49 = vld [vmem:[#allocation6_spill] sm:$0xff] }
 0x3f1   : > { %v1898_v31 = vadd.f32 %v1897_v36, %v4849_v8  ;;  %1920 = vperm.xlu2 %3761, %v1917_v53   ;;  %v1891_v8 = vadd.f32 %v1890_v39, %v4851_v56  ;;  %v5498_v56 = vld [vmem:[#allocation7_spill] sm:$0xff] }
 0x3f2   : > { %2010 = vmatpush.bf16.msrb.mxu2 %v1914_v33 }
 0x3f3   : > { %v1915_v43 = vpack.c.bf16 %v1898_v31, %v1896_v61  ;;  %v1907_v11 = vpack.c.bf16 %v1893_v42, %v1891_v8 }
 0x3f4   : > { %2253 = vmatpush.bf16.msra.mxu0 %v5495_v35  ;;  %2272 = vmatpush.bf16.msra.mxu1 %v5496_v28 }
 0x3f5   : > { %2023 = vmatpush.bf16.msrb.mxu3 %v1915_v43 }
 0x3f6   : > { %2011 = vmatpush.bf16.msrb.mxu2 %v1906_v18 }
 0x3f9   : > { %2024 = vmatpush.bf16.msrb.mxu3 %v1907_v11  ;;  %3540 = vmatmul.msk.bf16.vlgmr.msrb.gmra.mxu2 %vm733_vm2, %v4877_v40 }
 0x3fa   : > { %2118 = vmatpush.bf16.msra.mxu2 %v4906_v6  ;;  %v5514_v6 = vld [vmem:[#allocation25_spill] sm:$0xff] }
 0x3fb   : > { %3551 = vmatmul.msk.bf16.gmra.mxu0 %vm733_vm2, %v3677_v48  ;;  %3553 = vmatmul.msk.bf16.gmra.mxu1 %vm733_vm2, %v3677_v48 }
 0x3fc   : > { %3541 = vmatmul.msk.bf16.vlgmr.msrb.gmra.mxu3 %vm733_vm2, %v4877_v40  ;;  %v5500_v40 = vld [vmem:[#allocation15_spill] sm:$0xff] }
 0x3fd   : > { %2137 = vmatpush.bf16.msra.mxu3 %v4911_v16 }
 0x3fe   : > { %2119 = vmatpush.bf16.msra.mxu2 %v4921_v21  ;;  %v5058_v21 = vpop.permute.xlu2 %2467 }
 0x401   : > { %2138 = vmatpush.bf16.msra.mxu3 %v4923_v57 }
 0x402   : > { %2194 = vmatpush.bf16.msrb.mxu2 %v1914_v33 }
 0x405   : > { %2213 = vmatpush.bf16.msrb.mxu3 %v1915_v43 }
 0x406   : > { %2195 = vmatpush.bf16.msrb.mxu2 %v1906_v18 }
 0x409   : > { %2214 = vmatpush.bf16.msrb.mxu3 %v1907_v11  ;;  %3554 = vmatmul.msk.bf16.vlgmr.msra.gmra.mxu2 %vm733_vm2, %v4951_v5 }
 0x40a   : > { %2289 = vmatpush.bf16.msra.mxu2 %v5497_v49 }
 0x40b   : > { %3558 = vmatmul.msk.bf16.vlgmr.msrb.gmra.mxu0 %vm733_vm2, %v4951_v5  ;;  %3560 = vmatmul.msk.bf16.vlgmr.msrb.gmra.mxu1 %vm733_vm2, %v4951_v5 }
 0x40c   : > { %3556 = vmatmul.msk.bf16.vlgmr.msra.gmra.mxu3 %vm733_vm2, %v4951_v5  ;;  %2327 = vmatpush.bf16.msrb.mxu0 %v5499_v25 }
 0x40d   : > { %2308 = vmatpush.bf16.msra.mxu3 %v5498_v56  ;;  %2346 = vmatpush.bf16.msrb.mxu1 %v5500_v40 }
 0x40e   : > { %2290 = vmatpush.bf16.msra.mxu2 %v5501_v52 }
 0x410   : > { %2328 = vmatpush.bf16.msrb.mxu0 %v5503_v17 }
 0x411   : > { %2309 = vmatpush.bf16.msra.mxu3 %v5502_v20  ;;  %2347 = vmatpush.bf16.msrb.mxu1 %v5504_v47 }
 0x412   : > { %2291 = vmatpush.bf16.msra.mxu2 %v5505_v10 }
 0x414   : > { %2329 = vmatpush.bf16.msrb.mxu0 %v5507_v7 }
 0x415   : > { %2310 = vmatpush.bf16.msra.mxu3 %v5506_v45  ;;  %2348 = vmatpush.bf16.msrb.mxu1 %v5508_v54  ;;  %v5114_v54 = vpop.permute.xlu1 %2055 }
 0x419   : > { %3555 = vmatmul.msk.bf16.gmra.mxu2 %vm733_vm2, %v3677_v48 }
 0x41b   : > { %3559 = vmatmul.msk.bf16.gmra.mxu0 %vm733_vm2, %v3677_v48  ;;  %3561 = vmatmul.msk.bf16.gmra.mxu1 %vm733_vm2, %v3677_v48 }
 0x41c   : > { %3557 = vmatmul.msk.bf16.gmra.mxu3 %vm733_vm2, %v3677_v48 }
 0x429   : > { %3562 = vmatmul.msk.bf16.vlgmr.msrb.gmra.mxu2 %vm733_vm2, %v4951_v5 }
 0x42a   : > { %2365 = vmatpush.bf16.msrb.mxu2 %v5509_v60 }
 0x42b   : > { %3574 = vmatmul.msk.bf16.vlgmr.msra.gmra.mxu0 %vm415_vm1, %v3678_v22  ;;  %3576 = vmatmul.msk.bf16.vlgmr.msra.gmra.mxu1 %vm415_vm1, %v3678_v22 }
 0x42c   : > { %3564 = vmatmul.msk.bf16.vlgmr.msrb.gmra.mxu3 %vm733_vm2, %v4951_v5 }
 0x42d   : > { %2384 = vmatpush.bf16.msrb.mxu3 %v5510_v46 }
 0x42e   : > { %2366 = vmatpush.bf16.msrb.mxu2 %v5511_v23 }
 0x431   : > { %2385 = vmatpush.bf16.msrb.mxu3 %v5512_v50 }
 0x432   : > { %2367 = vmatpush.bf16.msrb.mxu2 %v5513_v12  ;;  %v5121_v12 = vpop.permute.xlu0 %2047 }
 0x435   : > { %2386 = vmatpush.bf16.msrb.mxu3 %v5514_v6 }
 0x437   : > { %v5030_v44 = vpop.f32.mrf.mxu0 }
 0x438   : > { %v5033_v63 = vpop.f32.mrf.mxu1  ;;  %v5062_v27 = vpop.permute.xlu2 %2531 }
 0x439   : > { %3563 = vmatmul.msk.bf16.gmra.mxu2 %vm733_vm2, %v3677_v48 }
 0x43b   : > { %3575 = vmatmul.msk.bf16.gmra.mxu0 %vm415_vm1, %v3679_v29  ;;  %3577 = vmatmul.msk.bf16.gmra.mxu1 %vm415_vm1, %v3679_v29 }
 0x43c   : > { %3565 = vmatmul.msk.bf16.gmra.mxu3 %vm733_vm2, %v3677_v48 }
 0x43f   : > { %v1937_v16 = vpop.f32.mrf.mxu0 }
 0x440   : > { %v1950_v30 = vpop.f32.mrf.mxu1 }
 0x441   : > { %v5066_v26 = vpop.permute.xlu2 %2768 }
 0x449   : > { %3578 = vmatmul.msk.bf16.vlgmr.msra.gmra.mxu2 %vm415_vm1, %v3678_v22 }
 0x44b   : > { %3582 = vmatmul.msk.bf16.vlgmr.msrb.gmra.mxu0 %vm415_vm1, %v3678_v22  ;;  %3584 = vmatmul.msk.bf16.vlgmr.msrb.gmra.mxu1 %vm415_vm1, %v3678_v22  ;;  %v5070_v34 = vpop.permute.xlu2 %1920 }
 0x44c   : > { %3580 = vmatmul.msk.bf16.vlgmr.msra.gmra.mxu3 %vm415_vm1, %v3678_v22 }
 0x458   : > { %v5048_v41 = vpop.f32.mrf.mxu0  ;;  %v5050_v15 = vpop.f32.mrf.mxu1 }
 0x459   : > { %5515 = vst [vmem:[#allocation10_spill] sm:$0xff] %v5050_v15  ;;  %3579 = vmatmul.msk.bf16.gmra.mxu2 %vm415_vm1, %v3679_v29 }
 0x45b   : > { %3583 = vmatmul.msk.bf16.gmra.mxu0 %vm415_vm1, %v3679_v29  ;;  %3585 = vmatmul.msk.bf16.gmra.mxu1 %vm415_vm1, %v3679_v29 }
 0x45c   : > { %3581 = vmatmul.msk.bf16.gmra.mxu3 %vm415_vm1, %v3679_v29  ;;  %v5056_v13 = vpop.f32.mrf.mxu2 }
 0x45d   : > { %5516 = vst [vmem:[#allocation11_spill] sm:$0xff] %v5056_v13 }
 0x460   : > { %v5060_v51 = vpop.f32.mrf.mxu3  ;;  %v1989_v57 = vpop.f32.mrf.mxu0 }
 0x461   : > { %5517 = vst [vmem:[#allocation6_spill] sm:$0xff] %v5060_v51  ;;  %v2002_v24 = vpop.f32.mrf.mxu1 }
 0x464   : > { %v1963_v32 = vpop.f32.mrf.mxu2 }
 0x468   : > { %v1976_v39 = vpop.f32.mrf.mxu3  ;;  %v2083_v37 = vpop.f32.mrf.mxu0 }
 0x469   : > { %v2102_v38 = vpop.f32.mrf.mxu1  ;;  %3586 = vmatmul.msk.bf16.vlgmr.msrb.gmra.mxu2 %vm415_vm1, %v3678_v22 }
 0x46c   : > { %3588 = vmatmul.msk.bf16.vlgmr.msrb.gmra.mxu3 %vm415_vm1, %v3678_v22 }
 0x470   : > { %v2085_v58 = vpop.f32.mrf.mxu0 }
 0x471   : > { %v2104_v0 = vpop.f32.mrf.mxu1  ;;  %v2086_v30 = vadd.f32 %v2085_v58, %v5121_v12 }
 0x472   : > { %v2105_v32 = vadd.f32 %v2104_v0, %v5121_v12 }
 0x478   : > { %v2088_v55 = vpop.f32.mrf.mxu0 }
 0x479   : > { %v2107_v5 = vpop.f32.mrf.mxu1  ;;  %3587 = vmatmul.msk.bf16.gmra.mxu2 %vm415_vm1, %v3679_v29  ;;  %v2089_v50 = vadd.f32 %v2088_v55, %v5038_v1 }
 0x47a   : > { %v2108_v6 = vadd.f32 %v2107_v5, %v5038_v1 }
 0x47c   : > { %3589 = vmatmul.msk.bf16.gmra.mxu3 %vm415_vm1, %v3679_v29  ;;  %v2013_v3 = vpop.f32.mrf.mxu2  ;;  %v5124_v29 = vpop.permute.xlu1 %2471 }
 0x47d   : > { %v5073_v59 = vadd.f32 %v2013_v3, %v5070_v34  ;;  %v2084_v3 = vadd.f32 %v2083_v37, %v5041_v19 }
 0x47f   : > { %5518 = vst [vmem:[#allocation7_spill] sm:$0xff] %v5073_v59  ;;  %v2026_v62 = vpop.f32.mrf.mxu3 }
 0x480   : > { %v5076_v36 = vadd.f32 %v2026_v62, %v5070_v34  ;;  %v2090_v61 = vpop.f32.mrf.mxu0 }
 0x481   : > { %v2109_v31 = vpop.f32.mrf.mxu1  ;;  %v2091_v55 = vadd.f32 %v2090_v61, %v5114_v54 }
 0x482   : > { %5519 = vst [vmem:[#allocation14_spill] sm:$0xff] %v5076_v36  ;;  %v2110_v36 = vadd.f32 %v2109_v31, %v5114_v54 }
 0x484   : > { %v2015_v53 = vpop.f32.mrf.mxu2 }
 0x485   : > { %v2103_v53 = vadd.f32 %v2102_v38, %v5041_v19 }
 0x487   : > { %v2028_v9 = vpop.f32.mrf.mxu3 }
 0x488   : > { %v5078_v33 = vpop.f32.mrf.mxu0 }
 0x489   : > { %v5080_v42 = vpop.f32.mrf.mxu1 }
 0x48c   : > { %v5082_v43 = vpop.f32.mrf.mxu2 }
 0x48f   : > { %v5084_v4 = vpop.f32.mrf.mxu3 }
 0x490   : > { %v5086_v2 = vpop.f32.mrf.mxu0 }
 0x491   : > { %v5088_v8 = vpop.f32.mrf.mxu1 }
 0x494   : > { %v5090_v18 = vpop.f32.mrf.mxu2 }
 0x497   : > { %v5092_v35 = vpop.f32.mrf.mxu3 }
 0x498   : > { %v5094_v11 = vpop.f32.mrf.mxu0 }
 0x499   : > { %v5096_v28 = vpop.f32.mrf.mxu1 }
 0x49c   : > { %v5098_v48 = vpop.f32.mrf.mxu2 }
 0x49f   : > { %v5100_v49 = vpop.f32.mrf.mxu3 }
 0x4a0   : > { %v5102_v56 = vpop.f32.mrf.mxu0 }
 0x4a1   : > { %v5104_v25 = vpop.f32.mrf.mxu1 }
 0x4a4   : > { %v5106_v40 = vpop.f32.mrf.mxu2 }
 0x4a7   : > { %v5108_v52 = vpop.f32.mrf.mxu3 }
 0x4a8   : > { %v2255_v20 = vpop.f32.mrf.mxu0 }
 0x4a9   : > { %v2274_v17 = vpop.f32.mrf.mxu1  ;;  %v2398_v59 = vadd.f32 %v2255_v20, %v2084_v3  ;;  %v5142_v20 = vpop.permute.xlu1 %2463 }
 0x4ab   : > { %v2430_v61 = vmax.f32 %v2398_v59, 0.0 }
 0x4ac   : > { %v5110_v47 = vpop.f32.mrf.mxu2 }
 0x4af   : > { %v5112_v10 = vpop.f32.mrf.mxu3 }
 0x4b0   : > { %v2257_v45 = vpop.f32.mrf.mxu0 }
 0x4b1   : > { %v2276_v7 = vpop.f32.mrf.mxu1  ;;  %v2406_v62 = vadd.f32 %v2257_v45, %v2086_v30 }
 0x4b2   : > { %v2407_v5 = vadd.f32 %v2276_v7, %v2105_v32 }
 0x4b3   : > { %v2438_v0 = vmax.f32 %v2406_v62, 0.0 }
 0x4b4   : > { %v5116_v22 = vpop.f32.mrf.mxu2 }
 0x4b7   : > { %v5118_v60 = vpop.f32.mrf.mxu3 }
 0x4b8   : > { %v2260_v46 = vpop.f32.mrf.mxu0 }
 0x4b9   : > { %v2279_v23 = vpop.f32.mrf.mxu1  ;;  %v2414_v57 = vadd.f32 %v2260_v46, %v2089_v50  ;;  %v2399_v50 = vadd.f32 %v2274_v17, %v2103_v53 }
 0x4ba   : > { %v2415_v39 = vadd.f32 %v2279_v23, %v2108_v6  ;;  %v2439_v6 = vmax.f32 %v2407_v5, 0.0 }
 0x4bb   : > { %v2446_v51 = vmax.f32 %v2414_v57, 0.0  ;;  %v2431_v31 = vmax.f32 %v2399_v50, 0.0  ;;  %v2486_v57 = vadd.f32 %v5058_v21, %v2438_v0 }
 0x4bc   : > { %v5126_v16 = vpop.f32.mrf.mxu2  ;;  %v2447_v13 = vmax.f32 %v2415_v39, 0.0 }
 0x4bd   : > { %v2494_v38 = vadd.f32 %v5124_v29, %v2446_v51  ;;  %v2478_v51 = vadd.f32 %v5142_v20, %v2430_v61  ;;  %v2479_v62 = vadd.f32 %v5142_v20, %v2431_v31  ;;  %v2165_v61 = vadd.f32 %v5094_v11, %v5038_v1 }
 0x4be   : > { %v2495_v17 = vadd.f32 %v5124_v29, %v2447_v13  ;;  %v5153_v13 = vld [vmem:[%s5438_s2 + $0x90] sm:$0xff]  ;;  %v2141_v31 = vadd.f32 %v5084_v4, %v5041_v19  ;;  %v2124_v11 = vadd.f32 %v5090_v18, %v5121_v12  ;;  %v2143_v4 = vadd.f32 %v5092_v35, %v5121_v12 }
 0x4bf   : > { %v5129_v24 = vpop.f32.mrf.mxu3  ;;  %v2146_v18 = vadd.f32 %v5100_v49, %v5038_v1  ;;  %v2129_v35 = vadd.f32 %v5106_v40, %v5114_v54 }
 0x4c0   : > { %v2262_v9 = vpop.f32.mrf.mxu0 }
 0x4c1   : > { %v2422_v58 = vadd.f32 %v2262_v9, %v2091_v55  ;;  %v2281_v46 = vpop.f32.mrf.mxu1  ;;  %v2510_v55 = vpack.c.bf16 %v2486_v57, %v2478_v51  ;;  %v2127_v51 = vadd.f32 %v5098_v48, %v5038_v1 }
 0x4c2   : > { %v2423_v15 = vadd.f32 %v2281_v46, %v2110_v36 }
 0x4c3   : > { %v2454_v23 = vmax.f32 %v2422_v58, 0.0 }
 0x4c4   : > { %v2455_v37 = vmax.f32 %v2423_v15, 0.0  ;;  %v5136_v45 = vpop.f32.mrf.mxu2  ;;  %v2487_v15 = vadd.f32 %v5058_v21, %v2439_v6 }
 0x4c5   : > { %v2502_v7 = vadd.f32 %v5046_v14, %v2454_v23 }
 0x4c6   : > { %v2503_v36 = vadd.f32 %v5046_v14, %v2455_v37  ;;  %v2511_v5 = vpack.c.bf16 %v2487_v15, %v2479_v62  ;;  %v2160_v37 = vadd.f32 %v5078_v33, %v5041_v19  ;;  %v5174_v33 = vld [vmem:[%s5438_s2 + $0x98] sm:$0xff]  ;;  %v2186_v62 = vadd.f32 %v5104_v25, %v5114_v54 }
 0x4c7   : > { %v5140_v30 = vpop.f32.mrf.mxu3  ;;  %v2518_v32 = vpack.c.bf16 %v2502_v7, %v2494_v38  ;;  %v2179_v38 = vadd.f32 %v5080_v42, %v5041_v19  ;;  %v2122_v7 = vadd.f32 %v5082_v43, %v5041_v19  ;;  %v2162_v42 = vadd.f32 %v5086_v2, %v5121_v12 }
 0x4c8   : > { %v2519_v39 = vpack.c.bf16 %v2503_v36, %v2495_v17  ;;  %v2331_v59 = vpop.f32.mrf.mxu0  ;;  %v2184_v17 = vadd.f32 %v5096_v28, %v5038_v1  ;;  %v2181_v28 = vadd.f32 %v5088_v8, %v5121_v12  ;;  %v2148_v8 = vadd.f32 %v5108_v52, %v5114_v54 }
 0x4c9   : > { %v2350_v3 = vpop.f32.mrf.mxu1  ;;  %2568 = vmatpush.bf16.msra.mxu0 %v2518_v32  ;;  %v2402_v57 = vadd.f32 %v2331_v59, %v2160_v37  ;;  %v2167_v59 = vadd.f32 %v5102_v56, %v5114_v54 }
 0x4ca   : > { %2587 = vmatpush.bf16.msra.mxu1 %v2519_v39  ;;  %v2403_v15 = vadd.f32 %v2350_v3, %v2179_v38 }
 0x4cb   : > { %v2434_v48 = vmax.f32 %v2402_v57, 0.0 }
 0x4cc   : > { %v2293_v53 = vpop.f32.mrf.mxu2  ;;  %v2435_v25 = vmax.f32 %v2403_v15, 0.0 }
 0x4cd   : > { %2569 = vmatpush.bf16.msra.mxu0 %v2510_v55  ;;  %v2400_v37 = vadd.f32 %v2293_v53, %v2122_v7 }
 0x4ce   : > { %2588 = vmatpush.bf16.msra.mxu1 %v2511_v5 }
 0x4cf   : > { %v2312_v9 = vpop.f32.mrf.mxu3 }
 0x4d0   : > { %v2333_v58 = vpop.f32.mrf.mxu0  ;;  %3598 = vmatmul.msk.bf16.vlgmr.msra.gmra.mxu0 %vm733_vm2, %v5153_v13  ;;  %v2401_v38 = vadd.f32 %v2312_v9, %v2141_v31 }
 0x4d1   : > { %v2352_v46 = vpop.f32.mrf.mxu1  ;;  %3600 = vmatmul.msk.bf16.vlgmr.msra.gmra.mxu1 %vm733_vm2, %v5153_v13  ;;  %v2410_v2 = vadd.f32 %v2333_v58, %v2162_v42 }
 0x4d2   : > { %v2411_v3 = vadd.f32 %v2352_v46, %v2181_v28 }
 0x4d4   : > { %v2295_v50 = vpop.f32.mrf.mxu2 }
 0x4d5   : > { %v2408_v52 = vadd.f32 %v2295_v50, %v2124_v11 }
 0x4d7   : > { %v2314_v0 = vpop.f32.mrf.mxu3  ;;  %v2440_v9 = vmax.f32 %v2408_v52, 0.0 }
 0x4d8   : > { %v2336_v23 = vpop.f32.mrf.mxu0  ;;  %v2409_v42 = vadd.f32 %v2314_v0, %v2143_v4 }
 0x4d9   : > { %v2355_v6 = vpop.f32.mrf.mxu1  ;;  %v2418_v43 = vadd.f32 %v2336_v23, %v2165_v61  ;;  %v2442_v61 = vmax.f32 %v2410_v2, 0.0  ;;  %v2482_v2 = vadd.f32 %v5142_v20, %v2434_v48 }
 0x4da   : > { %v2419_v39 = vadd.f32 %v2355_v6, %v2184_v17  ;;  %v2443_v17 = vmax.f32 %v2411_v3, 0.0  ;;  %v2441_v4 = vmax.f32 %v2409_v42, 0.0 }
 0x4db   : > { %v2450_v49 = vmax.f32 %v2418_v43, 0.0  ;;  %v2490_v50 = vadd.f32 %v5058_v21, %v2442_v61 }
 0x4dc   : > { %v2298_v36 = vpop.f32.mrf.mxu2  ;;  %v2451_v58 = vmax.f32 %v2419_v39, 0.0  ;;  %v2491_v11 = vadd.f32 %v5058_v21, %v2443_v17  ;;  %v2489_v48 = vadd.f32 %v5058_v21, %v2441_v4 }
 0x4dd   : > { %v2416_v5 = vadd.f32 %v2298_v36, %v2127_v51  ;;  %v2498_v36 = vadd.f32 %v5124_v29, %v2450_v49  ;;  %v2433_v49 = vmax.f32 %v2401_v38, 0.0 }
 0x4de   : > { %v2499_v15 = vadd.f32 %v5124_v29, %v2451_v58 }
 0x4df   : > { %v2317_v32 = vpop.f32.mrf.mxu3  ;;  %v2448_v43 = vmax.f32 %v2416_v5, 0.0 }
 0x4e0   : > { %v2338_v55 = vpop.f32.mrf.mxu0  ;;  %3599 = vmatmul.msk.bf16.gmra.mxu0 %vm733_vm2, %v5174_v33  ;;  %v2417_v6 = vadd.f32 %v2317_v32, %v2146_v18 }
 0x4e1   : > { %v2426_v23 = vadd.f32 %v2338_v55, %v2167_v59  ;;  %v2357_v56 = vpop.f32.mrf.mxu1  ;;  %3601 = vmatmul.msk.bf16.gmra.mxu1 %vm733_vm2, %v5174_v33 }
 0x4e2   : > { %v2427_v40 = vadd.f32 %v2357_v56, %v2186_v62  ;;  %v2449_v32 = vmax.f32 %v2417_v6, 0.0  ;;  %v2432_v62 = vmax.f32 %v2400_v37, 0.0  ;;  %v2488_v56 = vadd.f32 %v5058_v21, %v2440_v9 }
 0x4e3   : > { %v2458_v46 = vmax.f32 %v2426_v23, 0.0  ;;  %v2514_v6 = vpack.c.bf16 %v2490_v50, %v2482_v2 }
 0x4e4   : > { %v2459_v28 = vmax.f32 %v2427_v40, 0.0  ;;  %v2300_v57 = vpop.f32.mrf.mxu2  ;;  %v2497_v5 = vadd.f32 %v5124_v29, %v2449_v32  ;;  %v2480_v52 = vadd.f32 %v5142_v20, %v2432_v62 }
 0x4e5   : > { %v2506_v51 = vadd.f32 %v5046_v14, %v2458_v46  ;;  %v2424_v59 = vadd.f32 %v2300_v57, %v2129_v35  ;;  %v2496_v35 = vadd.f32 %v5124_v29, %v2448_v43  ;;  %v2203_v43 = vadd.f32 %v5126_v16, %v5038_v1 }
 0x4e6   : > { %v2507_v53 = vadd.f32 %v5046_v14, %v2459_v28  ;;  %v2512_v38 = vpack.c.bf16 %v2488_v56, %v2480_v52  ;;  %v2198_v16 = vadd.f32 %v5110_v47, %v5041_v19 }
 0x4e7   : > { %v2319_v55 = vpop.f32.mrf.mxu3  ;;  %v2522_v31 = vpack.c.bf16 %v2506_v51, %v2498_v36  ;;  %v2456_v0 = vmax.f32 %v2424_v59, 0.0  ;;  %v2222_v51 = vadd.f32 %v5129_v24, %v5038_v1  ;;  %v2200_v59 = vadd.f32 %v5116_v22, %v5121_v12 }
 0x4e8   : > { %v2425_v7 = vadd.f32 %v2319_v55, %v2148_v8  ;;  %v2523_v39 = vpack.c.bf16 %v2507_v53, %v2499_v15  ;;  %v2483_v8 = vadd.f32 %v5142_v20, %v2435_v25  ;;  %v2481_v25 = vadd.f32 %v5142_v20, %v2433_v49 }
 0x4e9   : > { %v2504_v3 = vadd.f32 %v5046_v14, %v2456_v0  ;;  %2644 = vmatpush.bf16.msrb.mxu0 %v2522_v31  ;;  %v2219_v15 = vadd.f32 %v5118_v60, %v5121_v12  ;;  %v2205_v1 = vadd.f32 %v5136_v45, %v5114_v54  ;;  %v2217_v53 = vadd.f32 %v5112_v10, %v5041_v19 }
 0x4ea   : > { %v2457_v18 = vmax.f32 %v2425_v7, 0.0  ;;  %2663 = vmatpush.bf16.msrb.mxu1 %v2523_v39  ;;  %v2515_v61 = vpack.c.bf16 %v2491_v11, %v2483_v8  ;;  %v2513_v17 = vpack.c.bf16 %v2489_v48, %v2481_v25  ;;  %v2224_v22 = vadd.f32 %v5140_v30, %v5114_v54 }
 0x4eb   : > { %v2520_v58 = vpack.c.bf16 %v2504_v3, %v2496_v35 }
 0x4ec   : > { %v2505_v23 = vadd.f32 %v5046_v14, %v2457_v18  ;;  %v2369_v37 = vpop.f32.mrf.mxu2 }
 0x4ed   : > { %2606 = vmatpush.bf16.msra.mxu2 %v2520_v58  ;;  %2645 = vmatpush.bf16.msrb.mxu0 %v2514_v6  ;;  %v2404_v60 = vadd.f32 %v2369_v37, %v2198_v16  ;;  %v5264_v6 = vpop.permute.xlu1 %2543  ;;  %v5266_v37 = vpop.permute.xlu0 %2539 }
 0x4ee   : > { %v2521_v40 = vpack.c.bf16 %v2505_v23, %v2497_v5  ;;  %2664 = vmatpush.bf16.msrb.mxu1 %v2515_v61 }
 0x4ef   : > { %v2388_v46 = vpop.f32.mrf.mxu3  ;;  %v2436_v54 = vmax.f32 %v2404_v60, 0.0 }
 0x4f0   : > { %2625 = vmatpush.bf16.msra.mxu3 %v2521_v40  ;;  %3606 = vmatmul.msk.bf16.vlgmr.msrb.gmra.mxu0 %vm733_vm2, %v5153_v13  ;;  %v2405_v47 = vadd.f32 %v2388_v46, %v2217_v53 }
 0x4f1   : > { %3608 = vmatmul.msk.bf16.vlgmr.msrb.gmra.mxu1 %vm733_vm2, %v5153_v13  ;;  %2607 = vmatpush.bf16.msra.mxu2 %v2512_v38  ;;  %v2484_v5 = vadd.f32 %v5142_v20, %v2436_v54 }
 0x4f2   : > { %v2437_v18 = vmax.f32 %v2405_v47, 0.0 }
 0x4f4   : > { %2626 = vmatpush.bf16.msra.mxu3 %v2513_v17  ;;  %v2371_v42 = vpop.f32.mrf.mxu2  ;;  %3602 = vmatmul.msk.bf16.vlgmr.msra.gmra.mxu2 %vm733_vm2, %v5153_v13  ;;  %v2485_v23 = vadd.f32 %v5142_v20, %v2437_v18 }
 0x4f5   : > { %v2412_v24 = vadd.f32 %v2371_v42, %v2200_v59  ;;  %v5268_v61 = vpop.permute.xlu1 %2535 }
 0x4f7   : > { %v2390_v28 = vpop.f32.mrf.mxu3  ;;  %3604 = vmatmul.msk.bf16.vlgmr.msra.gmra.mxu3 %vm733_vm2, %v5153_v13  ;;  %v2444_v11 = vmax.f32 %v2412_v24, 0.0 }
 0x4f8   : > { %v2413_v7 = vadd.f32 %v2390_v28, %v2219_v15 }
 0x4f9   : > { %v2492_v35 = vadd.f32 %v5058_v21, %v2444_v11 }
 0x4fa   : > { %v2445_v10 = vmax.f32 %v2413_v7, 0.0 }
 0x4fb   : > { %v2516_v56 = vpack.c.bf16 %v2492_v35, %v2484_v5 }
 0x4fc   : > { %v2374_v57 = vpop.f32.mrf.mxu2  ;;  %v2493_v8 = vadd.f32 %v5058_v21, %v2445_v10 }
 0x4fd   : > { %v2420_v55 = vadd.f32 %v2374_v57, %v2203_v43 }
 0x4fe   : > { %v2517_v58 = vpack.c.bf16 %v2493_v8, %v2485_v23 }
 0x4ff   : > { %v2393_v36 = vpop.f32.mrf.mxu3  ;;  %v2452_v12 = vmax.f32 %v2420_v55, 0.0 }
 0x500   : > { %3607 = vmatmul.msk.bf16.gmra.mxu0 %vm733_vm2, %v5174_v33  ;;  %v2421_v32 = vadd.f32 %v2393_v36, %v2222_v51  ;;  %v2765_v36 = vld [vmem:[%s5439_s3 + $0x8] sm:$0xff] }
 0x501   : > { %3609 = vmatmul.msk.bf16.gmra.mxu1 %vm733_vm2, %v5174_v33  ;;  %v2500_v30 = vadd.f32 %v5124_v29, %v2452_v12  ;;  %2773 = vperm.xlu0 %3759, %v2765_v36   ;;  %v5284_v12 = vld [vmem:[%s5438_s2 + $0xa0] sm:$0xff] }
 0x502   : > { %v2453_v45 = vmax.f32 %v2421_v32, 0.0 }
 0x504   : > { %v2376_v50 = vpop.f32.mrf.mxu2  ;;  %3603 = vmatmul.msk.bf16.gmra.mxu2 %vm733_vm2, %v5174_v33  ;;  %v2501_v2 = vadd.f32 %v5124_v29, %v2453_v45 }
 0x505   : > { %v2428_v9 = vadd.f32 %v2376_v50, %v2205_v1 }
 0x507   : > { %v2395_v31 = vpop.f32.mrf.mxu3  ;;  %3605 = vmatmul.msk.bf16.gmra.mxu3 %vm733_vm2, %v5174_v33  ;;  %v2460_v19 = vmax.f32 %v2428_v9, 0.0 }
 0x508   : > { %v2429_v0 = vadd.f32 %v2395_v31, %v2224_v22 }
 0x509   : > { %v2508_v39 = vadd.f32 %v5046_v14, %v2460_v19 }
 0x50a   : > { %v2461_v4 = vmax.f32 %v2429_v0, 0.0 }
 0x50b   : > { %v2524_v3 = vpack.c.bf16 %v2508_v39, %v2500_v30 }
 0x50c   : > { %v2509_v62 = vadd.f32 %v5046_v14, %v2461_v4 }
 0x50d   : > { %2682 = vmatpush.bf16.msrb.mxu2 %v2524_v3 }
 0x50e   : > { %v2525_v49 = vpack.c.bf16 %v2509_v62, %v2501_v2 }
 0x510   : > { %2701 = vmatpush.bf16.msrb.mxu3 %v2525_v49 }
 0x511   : > { %2683 = vmatpush.bf16.msrb.mxu2 %v2516_v56 }
 0x514   : > { %2702 = vmatpush.bf16.msrb.mxu3 %v2517_v58  ;;  %3610 = vmatmul.msk.bf16.vlgmr.msrb.gmra.mxu2 %vm733_vm2, %v5153_v13 }
 0x517   : > { %3612 = vmatmul.msk.bf16.vlgmr.msrb.gmra.mxu3 %vm733_vm2, %v5153_v13 }
 0x524   : > { %3611 = vmatmul.msk.bf16.gmra.mxu2 %vm733_vm2, %v5174_v33 }
 0x527   : > { %3613 = vmatmul.msk.bf16.gmra.mxu3 %vm733_vm2, %v5174_v33 }
 0x54d   : > { %v2571_v14 = vpop.f32.mrf.mxu0 }
 0x54e   : > { %v2590_v21 = vpop.f32.mrf.mxu1  ;;  %v2572_v46 = vadd.f32 %v2571_v14, %v5062_v27 }
 0x54f   : > { %v2591_v25 = vadd.f32 %v2590_v21, %v5062_v27 }
 0x550   : > { %v2714_v59 = vmax.f32 %v2572_v46, 0.0 }
 0x551   : > { %v2715_v32 = vmax.f32 %v2591_v25, 0.0 }
 0x555   : > { %v2573_v29 = vpop.f32.mrf.mxu0 }
 0x556   : > { %v2592_v20 = vpop.f32.mrf.mxu1  ;;  %v2574_v33 = vadd.f32 %v2573_v29, %v5268_v61 }
 0x557   : > { %v2593_v17 = vadd.f32 %v2592_v20, %v5268_v61 }
 0x558   : > { %v2722_v15 = vmax.f32 %v2574_v33, 0.0 }
 0x559   : > { %v2723_v1 = vmax.f32 %v2593_v17, 0.0 }
 0x55a   : > { %v2746_v22 = vpack.c.bf16 %v2722_v15, %v2714_v59 }
 0x55b   : > { %v2747_v50 = vpack.c.bf16 %v2723_v1, %v2715_v32 }
 0x55d   : > { %v2576_v48 = vpop.f32.mrf.mxu0 }
 0x55e   : > { %v2595_v40 = vpop.f32.mrf.mxu1  ;;  %v2577_v13 = vadd.f32 %v2576_v48, %v5266_v37 }
 0x55f   : > { %v2596_v52 = vadd.f32 %v2595_v40, %v5266_v37 }
 0x560   : > { %v2730_v28 = vmax.f32 %v2577_v13, 0.0 }
 0x561   : > { %v2731_v51 = vmax.f32 %v2596_v52, 0.0 }
 0x565   : > { %v2578_v38 = vpop.f32.mrf.mxu0 }
 0x566   : > { %v2579_v42 = vadd.f32 %v2578_v38, %v5264_v6  ;;  %v2597_v57 = vpop.f32.mrf.mxu1 }
 0x567   : > { %v2598_v43 = vadd.f32 %v2597_v57, %v5264_v6 }
 0x568   : > { %v2738_v55 = vmax.f32 %v2579_v42, 0.0 }
 0x569   : > { %v2739_v16 = vmax.f32 %v2598_v43, 0.0 }
 0x56a   : > { %v2754_v24 = vpack.c.bf16 %v2738_v55, %v2730_v28 }
 0x56b   : > { %v2755_v53 = vpack.c.bf16 %v2739_v16, %v2731_v51 }
 0x56c   : > { %2790 = vmatpush.bf16.msra.mxu0 %v2754_v24 }
 0x56d   : > { %2804 = vmatpush.bf16.msra.mxu1 %v2755_v53  ;;  %v2647_v7 = vpop.f32.mrf.mxu0 }
 0x56e   : > { %v2666_v60 = vpop.f32.mrf.mxu1  ;;  %v2648_v30 = vadd.f32 %v2647_v7, %v5062_v27 }
 0x56f   : > { %v2667_v18 = vadd.f32 %v2666_v60, %v5062_v27 }
 0x570   : > { %2791 = vmatpush.bf16.msra.mxu0 %v2746_v22  ;;  %v2718_v56 = vmax.f32 %v2648_v30, 0.0 }
 0x571   : > { %2805 = vmatpush.bf16.msra.mxu1 %v2747_v50  ;;  %v2719_v29 = vmax.f32 %v2667_v18, 0.0 }
 0x573   : > { %3618 = vmatmul.msk.bf16.vlgmr.msra.gmra.mxu0 %vm733_vm2, %v5284_v12 }
 0x574   : > { %3619 = vmatmul.msk.bf16.vlgmr.msra.gmra.mxu1 %vm733_vm2, %v5284_v12 }
 0x575   : > { %v2649_v9 = vpop.f32.mrf.mxu0 }
 0x576   : > { %v2668_v31 = vpop.f32.mrf.mxu1  ;;  %v2650_v39 = vadd.f32 %v2649_v9, %v5268_v61 }
 0x577   : > { %v2609_v47 = vpop.f32.mrf.mxu2  ;;  %v2669_v2 = vadd.f32 %v2668_v31, %v5268_v61 }
 0x578   : > { %v2726_v58 = vmax.f32 %v2650_v39, 0.0  ;;  %v2610_v43 = vadd.f32 %v2609_v47, %v5062_v27 }
 0x579   : > { %v2727_v20 = vmax.f32 %v2669_v2, 0.0 }
 0x57a   : > { %v2628_v45 = vpop.f32.mrf.mxu3  ;;  %v2750_v52 = vpack.c.bf16 %v2726_v58, %v2718_v56  ;;  %v2716_v22 = vmax.f32 %v2610_v43, 0.0  ;;  %v2920_v43 = vld [vmem:[%s5438_s2 + $0xb0] sm:$0x3] }
 0x57b   : > { %v2751_v46 = vpack.c.bf16 %v2727_v20, %v2719_v29  ;;  %v2629_v55 = vadd.f32 %v2628_v45, %v5062_v27 }
 0x57d   : > { %v2652_v0 = vpop.f32.mrf.mxu0  ;;  %v2717_v7 = vmax.f32 %v2629_v55, 0.0 }
 0x57e   : > { %v2671_v11 = vpop.f32.mrf.mxu1  ;;  %v2653_v4 = vadd.f32 %v2652_v0, %v5266_v37 }
 0x57f   : > { %v2611_v19 = vpop.f32.mrf.mxu2  ;;  %v2672_v54 = vadd.f32 %v2671_v11, %v5266_v37 }
 0x580   : > { %v2734_v35 = vmax.f32 %v2653_v4, 0.0  ;;  %v2612_v17 = vadd.f32 %v2611_v19, %v5268_v61 }
 0x581   : > { %v2735_v49 = vmax.f32 %v2672_v54, 0.0 }
 0x582   : > { %v2630_v10 = vpop.f32.mrf.mxu3  ;;  %v2724_v16 = vmax.f32 %v2612_v17, 0.0 }
 0x583   : > { %v2631_v57 = vadd.f32 %v2630_v10, %v5268_v61 }
 0x584   : > { %v2748_v60 = vpack.c.bf16 %v2724_v16, %v2716_v22 }
 0x585   : > { %v2654_v62 = vpop.f32.mrf.mxu0  ;;  %v2725_v24 = vmax.f32 %v2631_v57, 0.0 }
 0x586   : > { %v2655_v3 = vadd.f32 %v2654_v62, %v5264_v6  ;;  %v2673_v8 = vpop.f32.mrf.mxu1 }
 0x587   : > { %v2674_v5 = vadd.f32 %v2673_v8, %v5264_v6  ;;  %v2614_v23 = vpop.f32.mrf.mxu2  ;;  %v2749_v31 = vpack.c.bf16 %v2725_v24, %v2717_v7 }
 0x588   : > { %v2742_v14 = vmax.f32 %v2655_v3, 0.0  ;;  %v2615_v33 = vadd.f32 %v2614_v23, %v5266_v37 }
 0x589   : > { %v2743_v48 = vmax.f32 %v2674_v5, 0.0 }
 0x58a   : > { %v2633_v21 = vpop.f32.mrf.mxu3  ;;  %v2758_v40 = vpack.c.bf16 %v2742_v14, %v2734_v35  ;;  %v2732_v51 = vmax.f32 %v2615_v33, 0.0 }
 0x58b   : > { %v2759_v13 = vpack.c.bf16 %v2743_v48, %v2735_v49  ;;  %v2634_v25 = vadd.f32 %v2633_v21, %v5266_v37 }
 0x58c   : > { %2846 = vmatpush.bf16.msrb.mxu0 %v2758_v40 }
 0x58d   : > { %2860 = vmatpush.bf16.msrb.mxu1 %v2759_v13  ;;  %v2733_v15 = vmax.f32 %v2634_v25, 0.0 }
 0x58f   : > { %v2616_v38 = vpop.f32.mrf.mxu2 }
 0x590   : > { %v2617_v42 = vadd.f32 %v2616_v38, %v5264_v6  ;;  %2847 = vmatpush.bf16.msrb.mxu0 %v2750_v52  ;;  %v2774_v52 = vpop.permute.xlu0 %2773 }
 0x591   : > { %2861 = vmatpush.bf16.msrb.mxu1 %v2751_v46 }
 0x592   : > { %v2635_v28 = vpop.f32.mrf.mxu3  ;;  %v2740_v59 = vmax.f32 %v2617_v42, 0.0 }
 0x593   : > { %v2636_v36 = vadd.f32 %v2635_v28, %v5264_v6  ;;  %3622 = vmatmul.msk.bf16.vlgmr.msrb.gmra.mxu0 %vm733_vm2, %v5284_v12 }
 0x594   : > { %v2756_v1 = vpack.c.bf16 %v2740_v59, %v2732_v51  ;;  %3623 = vmatmul.msk.bf16.vlgmr.msrb.gmra.mxu1 %vm733_vm2, %v5284_v12 }
 0x595   : > { %v2741_v32 = vmax.f32 %v2636_v36, 0.0 }
 0x596   : > { %2818 = vmatpush.bf16.msra.mxu2 %v2756_v1 }
 0x597   : > { %v2757_v53 = vpack.c.bf16 %v2741_v32, %v2733_v15  ;;  %v2685_v50 = vpop.f32.mrf.mxu2 }
 0x598   : > { %v2686_v62 = vadd.f32 %v2685_v50, %v5062_v27 }
 0x599   : > { %2832 = vmatpush.bf16.msra.mxu3 %v2757_v53 }
 0x59a   : > { %v2704_v9 = vpop.f32.mrf.mxu3  ;;  %2819 = vmatpush.bf16.msra.mxu2 %v2748_v60  ;;  %v2720_v14 = vmax.f32 %v2686_v62, 0.0 }
 0x59b   : > { %v2705_v8 = vadd.f32 %v2704_v9, %v5062_v27  ;;  %v2921_v27 = vld [vmem:[%s5439_s3] sm:$0x7] }
 0x59d   : > { %2833 = vmatpush.bf16.msra.mxu3 %v2749_v31  ;;  %3620 = vmatmul.msk.bf16.vlgmr.msra.gmra.mxu2 %vm733_vm2, %v5284_v12  ;;  %v2721_v21 = vmax.f32 %v2705_v8, 0.0 }
 0x59f   : > { %v2687_v47 = vpop.f32.mrf.mxu2 }
 0x5a0   : > { %3621 = vmatmul.msk.bf16.vlgmr.msra.gmra.mxu3 %vm733_vm2, %v5284_v12  ;;  %v2688_v54 = vadd.f32 %v2687_v47, %v5268_v61 }
 0x5a2   : > { %v2706_v45 = vpop.f32.mrf.mxu3  ;;  %v2728_v23 = vmax.f32 %v2688_v54, 0.0 }
 0x5a3   : > { %v2707_v18 = vadd.f32 %v2706_v45, %v5268_v61 }
 0x5a4   : > { %v2752_v29 = vpack.c.bf16 %v2728_v23, %v2720_v14 }
 0x5a5   : > { %v2729_v56 = vmax.f32 %v2707_v18, 0.0 }
 0x5a7   : > { %v2690_v0 = vpop.f32.mrf.mxu2  ;;  %v2753_v61 = vpack.c.bf16 %v2729_v56, %v2721_v21 }
 0x5a8   : > { %v2691_v19 = vadd.f32 %v2690_v0, %v5266_v37 }
 0x5aa   : > { %v2709_v11 = vpop.f32.mrf.mxu3  ;;  %v2736_v35 = vmax.f32 %v2691_v19, 0.0 }
 0x5ab   : > { %v2710_v10 = vadd.f32 %v2709_v11, %v5266_v37 }
 0x5ad   : > { %v2737_v49 = vmax.f32 %v2710_v10, 0.0 }
 0x5af   : > { %v2692_v4 = vpop.f32.mrf.mxu2 }
 0x5b0   : > { %v2693_v30 = vadd.f32 %v2692_v4, %v5264_v6 }
 0x5b2   : > { %v2711_v39 = vpop.f32.mrf.mxu3  ;;  %v2744_v3 = vmax.f32 %v2693_v30, 0.0 }
 0x5b3   : > { %v2712_v2 = vadd.f32 %v2711_v39, %v5264_v6  ;;  %v3876_v6 = vmov 9  }
 0x5b4   : > { %v2760_v37 = vpack.c.bf16 %v2744_v3, %v2736_v35  ;;  %3760 = vset.pattern.permute.xlu1 %v3876_v6  ;;  %3762 = vset.pattern.permute.xlu0 %v3876_v6 }
 0x5b5   : > { %v2745_v5 = vmax.f32 %v2712_v2, 0.0  ;;  %2924 = vperm.xlu1 %3760, %v2921_v27  }
 0x5b6   : > { %2874 = vmatpush.bf16.msrb.mxu2 %v2760_v37 }
 0x5b7   : > { %v2761_v58 = vpack.c.bf16 %v2745_v5, %v2737_v49 }
 0x5b9   : > { %2888 = vmatpush.bf16.msrb.mxu3 %v2761_v58 }
 0x5ba   : > { %2875 = vmatpush.bf16.msrb.mxu2 %v2752_v29 }
 0x5bd   : > { %2889 = vmatpush.bf16.msrb.mxu3 %v2753_v61  ;;  %3624 = vmatmul.msk.bf16.vlgmr.msrb.gmra.mxu2 %vm733_vm2, %v5284_v12 }
 0x5c0   : > { %3625 = vmatmul.msk.bf16.vlgmr.msrb.gmra.mxu3 %vm733_vm2, %v5284_v12 }
 0x5f0   : > { %v2793_v20 = vpop.f32.mrf.mxu0 }
 0x5f1   : > { %v2807_v48 = vpop.f32.mrf.mxu1  ;;  %v2794_v40 = vadd.f32 %v2793_v20, %v5066_v26 }
 0x5f2   : > { %v2808_v13 = vadd.f32 %v2807_v48, %v5066_v26 }
 0x5f3   : > { %v2896_v33 = vmax.f32 %v2794_v40, 0.0 }
 0x5f4   : > { %v2897_v12 = vmax.f32 %v2808_v13, 0.0 }
 0x5f8   : > { %v2795_v46 = vpop.f32.mrf.mxu0 }
 0x5f9   : > { %v2796_v25 = vadd.f32 %v2795_v46, %v2774_v52  ;;  %v2809_v38 = vpop.f32.mrf.mxu1 }
 0x5fa   : > { %v2810_v17 = vadd.f32 %v2809_v38, %v2774_v52 }
 0x5fb   : > { %v2904_v42 = vmax.f32 %v2796_v25, 0.0 }
 0x5fc   : > { %v2905_v28 = vmax.f32 %v2810_v17, 0.0 }
 0x5fd   : > { %v2912_v57 = vpack.c.bf16 %v2904_v42, %v2896_v33 }
 0x5fe   : > { %v2913_v36 = vpack.c.bf16 %v2905_v28, %v2897_v12 }
 0x5ff   : > { %2938 = vmatpush.bf16.msra.mxu0 %v2912_v57 }
 0x600   : > { %2951 = vmatpush.bf16.msra.mxu1 %v2913_v36 }
 0x602   : > { %3626 = vmatmul.msk.bf16.vlgmr.msra.gmra.mxu0 %vm2927_vm3, %v2920_v43 }
 0x603   : > { %3627 = vmatmul.msk.bf16.vlgmr.msra.gmra.mxu1 %vm2927_vm3, %v2920_v43 }
 0x610   : > { %v2849_v51 = vpop.f32.mrf.mxu0 }
 0x611   : > { %v2863_v59 = vpop.f32.mrf.mxu1  ;;  %v2850_v55 = vadd.f32 %v2849_v51, %v5066_v26 }
 0x612   : > { %v2864_v15 = vadd.f32 %v2863_v59, %v5066_v26 }
 0x613   : > { %v2900_v16 = vmax.f32 %v2850_v55, 0.0 }
 0x614   : > { %v2901_v53 = vmax.f32 %v2864_v15, 0.0 }
 0x618   : > { %v2851_v32 = vpop.f32.mrf.mxu0 }
 0x619   : > { %v2852_v1 = vadd.f32 %v2851_v32, %v2774_v52  ;;  %v2865_v24 = vpop.f32.mrf.mxu1 }
 0x61a   : > { %v2866_v22 = vadd.f32 %v2865_v24, %v2774_v52 }
 0x61b   : > { %v2908_v7 = vmax.f32 %v2852_v1, 0.0 }
 0x61c   : > { %v2909_v50 = vmax.f32 %v2866_v22, 0.0 }
 0x61d   : > { %v2916_v60 = vpack.c.bf16 %v2908_v7, %v2900_v16 }
 0x61e   : > { %v2917_v9 = vpack.c.bf16 %v2909_v50, %v2901_v53  ;;  %v1936_v53 = vadd.f32 %v5030_v44, %v5070_v34  ;;  %v1949_v50 = vadd.f32 %v5033_v63, %v5070_v34 }
 0x61f   : > { %2990 = vmatpush.bf16.msrb.mxu0 %v2916_v60 }
 0x620   : > { %3003 = vmatpush.bf16.msrb.mxu1 %v2917_v9  ;;  %v2821_v31 = vpop.f32.mrf.mxu2 }
 0x621   : > { %v2822_v45 = vadd.f32 %v2821_v31, %v5066_v26 }
 0x622   : > { %3630 = vmatmul.msk.bf16.vlgmr.msrb.gmra.mxu0 %vm2927_vm3, %v2920_v43 }
 0x623   : > { %v2835_v47 = vpop.f32.mrf.mxu3  ;;  %3631 = vmatmul.msk.bf16.vlgmr.msrb.gmra.mxu1 %vm2927_vm3, %v2920_v43  ;;  %v2898_v19 = vmax.f32 %v2822_v45, 0.0  ;;  %v2030_v45 = vmul.f32 10.0, %v1936_v53 }
 0x624   : > { %v2836_v0 = vadd.f32 %v2835_v47, %v5066_v26 }
 0x626   : > { %v2899_v54 = vmax.f32 %v2836_v0, 0.0 }
 0x627   : > { %v5348_v6 = vpop.permute.xlu1 %2924 }
 0x628   : > { %v2823_v11 = vpop.f32.mrf.mxu2 }
 0x629   : > { %v2824_v10 = vadd.f32 %v2823_v11, %v2774_v52 }
 0x62b   : > { %v2837_v4 = vpop.f32.mrf.mxu3  ;;  %v2906_v39 = vmax.f32 %v2824_v10, 0.0 }
 0x62c   : > { %v2838_v30 = vadd.f32 %v2837_v4, %v2774_v52 }
 0x62d   : > { %v2914_v2 = vpack.c.bf16 %v2906_v39, %v2898_v19  ;;  %v2031_v19 = vmul.f32 10.0, %v1949_v50 }
 0x62e   : > { %v2907_v18 = vmax.f32 %v2838_v30, 0.0 }
 0x62f   : > { %2964 = vmatpush.bf16.msra.mxu2 %v2914_v2 }
 0x630   : > { %v2915_v62 = vpack.c.bf16 %v2907_v18, %v2899_v54 }
 0x632   : > { %2977 = vmatpush.bf16.msra.mxu3 %v2915_v62  ;;  %3628 = vmatmul.msk.bf16.vlgmr.msra.gmra.mxu2 %vm2927_vm3, %v2920_v43 }
 0x635   : > { %3629 = vmatmul.msk.bf16.vlgmr.msra.gmra.mxu3 %vm2927_vm3, %v2920_v43 }
 0x640   : > { %v2877_v35 = vpop.f32.mrf.mxu2 }
 0x641   : > { %v2878_v8 = vadd.f32 %v2877_v35, %v5066_v26 }
 0x643   : > { %v2891_v3 = vpop.f32.mrf.mxu3  ;;  %v2902_v58 = vmax.f32 %v2878_v8, 0.0 }
 0x644   : > { %v2892_v49 = vadd.f32 %v2891_v3, %v5066_v26 }
 0x646   : > { %v2903_v21 = vmax.f32 %v2892_v49, 0.0 }
 0x648   : > { %v2879_v5 = vpop.f32.mrf.mxu2 }
 0x649   : > { %v2880_v23 = vadd.f32 %v2879_v5, %v2774_v52 }
 0x64b   : > { %v2893_v37 = vpop.f32.mrf.mxu3  ;;  %v2910_v14 = vmax.f32 %v2880_v23, 0.0 }
 0x64c   : > { %v2894_v56 = vadd.f32 %v2893_v37, %v2774_v52 }
 0x64d   : > { %v2918_v61 = vpack.c.bf16 %v2910_v14, %v2902_v58 }
 0x64e   : > { %v2911_v29 = vmax.f32 %v2894_v56, 0.0 }
 0x64f   : > { %3016 = vmatpush.bf16.msrb.mxu2 %v2918_v61 }
 0x650   : > { %v2919_v27 = vpack.c.bf16 %v2911_v29, %v2903_v21 }
 0x652   : > { %3029 = vmatpush.bf16.msrb.mxu3 %v2919_v27  ;;  %3632 = vmatmul.msk.bf16.vlgmr.msrb.gmra.mxu2 %vm2927_vm3, %v2920_v43 }
 0x655   : > { %3633 = vmatmul.msk.bf16.vlgmr.msrb.gmra.mxu3 %vm2927_vm3, %v2920_v43 }
 0x67f   : > { %v2940_v20 = vpop.f32.mrf.mxu0 }
 0x680   : > { %v2941_v26 = vadd.f32 %v2940_v20, %v5348_v6  ;;  %v2953_v48 = vpop.f32.mrf.mxu1 }
 0x681   : > { %v2954_v40 = vadd.f32 %v2953_v48, %v5348_v6 }
 0x682   : > { %v3634_v13 = vmul.f32 -1.442695, %v2941_v26 }
 0x683   : > { %v3635_v52 = vmul.f32 -1.442695, %v2954_v40 }
 0x684   : > { %3763 = vpow2.f32 %v3634_v13 }
 0x685   : > { %3765 = vpow2.f32 %v3635_v52 }
 0x687   : > { %v2942_v46 = vpop.f32.mrf.mxu0 }
 0x688   : > { %v2955_v33 = vpop.f32.mrf.mxu1 }
 0x68a   : > { %v3764_v25 = vpop.eup %3763 }
 0x68b   : > { %v3766_v38 = vpop.eup %3765  ;;  %v3059_v12 = vadd.f32 1.0, %v3764_v25 }
 0x68c   : > { %v3060_v17 = vadd.f32 1.0, %v3766_v38  ;;  %v1988_v38 = vadd.f32 %v5048_v41, %v5070_v34 }
 0x68d   : > { %3767 = vrcp.f32 %v3059_v12  ;;  %vm3072_vm4 = vweird.f32 %v3059_v12  ;;  %v3078_v36 = vand.u32 2147483648, %v3059_v12  ;;  %v3076_v59 = vand.u32 2147483647, %v3059_v12 }
 0x68e   : > { %3769 = vrcp.f32 %v3060_v17  ;;  %v3093_v55 = vand.u32 2147483648, %v3060_v17  ;;  %vm3087_vm6 = vweird.f32 %v3060_v17  ;;  %v3091_v32 = vand.u32 2147483647, %v3060_v17 }
 0x68f   : > { %v3079_v1 = vor.u32 1.1754944e-38, %v3078_v36  ;;  %vm3077_vm9 = vcmp.eq.f32.partialorder %v3076_v59, 8.507059e+37  ;;  %v5520_v36 = vld [vmem:[#allocation10_spill] sm:$0xff] }
 0x690   : > { %v3094_v7 = vor.u32 1.1754944e-38, %v3093_v55  ;;  %vm3092_vm11 = vcmp.eq.f32.partialorder %v3091_v32, 8.507059e+37  ;;  %v2034_v32 = vmul.f32 10.0, %v1988_v38 }
 0x693   : > { %v3768_v42 = vpop.eup %3767 }
 0x694   : > { %v3770_v28 = vpop.eup %3769  ;;  %v3068_v57 = vmul.f32 %v3768_v42, %v3059_v12  ;;  %vm3073_vm5 = vweird.f32 %v3768_v42 }
 0x695   : > { %v3083_v43 = vmul.f32 %v3770_v28, %v3060_v17  ;;  %vm3088_vm7 = vweird.f32 %v3770_v28  ;;  %vm3074_vm8 = vmor %vm3072_vm4, %vm3073_vm5 }
 0x696   : > { %v3069_v51 = vsub.f32 1.0, %v3068_v57  ;;  %vm3089_vm10 = vmor %vm3087_vm6, %vm3088_vm7 }
 0x697   : > { %v3084_v15 = vsub.f32 1.0, %v3083_v43  ;;  %v2001_v43 = vadd.f32 %v5520_v36, %v5070_v34 }
 0x698   : > { %v3070_v16 = vmul.f32 %v3768_v42, %v3069_v51 }
 0x699   : > { %v3085_v24 = vmul.f32 %v3770_v28, %v3084_v15  ;;  %v2035_v53 = vmul.f32 10.0, %v2001_v43 }
 0x69a   : > { %v3071_v22 = vadd.f32 %v3768_v42, %v3070_v16 }
 0x69b   : > { %v3086_v60 = vadd.f32 %v3770_v28, %v3085_v24 }
 0x69c   : > { %v3075_v9 = vsel %vm3074_vm8, %v3768_v42, %v3071_v22 }
 0x69d   : > { %v3080_v31 = vsel %vm3077_vm9, %v3079_v1, %v3075_v9  ;;  %v3090_v47 = vsel %vm3089_vm10, %v3770_v28, %v3086_v60 }
 0x69e   : > { %v3195_v0 = vrot.slane %v3080_v31, 7  ;;  %v3095_v11 = vsel %vm3092_vm11, %v3094_v7, %v3090_v47 }
 0x69f   : > { %v3196_v44 = vrot.slane %v3095_v11, 7  ;;  %v2992_v10 = vpop.f32.mrf.mxu0 }
 0x6a0   : > { %v3212_v4 = vsel %vm3211_vm12, %v2030_v45, %v3195_v0  ;;  %v2993_v54 = vadd.f32 %v2992_v10, %v5348_v6  ;;  %v3005_v30 = vpop.f32.mrf.mxu1 }
 0x6a1   : > { %v3221_v63 = vsel %vm3220_vm13, %v3212_v4, 0.0  ;;  %v3213_v39 = vsel %vm3211_vm12, %v2031_v19, %v3196_v44  ;;  %v3006_v18 = vadd.f32 %v3005_v30, %v5348_v6 }
 0x6a2   : > { %3229 = vst [vmem:[%s5362_s14] sm:$0xff] %v3221_v63  ;;  %v3222_v2 = vsel %vm3220_vm13, %v3213_v39, 0.0  ;;  %v3638_v62 = vmul.f32 -1.442695, %v2993_v54 }
 0x6a3   : > { %3230 = vst [vmem:[%s5362_s14 + $0x8] sm:$0xff] %v3222_v2  ;;  %v3639_v35 = vmul.f32 -1.442695, %v3006_v18 }
 0x6a4   : > { %3771 = vpow2.f32 %v3638_v62 }
 0x6a5   : > { %3773 = vpow2.f32 %v3639_v35 }
 0x6a7   : > { %v2994_v3 = vpop.f32.mrf.mxu0 }
 0x6a8   : > { %v3007_v8 = vpop.f32.mrf.mxu1  ;;  %v5521_v3 = vld [vmem:[#allocation11_spill] sm:$0xff] }
 0x6a9   : > { %v1962_v8 = vadd.f32 %v5521_v3, %v5070_v34 }
 0x6aa   : > { %v3772_v49 = vpop.eup %3771 }
 0x6ab   : > { %v3774_v5 = vpop.eup %3773  ;;  %v3063_v23 = vadd.f32 1.0, %v3772_v49 }
 0x6ac   : > { %v3064_v37 = vadd.f32 1.0, %v3774_v5 }
 0x6ad   : > { %3775 = vrcp.f32 %v3063_v23  ;;  %vm3132_vm14 = vweird.f32 %v3063_v23  ;;  %v3136_v21 = vand.u32 2147483647, %v3063_v23  ;;  %v3138_v29 = vand.u32 2147483648, %v3063_v23 }
 0x6ae   : > { %3777 = vrcp.f32 %v3064_v37  ;;  %vm3147_vm15 = vweird.f32 %v3064_v37  ;;  %v3153_v26 = vand.u32 2147483648, %v3064_v37  ;;  %v3151_v52 = vand.u32 2147483647, %v3064_v37 }
 0x6af   : > { %v3139_v12 = vor.u32 1.1754944e-38, %v3138_v29  ;;  %vm3137_vm3 = vcmp.eq.f32.partialorder %v3136_v21, 8.507059e+37  ;;  %v2032_v29 = vmul.f32 10.0, %v1962_v8 }
 0x6b0   : > { %v3154_v57 = vor.u32 1.1754944e-38, %v3153_v26  ;;  %vm3152_vm5 = vcmp.eq.f32.partialorder %v3151_v52, 8.507059e+37 }
 0x6b3   : > { %v3776_v56 = vpop.eup %3775 }
 0x6b4   : > { %v3778_v58 = vpop.eup %3777  ;;  %v3128_v14 = vmul.f32 %v3776_v56, %v3063_v23  ;;  %vm3133_vm0 = vweird.f32 %v3776_v56  ;;  %v5522_v23 = vld [vmem:[#allocation6_spill] sm:$0xff] }
 0x6b5   : > { %v3143_v61 = vmul.f32 %v3778_v58, %v3064_v37  ;;  %v2966_v27 = vpop.f32.mrf.mxu2  ;;  %vm3148_vm1 = vweird.f32 %v3778_v58  ;;  %vm3134_vm2 = vmor %vm3132_vm14, %vm3133_vm0  ;;  %v1975_v37 = vadd.f32 %v5522_v23, %v5070_v34 }
 0x6b6   : > { %v3129_v20 = vsub.f32 1.0, %v3128_v14  ;;  %v2967_v48 = vadd.f32 %v2966_v27, %v5348_v6  ;;  %vm3149_vm4 = vmor %vm3147_vm15, %vm3148_vm1 }
 0x6b7   : > { %v3144_v13 = vsub.f32 1.0, %v3143_v61 }
 0x6b8   : > { %v2979_v40 = vpop.f32.mrf.mxu3  ;;  %v3130_v33 = vmul.f32 %v3776_v56, %v3129_v20  ;;  %v3636_v25 = vmul.f32 -1.442695, %v2967_v48  ;;  %v2033_v20 = vmul.f32 10.0, %v1975_v37 }
 0x6b9   : > { %v2980_v46 = vadd.f32 %v2979_v40, %v5348_v6  ;;  %v3145_v17 = vmul.f32 %v3778_v58, %v3144_v13 }
 0x6ba   : > { %v3131_v28 = vadd.f32 %v3776_v56, %v3130_v33  ;;  %3779 = vpow2.f32 %v3636_v25 }
 0x6bb   : > { %v3637_v42 = vmul.f32 -1.442695, %v2980_v46  ;;  %v3146_v51 = vadd.f32 %v3778_v58, %v3145_v17 }
 0x6bc   : > { %v3135_v59 = vsel %vm3134_vm2, %v3776_v56, %v3131_v28 }
 0x6bd   : > { %3781 = vpow2.f32 %v3637_v42  ;;  %v3140_v41 = vsel %vm3137_vm3, %v3139_v12, %v3135_v59  ;;  %v3150_v55 = vsel %vm3149_vm4, %v3778_v58, %v3146_v51  ;;  %v2968_v15 = vpop.f32.mrf.mxu2 }
 0x6be   : > { %v3199_v16 = vrot.slane %v3140_v41, 7  ;;  %v3155_v1 = vsel %vm3152_vm5, %v3154_v57, %v3150_v55 }
 0x6bf   : > { %v3200_v22 = vrot.slane %v3155_v1, 7 }
 0x6c0   : > { %v2981_v24 = vpop.f32.mrf.mxu3  ;;  %v3780_v7 = vpop.eup %3779  ;;  %v3216_v50 = vsel %vm3211_vm12, %v2034_v32, %v3199_v16 }
 0x6c1   : > { %v3225_v9 = vsel %vm3220_vm13, %v3216_v50, 0.0  ;;  %v3217_v31 = vsel %vm3211_vm12, %v2035_v53, %v3200_v22  ;;  %v3061_v47 = vadd.f32 1.0, %v3780_v7 }
 0x6c2   : > { %3233 = vst [vmem:[%s5362_s14 + $0x20] sm:$0xff] %v3225_v9  ;;  %v3226_v45 = vsel %vm3220_vm13, %v3217_v31, 0.0 }
 0x6c3   : > { %v3782_v60 = vpop.eup %3781  ;;  %3234 = vst [vmem:[%s5362_s14 + $0x28] sm:$0xff] %v3226_v45  ;;  %3783 = vrcp.f32 %v3061_v47  ;;  %vm3102_vm6 = vweird.f32 %v3061_v47  ;;  %v3108_v10 = vand.u32 2147483648, %v3061_v47  ;;  %v3106_v30 = vand.u32 2147483647, %v3061_v47 }
 0x6c4   : > { %v3062_v0 = vadd.f32 1.0, %v3782_v60 }
 0x6c5   : > { %v3109_v62 = vor.u32 1.1754944e-38, %v3108_v10  ;;  %vm3107_vm11 = vcmp.eq.f32.partialorder %v3106_v30, 8.507059e+37  ;;  %v5524_v10 = vld [vmem:[#allocation14_spill] sm:$0xff] }
 0x6c6   : > { %3785 = vrcp.f32 %v3062_v0  ;;  %v3123_v63 = vand.u32 2147483648, %v3062_v0  ;;  %vm3117_vm8 = vweird.f32 %v3062_v0  ;;  %v3121_v18 = vand.u32 2147483647, %v3062_v0 }
 0x6c8   : > { %v3124_v5 = vor.u32 1.1754944e-38, %v3123_v63  ;;  %vm3122_vm15 = vcmp.eq.f32.partialorder %v3121_v18, 8.507059e+37 }
 0x6c9   : > { %v3784_v11 = vpop.eup %3783 }
 0x6ca   : > { %v3098_v44 = vmul.f32 %v3784_v11, %v3061_v47  ;;  %vm3103_vm7 = vweird.f32 %v3784_v11 }
 0x6cb   : > { %vm3104_vm10 = vmor %vm3102_vm6, %vm3103_vm7 }
 0x6cc   : > { %v3786_v19 = vpop.eup %3785  ;;  %v3099_v54 = vsub.f32 1.0, %v3098_v44 }
 0x6cd   : > { %v3113_v4 = vmul.f32 %v3786_v19, %v3062_v0  ;;  %vm3118_vm9 = vweird.f32 %v3786_v19  ;;  %v5523_v0 = vld [vmem:[#allocation7_spill] sm:$0xff] }
 0x6ce   : > { %v3100_v2 = vmul.f32 %v3784_v11, %v3099_v54  ;;  %vm3119_vm14 = vmor %vm3117_vm8, %vm3118_vm9 }
 0x6cf   : > { %v3114_v39 = vsub.f32 1.0, %v3113_v4  ;;  %v2037_v4 = vmul.f32 10.0, %v5524_v10 }
 0x6d0   : > { %v3101_v49 = vadd.f32 %v3784_v11, %v3100_v2 }
 0x6d1   : > { %v3115_v35 = vmul.f32 %v3786_v19, %v3114_v39 }
 0x6d2   : > { %v3105_v58 = vsel %vm3104_vm10, %v3784_v11, %v3101_v49  ;;  %v2036_v11 = vmul.f32 10.0, %v5523_v0 }
 0x6d3   : > { %v3116_v56 = vadd.f32 %v3786_v19, %v3115_v35  ;;  %v3110_v14 = vsel %vm3107_vm11, %v3109_v62, %v3105_v58 }
 0x6d4   : > { %v3197_v61 = vrot.slane %v3110_v14, 7 }
 0x6d5   : > { %v3120_v21 = vsel %vm3119_vm14, %v3786_v19, %v3116_v56  ;;  %v3018_v48 = vpop.f32.mrf.mxu2 }
 0x6d6   : > { %v3125_v27 = vsel %vm3122_vm15, %v3124_v5, %v3120_v21  ;;  %v3214_v40 = vsel %vm3211_vm12, %v2032_v29, %v3197_v61  ;;  %v3019_v13 = vadd.f32 %v3018_v48, %v5348_v6 }
 0x6d7   : > { %v3198_v26 = vrot.slane %v3125_v27, 7  ;;  %v3223_v34 = vsel %vm3220_vm13, %v3214_v40, 0.0 }
 0x6d8   : > { %v3031_v52 = vpop.f32.mrf.mxu3  ;;  %3231 = vst [vmem:[%s5362_s14 + $0x10] sm:$0xff] %v3223_v34  ;;  %v3640_v38 = vmul.f32 -1.442695, %v3019_v13 }
 0x6d9   : > { %v3215_v46 = vsel %vm3211_vm12, %v2033_v20, %v3198_v26  ;;  %v3032_v33 = vadd.f32 %v3031_v52, %v5348_v6 }
 0x6da   : > { %v3224_v25 = vsel %vm3220_vm13, %v3215_v46, 0.0  ;;  %3787 = vpow2.f32 %v3640_v38 }
 0x6db   : > { %3232 = vst [vmem:[%s5362_s14 + $0x18] sm:$0xff] %v3224_v25  ;;  %v3641_v12 = vmul.f32 -1.442695, %v3032_v33 }
 0x6dd   : > { %3789 = vpow2.f32 %v3641_v12  ;;  %v3020_v17 = vpop.f32.mrf.mxu2 }
 0x6e0   : > { %v3033_v42 = vpop.f32.mrf.mxu3  ;;  %v3788_v28 = vpop.eup %3787 }
 0x6e1   : > { %v3065_v36 = vadd.f32 1.0, %v3788_v28 }
 0x6e3   : > { %v3790_v57 = vpop.eup %3789  ;;  %3791 = vrcp.f32 %v3065_v36  ;;  %v3168_v15 = vand.u32 2147483648, %v3065_v36  ;;  %v3166_v1 = vand.u32 2147483647, %v3065_v36  ;;  %vm3162_vm2 = vweird.f32 %v3065_v36 }
 0x6e4   : > { %v3066_v43 = vadd.f32 1.0, %v3790_v57 }
 0x6e5   : > { %v3169_v50 = vor.u32 1.1754944e-38, %v3168_v15  ;;  %vm3167_vm5 = vcmp.eq.f32.partialorder %v3166_v1, 8.507059e+37 }
 0x6e6   : > { %3793 = vrcp.f32 %v3066_v43  ;;  %v3183_v24 = vand.u32 2147483648, %v3066_v43  ;;  %v3181_v22 = vand.u32 2147483647, %v3066_v43  ;;  %vm3177_vm4 = vweird.f32 %v3066_v43 }
 0x6e8   : > { %v3184_v31 = vor.u32 1.1754944e-38, %v3183_v24  ;;  %vm3182_vm7 = vcmp.eq.f32.partialorder %v3181_v22, 8.507059e+37 }
 0x6e9   : > { %v3792_v51 = vpop.eup %3791 }
 0x6ea   : > { %v3158_v6 = vmul.f32 %v3792_v51, %v3065_v36  ;;  %vm3163_vm0 = vweird.f32 %v3792_v51 }
 0x6eb   : > { %vm3164_vm3 = vmor %vm3162_vm2, %vm3163_vm0 }
 0x6ec   : > { %v3794_v59 = vpop.eup %3793  ;;  %v3159_v55 = vsub.f32 1.0, %v3158_v6 }
 0x6ed   : > { %v3173_v41 = vmul.f32 %v3794_v59, %v3066_v43  ;;  %vm3178_vm1 = vweird.f32 %v3794_v59 }
 0x6ee   : > { %v3160_v16 = vmul.f32 %v3792_v51, %v3159_v55  ;;  %vm3179_vm6 = vmor %vm3177_vm4, %vm3178_vm1 }
 0x6ef   : > { %v3174_v32 = vsub.f32 1.0, %v3173_v41 }
 0x6f0   : > { %v3161_v7 = vadd.f32 %v3792_v51, %v3160_v16 }
 0x6f1   : > { %v3175_v53 = vmul.f32 %v3794_v59, %v3174_v32 }
 0x6f2   : > { %v3165_v9 = vsel %vm3164_vm3, %v3792_v51, %v3161_v7 }
 0x6f3   : > { %v3176_v60 = vadd.f32 %v3794_v59, %v3175_v53  ;;  %v3170_v47 = vsel %vm3167_vm5, %v3169_v50, %v3165_v9 }
 0x6f4   : > { %v3201_v19 = vrot.slane %v3170_v47, 7 }
 0x6f5   : > { %v3180_v45 = vsel %vm3179_vm6, %v3794_v59, %v3176_v60 }
 0x6f6   : > { %v3185_v44 = vsel %vm3182_vm7, %v3184_v31, %v3180_v45  ;;  %v3218_v30 = vsel %vm3211_vm12, %v2036_v11, %v3201_v19 }
 0x6f7   : > { %v3202_v54 = vrot.slane %v3185_v44, 7  ;;  %v3227_v63 = vsel %vm3220_vm13, %v3218_v30, 0.0 }
 0x6f8   : > { %3235 = vst [vmem:[%s5362_s14 + $0x30] sm:$0xff] %v3227_v63 }
 0x6f9   : > { %v3219_v39 = vsel %vm3211_vm12, %v2037_v4, %v3202_v54 }
 0x6fa   : > { %v3228_v18 = vsel %vm3220_vm13, %v3219_v39, 0.0 }
 0x6fb   : > { %3236 = vst [vmem:[%s5362_s14 + $0x38] sm:$0xff] %v3228_v18 }
 0x6fc   : > { %3830 = shalt.err (!%p3827_p5)
}
 0x6fd   : > { %3686 = dma.vmem_to_hbm [thread:$0]  (%p3940_p6), %s3252_s19, 1024, %s3254_s28, %s3238_s29  }
 0x6fe PF: > { %s3265_s8 = sand.u32 1, %s3853_s15   ;;  %p3689_p7 = pnand %p3321_p9, %p3944_p8 }
 0x6ff   : > { %s3266_s12 = scalar_lea.sflag [#allocation4], %s3265_s8 }
 0x700   : > { %p3690_p10 = pneg %p3689_p7 }
 0x702   : > { %3848 = dma.done.wait (%p3690_p10), %s3266_s12, 1024  }
 0x703   : > { %3850 = vsyncadd (%p3690_p10), %s3266_s12, 4294966272  ;;  %p14_p11 = scmp.ge.s32.totalorder %s3925_s21, 4   ;;  %s5525_s15 = smov %s3857_s16 }
 0x704   : > { %s5526_s16 = smov %s3861_s17  ;;  %s5527_s17 = smov %s3938_s24 }
 0x705   : > { %s5528_s18 = smov %s3925_s21  ;;  %16 = sbr.rel (!%p14_p11) target bundleno = 3 (0x3), region = 99 }
 0x70a   :  { %3272 = vsyncpa [#allocation4], 1 }
 0x70b   :  { %3274 = vsyncpa [#allocation4 + $0x1], 1 }

</bundles_post_ra>
